<compile_context>
chip_gen: v7x
topology: tpu7x:2x2x1
jax: 0.10.0
libtpu: 0.0.40
codegen_flags: <defaults>
</compile_context>

<pallas_src>
import math
import functools
from functools import partial

import jax
import jax.numpy as jnp
from jax import lax
from jax.experimental import pallas as pl
from jax.experimental.pallas import tpu as pltpu


_LN_EPS = 1e-5  # torch.nn.LayerNorm default


# --------------------------- in-kernel helpers -------------------------------

def _dot_w(x_f32, w_bf16):
    """activation (f32) @ pre-cast bf16 weight, f32 accumulation on the MXU."""
    return jnp.dot(x_f32.astype(jnp.bfloat16), w_bf16,
                   preferred_element_type=jnp.float32)


def _dot_nt(a, b):
    """a @ b.T (contract last dims) without materializing a transpose."""
    return lax.dot_general(a.astype(jnp.bfloat16), b.astype(jnp.bfloat16),
                           dimension_numbers=(((1,), (1,)), ((), ())),
                           preferred_element_type=jnp.float32)


def _gelu(x):
    # exact GELU (matches torch.nn.functional.gelu default)
    return 0.5 * x * (1.0 + lax.erf(x * (1.0 / math.sqrt(2.0))))


def _layernorm(x, g, b):
    mu = jnp.mean(x, axis=-1, keepdims=True)
    var = jnp.mean(jnp.square(x - mu), axis=-1, keepdims=True)
    return (x - mu) * lax.rsqrt(var + _LN_EPS) * g + b


def _softmax_rows(s):
    m = jnp.max(s, axis=-1, keepdims=True)
    p = jnp.exp(s - m)
    denom = jnp.sum(p, axis=-1, keepdims=True)
    return p * pl.reciprocal(denom, approx=True)   # EUP reciprocal, ~free slot


def _mha_proj(q, k, v, wo_bf16, n_heads, causal):
    """Multi-head attention fused with the output projection.

    q: (L, D) f32, k/v: (S, D) f32, wo_bf16: (D, D) bf16 (already loaded).
    Per head: softmax(q_h k_h^T / sqrt(E)) v_h  @ wo[h*E:(h+1)*E, :]
    accumulated directly into the (L, D) result -> no per-head concat.
    """
    L, D = q.shape
    S = k.shape[0]
    E = D // n_heads
    scale = 1.0 / math.sqrt(E)
    if causal:
        row = lax.broadcasted_iota(jnp.int32, (L, S), 0)
        col = lax.broadcasted_iota(jnp.int32, (L, S), 1)
        keep = col <= row                                # TriangularCausalMask
    acc = jnp.zeros((L, D), jnp.float32)
    for h in range(n_heads):
        sl = slice(h * E, (h + 1) * E)
        s = _dot_nt(q[:, sl], k[:, sl]) * scale          # (L, S)
        if causal:
            s = jnp.where(keep, s, jnp.float32(-1e30))   # finite mask (NaN-safe)
        p = _softmax_rows(s)
        ctx = jnp.dot(p.astype(jnp.bfloat16), v[:, sl].astype(jnp.bfloat16),
                      preferred_element_type=jnp.float32)        # (L, E)
        acc = acc + jnp.dot(ctx.astype(jnp.bfloat16), wo_bf16[sl, :],
                            preferred_element_type=jnp.float32)  # (L, D)
    return acc


def _encoder_layer(x, p, n_heads):
    (wqkv, bqkv, wo, bo, n1g, n1b, w1, b1, w2, b2, n2g, n2b) = p
    D = x.shape[-1]
    qkv = _dot_w(x, wqkv[...]) + bqkv[...]                       # (L, 3D)
    attn = _mha_proj(qkv[:, :D], qkv[:, D:2 * D], qkv[:, 2 * D:],
                     wo[...], n_heads, causal=False) + bo[...]
    x = _layernorm(x + attn, n1g[...], n1b[...])
    h = _gelu(_dot_w(x, w1[...]) + b1[...])
    y = _dot_w(h, w2[...]) + b2[...]
    return _layernorm(x + y, n2g[...], n2b[...])


def _decoder_layer(x, cross, p, n_heads):
    (s_wqkv, s_bqkv, s_wo, s_bo,
     c_wq, c_bq, c_wkv, c_bkv, c_wo, c_bo,
     n1g, n1b, n2g, n2b, n3g, n3b,
     w1, b1, w2, b2) = p
    D = x.shape[-1]

    # masked (causal) self-attention + residual + LN
    qkv = _dot_w(x, s_wqkv[...]) + s_bqkv[...]
    attn = _mha_proj(qkv[:, :D], qkv[:, D:2 * D], qkv[:, 2 * D:],
                     s_wo[...], n_heads, causal=True) + s_bo[...]
    x = _layernorm(x + attn, n1g[...], n1b[...])

    # cross-attention (fused KV projection) + residual + LN
    q = _dot_w(x, c_wq[...]) + c_bq[...]
    kv = _dot_w(cross, c_wkv[...]) + c_bkv[...]
    attn = _mha_proj(q, kv[:, :D], kv[:, D:],
                     c_wo[...], n_heads, causal=False) + c_bo[...]
    x = _layernorm(x + attn, n2g[...], n2b[...])

    # FFN + residual + LN
    h = _gelu(_dot_w(x, w1[...]) + b1[...])
    y = _dot_w(h, w2[...]) + b2[...]
    return _layernorm(x + y, n3g[...], n3b[...])


# ------------------------------ fused kernel ----------------------------------

_ENC_REFS = 12
_DEC_REFS = 20


def _transformer_kernel(*refs, n_heads, e_layers, d_layers):
    it = iter(refs)
    enc_win_ref = next(it)
    dec_win_ref = next(it)
    enc_emb_w = next(it)
    pe_enc = next(it)
    dec_emb_w = next(it)
    pe_dec = next(it)
    enc_layer_refs = [[next(it) for _ in range(_ENC_REFS)] for _ in range(e_layers)]
    enc_ng = next(it)
    enc_nb = next(it)
    dec_layer_refs = [[next(it) for _ in range(_DEC_REFS)] for _ in range(d_layers)]
    dec_ng = next(it)
    dec_nb = next(it)
    proj_w = next(it)
    proj_b = next(it)
    enc_out_ref = next(it)
    dec_out_ref = next(it)
    out_ref = next(it)

    # ---- DataEmbedding: Conv1d(k=3, circular, no bias) as im2col matmul + PE
    x = _dot_w(enc_win_ref[0].astype(jnp.float32), enc_emb_w[...]) + pe_enc[...]
    y = _dot_w(dec_win_ref[0].astype(jnp.float32), dec_emb_w[...]) + pe_dec[...]

    # ---- Encoder stack + final LayerNorm
    for p in enc_layer_refs:
        x = _encoder_layer(x, p, n_heads)
    x = _layernorm(x, enc_ng[...], enc_nb[...])
    enc_out_ref[0] = x.astype(enc_out_ref.dtype)

    # ---- Decoder stack + final LayerNorm
    for p in dec_layer_refs:
        y = _decoder_layer(y, x, p, n_heads)
    y = _layernorm(y, dec_ng[...], dec_nb[...])
    dec_out_ref[0] = y.astype(dec_out_ref.dtype)

    # ---- output projection (lane-dense padded to 128; sliced outside)
    out_ref[0] = (_dot_w(y, proj_w[...]) + proj_b[...]).astype(out_ref.dtype)


# ------------------------------ wrappers ---------------------------------------

@functools.lru_cache(maxsize=None)
def positional_encoding(L, d_model):
    position = jnp.arange(L, dtype=jnp.float32)[:, None]
    div_term = jnp.exp(jnp.arange(0, d_model, 2, dtype=jnp.float32)
                       * (-math.log(10000.0) / d_model))
    pe = jnp.zeros((L, d_model), jnp.float32)
    pe = pe.at[:, 0::2].set(jnp.sin(position * div_term))
    pe = pe.at[:, 1::2].set(jnp.cos(position * div_term)[:, : d_model // 2])
    return pe


def _im2col_circular(x):
    """(B, L, C) -> (B, L, 3C) circular-padded k=3 windows (tiny prologue)."""
    B, L, C = x.shape
    xp = jnp.pad(x, ((0, 0), (1, 1), (0, 0)), mode="wrap")
    return jnp.concatenate([xp[:, k:k + L, :] for k in range(3)], axis=-1)


def transformer_base_forward(params, x_enc, x_dec, n_heads):
    """Whole Transformer_base forward as ONE fused pallas_call."""
    d_model = params["enc_emb_w"].shape[1]
    B, Le, _ = x_enc.shape
    _, Ld, _ = x_dec.shape
    e_layers = len(params["enc_layers"])
    d_layers = len(params["dec_layers"])
    c_out = params["proj_w"].shape[1]
    pad_out = max(128, -(-c_out // 128) * 128)   # lane-dense output width

    pe_enc = positional_encoding(Le, d_model)
    pe_dec = positional_encoding(Ld, d_model)
    enc_win = _im2col_circular(x_enc)
    dec_win = _im2col_circular(x_dec)

    bf16 = lambda a: a.astype(jnp.bfloat16)

    proj_w_p = jnp.zeros((d_model, pad_out), jnp.bfloat16).at[:, :c_out].set(
        bf16(params["proj_w"]))
    proj_b_p = jnp.zeros((1, pad_out), jnp.float32).at[:, :c_out].set(
        params["proj_b"])

    args, specs = [], []

    def add_batched(a, blk):
        args.append(a)
        specs.append(pl.BlockSpec(blk, lambda b: (b, 0, 0)))

    def add_full(a):
        args.append(a)
        specs.append(pl.BlockSpec(a.shape, lambda b, _nd=a.ndim: (0,) * _nd))

    # inputs (order MUST match the kernel's parse order)
    add_batched(enc_win, (1, Le, enc_win.shape[-1]))
    add_batched(dec_win, (1, Ld, dec_win.shape[-1]))
    add_full(bf16(params["enc_emb_w"]))
    add_full(pe_enc)
    add_full(bf16(params["dec_emb_w"]))
    add_full(pe_dec)

    for lp in params["enc_layers"]:
        add_full(bf16(lp["wqkv"])); add_full(lp["bqkv"])
        add_full(bf16(lp["wo"]));   add_full(lp["bo"])
        add_full(lp["norm1_g"]);    add_full(lp["norm1_b"])
        add_full(bf16(lp["w1"]));   add_full(lp["b1"])
        add_full(bf16(lp["w2"]));   add_full(lp["b2"])
        add_full(lp["norm2_g"]);    add_full(lp["norm2_b"])
    add_full(params["enc_norm_g"]); add_full(params["enc_norm_b"])

    for lp in params["dec_layers"]:
        sa, ca = lp["self_attn"], lp["cross_attn"]
        add_full(bf16(sa["wqkv"])); add_full(sa["bqkv"])
        add_full(bf16(sa["wo"]));   add_full(sa["bo"])
        add_full(bf16(ca["wq"]));   add_full(ca["bq"])
        add_full(bf16(ca["wkv"]));  add_full(ca["bkv"])
        add_full(bf16(ca["wo"]));   add_full(ca["bo"])
        add_full(lp["norm1_g"]);    add_full(lp["norm1_b"])
        add_full(lp["norm2_g"]);    add_full(lp["norm2_b"])
        add_full(lp["norm3_g"]);    add_full(lp["norm3_b"])
        add_full(bf16(lp["w1"]));   add_full(lp["b1"])
        add_full(bf16(lp["w2"]));   add_full(lp["b2"])
    add_full(params["dec_norm_g"]); add_full(params["dec_norm_b"])
    add_full(proj_w_p); add_full(proj_b_p)

    out_shape = (jax.ShapeDtypeStruct((B, Le, d_model), jnp.float32),
                 jax.ShapeDtypeStruct((B, Ld, d_model), jnp.float32),
                 jax.ShapeDtypeStruct((B, Ld, pad_out), jnp.float32))
    out_specs = (pl.BlockSpec((1, Le, d_model), lambda b: (b, 0, 0)),
                 pl.BlockSpec((1, Ld, d_model), lambda b: (b, 0, 0)),
                 pl.BlockSpec((1, Ld, pad_out), lambda b: (b, 0, 0)))

    enc_out, dec_out, proj_out = pl.pallas_call(
        partial(_transformer_kernel, n_heads=n_heads,
                e_layers=e_layers, d_layers=d_layers),
        grid=(B,),
        out_shape=out_shape,
        in_specs=specs,
        out_specs=out_specs,
        compiler_params=pltpu.CompilerParams(
            dimension_semantics=("parallel",),     # v7x: split batch across 2 TCs
            vmem_limit_bytes=32 * 1024 * 1024),
    )(*args)

    return enc_out, dec_out, proj_out[:, :, :c_out]


# ------------------------------ parameter init --------------------------------

def _dense(key, din, dout, scale=0.05):
    return scale * jax.random.normal(key, (din, dout), jnp.float32)


def _zeros(shape):
    return jnp.zeros(shape, jnp.float32)


def _ones(shape):
    return jnp.ones(shape, jnp.float32)


def _init_self_attn(key, d_model):
    k1, k2 = jax.random.split(key, 2)
    # wq/wk/wv fused into one (d_model, 3*d_model) weight
    return dict(wqkv=_dense(k1, d_model, 3 * d_model), bqkv=_zeros((1, 3 * d_model)),
                wo=_dense(k2, d_model, d_model), bo=_zeros((1, d_model)))


def _init_cross_attn(key, d_model):
    k1, k2, k3 = jax.random.split(key, 3)
    # wk/wv fused into one (d_model, 2*d_model) weight
    return dict(wq=_dense(k1, d_model, d_model), bq=_zeros((1, d_model)),
                wkv=_dense(k2, d_model, 2 * d_model), bkv=_zeros((1, 2 * d_model)),
                wo=_dense(k3, d_model, d_model), bo=_zeros((1, d_model)))


def _init_enc_layer(key, d_model, d_ff):
    k1, k2, k3 = jax.random.split(key, 3)
    layer = _init_self_attn(k1, d_model)
    layer.update(w1=_dense(k2, d_model, d_ff), b1=_zeros((1, d_ff)),
                 w2=_dense(k3, d_ff, d_model), b2=_zeros((1, d_model)),
                 norm1_g=_ones((1, d_model)), norm1_b=_zeros((1, d_model)),
                 norm2_g=_ones((1, d_model)), norm2_b=_zeros((1, d_model)))
    return layer


def _init_dec_layer(key, d_model, d_ff):
    k1, k2, k3, k4 = jax.random.split(key, 4)
    return dict(self_attn=_init_self_attn(k1, d_model),
                cross_attn=_init_cross_attn(k2, d_model),
                w1=_dense(k3, d_model, d_ff), b1=_zeros((1, d_ff)),
                w2=_dense(k4, d_ff, d_model), b2=_zeros((1, d_model)),
                norm1_g=_ones((1, d_model)), norm1_b=_zeros((1, d_model)),
                norm2_g=_ones((1, d_model)), norm2_b=_zeros((1, d_model)),
                norm3_g=_ones((1, d_model)), norm3_b=_zeros((1, d_model)))


def init_model_params(key, enc_in, dec_in, c_out, d_model, e_layers, d_layers, d_ff):
    keys = jax.random.split(key, 3 + e_layers + d_layers)
    # Conv1d weight (d_model, c_in, 3) permuted to (3, c_in, d_model) and flattened.
    enc_emb_w = _dense(keys[0], 3 * enc_in, d_model)
    dec_emb_w = _dense(keys[1], 3 * dec_in, d_model)
    enc_layers = [_init_enc_layer(keys[3 + i], d_model, d_ff) for i in range(e_layers)]
    dec_layers = [_init_dec_layer(keys[3 + e_layers + i], d_model, d_ff)
                  for i in range(d_layers)]
    return dict(enc_emb_w=enc_emb_w, dec_emb_w=dec_emb_w,
                enc_layers=enc_layers, dec_layers=dec_layers,
                enc_norm_g=_ones((1, d_model)), enc_norm_b=_zeros((1, d_model)),
                dec_norm_g=_ones((1, d_model)), dec_norm_b=_zeros((1, d_model)),
                proj_w=_dense(keys[2], d_model, c_out),
                proj_b=_zeros((1, c_out)))


# ----------------------------------- main --------------------------------------

if __name__ == "__main__":
    # nn.Module defaults: d_model=128, n_heads=4, e_layers=2, d_layers=1, d_ff=256
    enc_in, dec_in, c_out = 4, 4, 4
    d_model, n_heads, e_layers, d_layers, d_ff = 128, 4, 2, 1, 256
    B, L_enc, L_dec = 2, 8, 8

    key = jax.random.PRNGKey(0)
    kp, ke, kd = jax.random.split(key, 3)
    params = init_model_params(kp, enc_in, dec_in, c_out,
                               d_model, e_layers, d_layers, d_ff)
    x_enc = jax.random.normal(ke, (B, L_enc, enc_in), jnp.float32)
    x_dec = jax.random.normal(kd, (B, L_dec, dec_in), jnp.float32)

    fwd = jax.jit(partial(transformer_base_forward, n_heads=n_heads))
    enc_out, dec_out, output = fwd(params, x_enc, x_dec)
    jax.block_until_ready((enc_out, dec_out, output))

    assert enc_out.shape == (B, L_enc, d_model)
    assert dec_out.shape == (B, L_dec, d_model)
    assert output.shape == (B, L_dec, c_out)
    assert bool(jnp.all(jnp.isfinite(enc_out)))
    assert bool(jnp.all(jnp.isfinite(dec_out)))
    assert bool(jnp.all(jnp.isfinite(output)))
    print("KERNEL_OK")
</pallas_src>

<mosaic_0001>
module attributes {stable_mosaic.version = 11 : i64} {
  func.func @_transformer_kernel(%arg0: i32, %arg1: memref<1x8x12xf32, #tpu.memory_space<vmem>>, %arg2: memref<1x8x12xf32, #tpu.memory_space<vmem>>, %arg3: memref<12x128xbf16, #tpu.memory_space<vmem>>, %arg4: memref<8x128xf32, #tpu.memory_space<vmem>>, %arg5: memref<12x128xbf16, #tpu.memory_space<vmem>>, %arg6: memref<8x128xf32, #tpu.memory_space<vmem>>, %arg7: memref<128x384xbf16, #tpu.memory_space<vmem>>, %arg8: memref<1x384xf32, #tpu.memory_space<vmem>>, %arg9: memref<128x128xbf16, #tpu.memory_space<vmem>>, %arg10: memref<1x128xf32, #tpu.memory_space<vmem>>, %arg11: memref<1x128xf32, #tpu.memory_space<vmem>>, %arg12: memref<1x128xf32, #tpu.memory_space<vmem>>, %arg13: memref<128x256xbf16, #tpu.memory_space<vmem>>, %arg14: memref<1x256xf32, #tpu.memory_space<vmem>>, %arg15: memref<256x128xbf16, #tpu.memory_space<vmem>>, %arg16: memref<1x128xf32, #tpu.memory_space<vmem>>, %arg17: memref<1x128xf32, #tpu.memory_space<vmem>>, %arg18: memref<1x128xf32, #tpu.memory_space<vmem>>, %arg19: memref<128x384xbf16, #tpu.memory_space<vmem>>, %arg20: memref<1x384xf32, #tpu.memory_space<vmem>>, %arg21: memref<128x128xbf16, #tpu.memory_space<vmem>>, %arg22: memref<1x128xf32, #tpu.memory_space<vmem>>, %arg23: memref<1x128xf32, #tpu.memory_space<vmem>>, %arg24: memref<1x128xf32, #tpu.memory_space<vmem>>, %arg25: memref<128x256xbf16, #tpu.memory_space<vmem>>, %arg26: memref<1x256xf32, #tpu.memory_space<vmem>>, %arg27: memref<256x128xbf16, #tpu.memory_space<vmem>>, %arg28: memref<1x128xf32, #tpu.memory_space<vmem>>, %arg29: memref<1x128xf32, #tpu.memory_space<vmem>>, %arg30: memref<1x128xf32, #tpu.memory_space<vmem>>, %arg31: memref<1x128xf32, #tpu.memory_space<vmem>>, %arg32: memref<1x128xf32, #tpu.memory_space<vmem>>, %arg33: memref<128x384xbf16, #tpu.memory_space<vmem>>, %arg34: memref<1x384xf32, #tpu.memory_space<vmem>>, %arg35: memref<128x128xbf16, #tpu.memory_space<vmem>>, %arg36: memref<1x128xf32, #tpu.memory_space<vmem>>, %arg37: memref<128x128xbf16, #tpu.memory_space<vmem>>, %arg38: memref<1x128xf32, #tpu.memory_space<vmem>>, %arg39: memref<128x256xbf16, #tpu.memory_space<vmem>>, %arg40: memref<1x256xf32, #tpu.memory_space<vmem>>, %arg41: memref<128x128xbf16, #tpu.memory_space<vmem>>, %arg42: memref<1x128xf32, #tpu.memory_space<vmem>>, %arg43: memref<1x128xf32, #tpu.memory_space<vmem>>, %arg44: memref<1x128xf32, #tpu.memory_space<vmem>>, %arg45: memref<1x128xf32, #tpu.memory_space<vmem>>, %arg46: memref<1x128xf32, #tpu.memory_space<vmem>>, %arg47: memref<1x128xf32, #tpu.memory_space<vmem>>, %arg48: memref<1x128xf32, #tpu.memory_space<vmem>>, %arg49: memref<128x256xbf16, #tpu.memory_space<vmem>>, %arg50: memref<1x256xf32, #tpu.memory_space<vmem>>, %arg51: memref<256x128xbf16, #tpu.memory_space<vmem>>, %arg52: memref<1x128xf32, #tpu.memory_space<vmem>>, %arg53: memref<1x128xf32, #tpu.memory_space<vmem>>, %arg54: memref<1x128xf32, #tpu.memory_space<vmem>>, %arg55: memref<128x128xbf16, #tpu.memory_space<vmem>>, %arg56: memref<1x128xf32, #tpu.memory_space<vmem>>, %arg57: memref<1x8x128xf32, #tpu.memory_space<vmem>>, %arg58: memref<1x8x128xf32, #tpu.memory_space<vmem>>, %arg59: memref<1x8x128xf32, #tpu.memory_space<vmem>>) attributes {dimension_semantics = [#tpu.dimension_semantics<parallel>], iteration_bounds = array<i64: 2>, scalar_prefetch = 0 : i64, scratch_operands = 0 : i64, tpu.core_type = #tpu.core_type<tc>, window_params = [{transform_indices = @transform_0, window_bounds = array<i64: 1, 8, 12>}, {transform_indices = @transform_1, window_bounds = array<i64: 1, 8, 12>}, {pipeline_mode = #tpu.pipeline_mode<synchronous>, transform_indices = @transform_2, window_bounds = array<i64: 12, 128>}, {pipeline_mode = #tpu.pipeline_mode<synchronous>, transform_indices = @transform_3, window_bounds = array<i64: 8, 128>}, {pipeline_mode = #tpu.pipeline_mode<synchronous>, transform_indices = @transform_4, window_bounds = array<i64: 12, 128>}, {pipeline_mode = #tpu.pipeline_mode<synchronous>, transform_indices = @transform_5, window_bounds = array<i64: 8, 128>}, {pipeline_mode = #tpu.pipeline_mode<synchronous>, transform_indices = @transform_6, window_bounds = array<i64: 128, 384>}, {pipeline_mode = #tpu.pipeline_mode<synchronous>, transform_indices = @transform_7, window_bounds = array<i64: 1, 384>}, {pipeline_mode = #tpu.pipeline_mode<synchronous>, transform_indices = @transform_8, window_bounds = array<i64: 128, 128>}, {pipeline_mode = #tpu.pipeline_mode<synchronous>, transform_indices = @transform_9, window_bounds = array<i64: 1, 128>}, {pipeline_mode = #tpu.pipeline_mode<synchronous>, transform_indices = @transform_10, window_bounds = array<i64: 1, 128>}, {pipeline_mode = #tpu.pipeline_mode<synchronous>, transform_indices = @transform_11, window_bounds = array<i64: 1, 128>}, {pipeline_mode = #tpu.pipeline_mode<synchronous>, transform_indices = @transform_12, window_bounds = array<i64: 128, 256>}, {pipeline_mode = #tpu.pipeline_mode<synchronous>, transform_indices = @transform_13, window_bounds = array<i64: 1, 256>}, {pipeline_mode = #tpu.pipeline_mode<synchronous>, transform_indices = @transform_14, window_bounds = array<i64: 256, 128>}, {pipeline_mode = #tpu.pipeline_mode<synchronous>, transform_indices = @transform_15, window_bounds = array<i64: 1, 128>}, {pipeline_mode = #tpu.pipeline_mode<synchronous>, transform_indices = @transform_16, window_bounds = array<i64: 1, 128>}, {pipeline_mode = #tpu.pipeline_mode<synchronous>, transform_indices = @transform_17, window_bounds = array<i64: 1, 128>}, {pipeline_mode = #tpu.pipeline_mode<synchronous>, transform_indices = @transform_18, window_bounds = array<i64: 128, 384>}, {pipeline_mode = #tpu.pipeline_mode<synchronous>, transform_indices = @transform_19, window_bounds = array<i64: 1, 384>}, {pipeline_mode = #tpu.pipeline_mode<synchronous>, transform_indices = @transform_20, window_bounds = array<i64: 128, 128>}, {pipeline_mode = #tpu.pipeline_mode<synchronous>, transform_indices = @transform_21, window_bounds = array<i64: 1, 128>}, {pipeline_mode = #tpu.pipeline_mode<synchronous>, transform_indices = @transform_22, window_bounds = array<i64: 1, 128>}, {pipeline_mode = #tpu.pipeline_mode<synchronous>, transform_indices = @transform_23, window_bounds = array<i64: 1, 128>}, {pipeline_mode = #tpu.pipeline_mode<synchronous>, transform_indices = @transform_24, window_bounds = array<i64: 128, 256>}, {pipeline_mode = #tpu.pipeline_mode<synchronous>, transform_indices = @transform_25, window_bounds = array<i64: 1, 256>}, {pipeline_mode = #tpu.pipeline_mode<synchronous>, transform_indices = @transform_26, window_bounds = array<i64: 256, 128>}, {pipeline_mode = #tpu.pipeline_mode<synchronous>, transform_indices = @transform_27, window_bounds = array<i64: 1, 128>}, {pipeline_mode = #tpu.pipeline_mode<synchronous>, transform_indices = @transform_28, window_bounds = array<i64: 1, 128>}, {pipeline_mode = #tpu.pipeline_mode<synchronous>, transform_indices = @transform_29, window_bounds = array<i64: 1, 128>}, {pipeline_mode = #tpu.pipeline_mode<synchronous>, transform_indices = @transform_30, window_bounds = array<i64: 1, 128>}, {pipeline_mode = #tpu.pipeline_mode<synchronous>, transform_indices = @transform_31, window_bounds = array<i64: 1, 128>}, {pipeline_mode = #tpu.pipeline_mode<synchronous>, transform_indices = @transform_32, window_bounds = array<i64: 128, 384>}, {pipeline_mode = #tpu.pipeline_mode<synchronous>, transform_indices = @transform_33, window_bounds = array<i64: 1, 384>}, {pipeline_mode = #tpu.pipeline_mode<synchronous>, transform_indices = @transform_34, window_bounds = array<i64: 128, 128>}, {pipeline_mode = #tpu.pipeline_mode<synchronous>, transform_indices = @transform_35, window_bounds = array<i64: 1, 128>}, {pipeline_mode = #tpu.pipeline_mode<synchronous>, transform_indices = @transform_36, window_bounds = array<i64: 128, 128>}, {pipeline_mode = #tpu.pipeline_mode<synchronous>, transform_indices = @transform_37, window_bounds = array<i64: 1, 128>}, {pipeline_mode = #tpu.pipeline_mode<synchronous>, transform_indices = @transform_38, window_bounds = array<i64: 128, 256>}, {pipeline_mode = #tpu.pipeline_mode<synchronous>, transform_indices = @transform_39, window_bounds = array<i64: 1, 256>}, {pipeline_mode = #tpu.pipeline_mode<synchronous>, transform_indices = @transform_40, window_bounds = array<i64: 128, 128>}, {pipeline_mode = #tpu.pipeline_mode<synchronous>, transform_indices = @transform_41, window_bounds = array<i64: 1, 128>}, {pipeline_mode = #tpu.pipeline_mode<synchronous>, transform_indices = @transform_42, window_bounds = array<i64: 1, 128>}, {pipeline_mode = #tpu.pipeline_mode<synchronous>, transform_indices = @transform_43, window_bounds = array<i64: 1, 128>}, {pipeline_mode = #tpu.pipeline_mode<synchronous>, transform_indices = @transform_44, window_bounds = array<i64: 1, 128>}, {pipeline_mode = #tpu.pipeline_mode<synchronous>, transform_indices = @transform_45, window_bounds = array<i64: 1, 128>}, {pipeline_mode = #tpu.pipeline_mode<synchronous>, transform_indices = @transform_46, window_bounds = array<i64: 1, 128>}, {pipeline_mode = #tpu.pipeline_mode<synchronous>, transform_indices = @transform_47, window_bounds = array<i64: 1, 128>}, {pipeline_mode = #tpu.pipeline_mode<synchronous>, transform_indices = @transform_48, window_bounds = array<i64: 128, 256>}, {pipeline_mode = #tpu.pipeline_mode<synchronous>, transform_indices = @transform_49, window_bounds = array<i64: 1, 256>}, {pipeline_mode = #tpu.pipeline_mode<synchronous>, transform_indices = @transform_50, window_bounds = array<i64: 256, 128>}, {pipeline_mode = #tpu.pipeline_mode<synchronous>, transform_indices = @transform_51, window_bounds = array<i64: 1, 128>}, {pipeline_mode = #tpu.pipeline_mode<synchronous>, transform_indices = @transform_52, window_bounds = array<i64: 1, 128>}, {pipeline_mode = #tpu.pipeline_mode<synchronous>, transform_indices = @transform_53, window_bounds = array<i64: 1, 128>}, {pipeline_mode = #tpu.pipeline_mode<synchronous>, transform_indices = @transform_54, window_bounds = array<i64: 128, 128>}, {pipeline_mode = #tpu.pipeline_mode<synchronous>, transform_indices = @transform_55, window_bounds = array<i64: 1, 128>}, {transform_indices = @transform_56, window_bounds = array<i64: 1, 8, 128>}, {transform_indices = @transform_57, window_bounds = array<i64: 1, 8, 128>}, {transform_indices = @transform_58, window_bounds = array<i64: 1, 8, 128>}]} {
    %c0 = arith.constant 0 : index
    %c0_0 = arith.constant 0 : index
    %c0_1 = arith.constant 0 : index
    %0 = vector.load %arg1[%c0, %c0_0, %c0_1] : memref<1x8x12xf32, #tpu.memory_space<vmem>>, vector<1x8x12xf32>
    %1 = vector.shape_cast %0 : vector<1x8x12xf32> to vector<8x12xf32>
    %c0_2 = arith.constant 0 : index
    %c0_3 = arith.constant 0 : index
    %2 = vector.load %arg3[%c0_2, %c0_3] : memref<12x128xbf16, #tpu.memory_space<vmem>>, vector<12x128xbf16>
    %3 = arith.truncf %1 : vector<8x12xf32> to vector<8x12xbf16>
    %cst = arith.constant dense<0.000000e+00> : vector<8x128xf32>
    %4 = tpu.matmul %3, %2, %cst {dimension_numbers = #tpu.dot_dimension_numbers<[1], [0], [0], [1], [0, 0, 1, 1], [], []>} : vector<8x12xbf16>, vector<12x128xbf16>, vector<8x128xf32> -> vector<8x128xf32>
    %c0_4 = arith.constant 0 : index
    %c0_5 = arith.constant 0 : index
    %5 = vector.load %arg4[%c0_4, %c0_5] : memref<8x128xf32, #tpu.memory_space<vmem>>, vector<8x128xf32>
    %6 = arith.addf %4, %5 : vector<8x128xf32>
    %c0_6 = arith.constant 0 : index
    %c0_7 = arith.constant 0 : index
    %c0_8 = arith.constant 0 : index
    %7 = vector.load %arg2[%c0_6, %c0_7, %c0_8] : memref<1x8x12xf32, #tpu.memory_space<vmem>>, vector<1x8x12xf32>
    %8 = vector.shape_cast %7 : vector<1x8x12xf32> to vector<8x12xf32>
    %c0_9 = arith.constant 0 : index
    %c0_10 = arith.constant 0 : index
    %9 = vector.load %arg5[%c0_9, %c0_10] : memref<12x128xbf16, #tpu.memory_space<vmem>>, vector<12x128xbf16>
    %10 = arith.truncf %8 : vector<8x12xf32> to vector<8x12xbf16>
    %cst_11 = arith.constant dense<0.000000e+00> : vector<8x128xf32>
    %11 = tpu.matmul %10, %9, %cst_11 {dimension_numbers = #tpu.dot_dimension_numbers<[1], [0], [0], [1], [0, 0, 1, 1], [], []>} : vector<8x12xbf16>, vector<12x128xbf16>, vector<8x128xf32> -> vector<8x128xf32>
    %c0_12 = arith.constant 0 : index
    %c0_13 = arith.constant 0 : index
    %12 = vector.load %arg6[%c0_12, %c0_13] : memref<8x128xf32, #tpu.memory_space<vmem>>, vector<8x128xf32>
    %13 = arith.addf %11, %12 : vector<8x128xf32>
    %c0_14 = arith.constant 0 : index
    %c0_15 = arith.constant 0 : index
    %14 = vector.load %arg7[%c0_14, %c0_15] : memref<128x384xbf16, #tpu.memory_space<vmem>>, vector<128x384xbf16>
    %15 = arith.truncf %6 : vector<8x128xf32> to vector<8x128xbf16>
    %cst_16 = arith.constant dense<0.000000e+00> : vector<8x384xf32>
    %16 = tpu.matmul %15, %14, %cst_16 {dimension_numbers = #tpu.dot_dimension_numbers<[1], [0], [0], [1], [0, 0, 1, 1], [], []>} : vector<8x128xbf16>, vector<128x384xbf16>, vector<8x384xf32> -> vector<8x384xf32>
    %c0_17 = arith.constant 0 : index
    %c0_18 = arith.constant 0 : index
    %17 = vector.load %arg8[%c0_17, %c0_18] : memref<1x384xf32, #tpu.memory_space<vmem>>, vector<1x384xf32>
    %18 = vector.broadcast %17 : vector<1x384xf32> to vector<8x384xf32>
    %19 = arith.addf %16, %18 : vector<8x384xf32>
    %20 = vector.extract_strided_slice %19 {offsets = [0, 0], sizes = [8, 128], strides = [1, 1]} : vector<8x384xf32> to vector<8x128xf32>
    %21 = vector.extract_strided_slice %19 {offsets = [0, 128], sizes = [8, 128], strides = [1, 1]} : vector<8x384xf32> to vector<8x128xf32>
    %22 = vector.extract_strided_slice %19 {offsets = [0, 256], sizes = [8, 128], strides = [1, 1]} : vector<8x384xf32> to vector<8x128xf32>
    %c0_19 = arith.constant 0 : index
    %c0_20 = arith.constant 0 : index
    %23 = vector.load %arg9[%c0_19, %c0_20] : memref<128x128xbf16, #tpu.memory_space<vmem>>, vector<128x128xbf16>
    %cst_21 = arith.constant 0.000000e+00 : f32
    %24 = vector.broadcast %cst_21 : f32 to vector<8x128xf32>
    %25 = vector.extract_strided_slice %20 {offsets = [0, 0], sizes = [8, 32], strides = [1, 1]} : vector<8x128xf32> to vector<8x32xf32>
    %26 = vector.extract_strided_slice %21 {offsets = [0, 0], sizes = [8, 32], strides = [1, 1]} : vector<8x128xf32> to vector<8x32xf32>
    %27 = arith.truncf %25 : vector<8x32xf32> to vector<8x32xbf16>
    %28 = arith.truncf %26 : vector<8x32xf32> to vector<8x32xbf16>
    %cst_22 = arith.constant dense<0.000000e+00> : vector<8x8xf32>
    %29 = tpu.matmul %27, %28, %cst_22 {dimension_numbers = #tpu.dot_dimension_numbers<[1], [1], [0], [0], [0, 0, 1, 0], [], []>} : vector<8x32xbf16>, vector<8x32xbf16>, vector<8x8xf32> -> vector<8x8xf32>
    %cst_23 = arith.constant 0.176776692 : f32
    %30 = vector.broadcast %cst_23 : f32 to vector<8x8xf32>
    %31 = arith.mulf %29, %30 : vector<8x8xf32>
    %cst_24 = arith.constant dense<0xFF800000> : vector<8xf32>
    %32 = vector.multi_reduction <maximumf>, %31, %cst_24 [1] : vector<8x8xf32> to vector<8xf32>
    %33 = vector.shape_cast %32 : vector<8xf32> to vector<8x1xf32>
    %34 = vector.broadcast %33 : vector<8x1xf32> to vector<8x8xf32>
    %35 = arith.subf %31, %34 : vector<8x8xf32>
    %36 = math.exp %35 : vector<8x8xf32>
    %cst_25 = arith.constant dense<0.000000e+00> : vector<8xf32>
    %37 = vector.multi_reduction <add>, %36, %cst_25 [1] : vector<8x8xf32> to vector<8xf32>
    %38 = vector.shape_cast %37 : vector<8xf32> to vector<8x1xf32>
    %39 = tpu.reciprocal %38 {approx = true} : vector<8x1xf32> -> vector<8x1xf32>
    %40 = vector.broadcast %39 : vector<8x1xf32> to vector<8x8xf32>
    %41 = arith.mulf %36, %40 : vector<8x8xf32>
    %42 = arith.truncf %41 : vector<8x8xf32> to vector<8x8xbf16>
    %43 = vector.extract_strided_slice %22 {offsets = [0, 0], sizes = [8, 32], strides = [1, 1]} : vector<8x128xf32> to vector<8x32xf32>
    %44 = arith.truncf %43 : vector<8x32xf32> to vector<8x32xbf16>
    %cst_26 = arith.constant dense<0.000000e+00> : vector<8x32xf32>
    %45 = tpu.matmul %42, %44, %cst_26 {dimension_numbers = #tpu.dot_dimension_numbers<[1], [0], [0], [1], [0, 0, 1, 1], [], []>} : vector<8x8xbf16>, vector<8x32xbf16>, vector<8x32xf32> -> vector<8x32xf32>
    %46 = arith.truncf %45 : vector<8x32xf32> to vector<8x32xbf16>
    %47 = vector.extract_strided_slice %23 {offsets = [0, 0], sizes = [32, 128], strides = [1, 1]} : vector<128x128xbf16> to vector<32x128xbf16>
    %cst_27 = arith.constant dense<0.000000e+00> : vector<8x128xf32>
    %48 = tpu.matmul %46, %47, %cst_27 {dimension_numbers = #tpu.dot_dimension_numbers<[1], [0], [0], [1], [0, 0, 1, 1], [], []>} : vector<8x32xbf16>, vector<32x128xbf16>, vector<8x128xf32> -> vector<8x128xf32>
    %49 = arith.addf %24, %48 : vector<8x128xf32>
    %50 = vector.extract_strided_slice %20 {offsets = [0, 32], sizes = [8, 32], strides = [1, 1]} : vector<8x128xf32> to vector<8x32xf32>
    %51 = vector.extract_strided_slice %21 {offsets = [0, 32], sizes = [8, 32], strides = [1, 1]} : vector<8x128xf32> to vector<8x32xf32>
    %52 = arith.truncf %50 : vector<8x32xf32> to vector<8x32xbf16>
    %53 = arith.truncf %51 : vector<8x32xf32> to vector<8x32xbf16>
    %cst_28 = arith.constant dense<0.000000e+00> : vector<8x8xf32>
    %54 = tpu.matmul %52, %53, %cst_28 {dimension_numbers = #tpu.dot_dimension_numbers<[1], [1], [0], [0], [0, 0, 1, 0], [], []>} : vector<8x32xbf16>, vector<8x32xbf16>, vector<8x8xf32> -> vector<8x8xf32>
    %cst_29 = arith.constant 0.176776692 : f32
    %55 = vector.broadcast %cst_29 : f32 to vector<8x8xf32>
    %56 = arith.mulf %54, %55 : vector<8x8xf32>
    %cst_30 = arith.constant dense<0xFF800000> : vector<8xf32>
    %57 = vector.multi_reduction <maximumf>, %56, %cst_30 [1] : vector<8x8xf32> to vector<8xf32>
    %58 = vector.shape_cast %57 : vector<8xf32> to vector<8x1xf32>
    %59 = vector.broadcast %58 : vector<8x1xf32> to vector<8x8xf32>
    %60 = arith.subf %56, %59 : vector<8x8xf32>
    %61 = math.exp %60 : vector<8x8xf32>
    %cst_31 = arith.constant dense<0.000000e+00> : vector<8xf32>
    %62 = vector.multi_reduction <add>, %61, %cst_31 [1] : vector<8x8xf32> to vector<8xf32>
    %63 = vector.shape_cast %62 : vector<8xf32> to vector<8x1xf32>
    %64 = tpu.reciprocal %63 {approx = true} : vector<8x1xf32> -> vector<8x1xf32>
    %65 = vector.broadcast %64 : vector<8x1xf32> to vector<8x8xf32>
    %66 = arith.mulf %61, %65 : vector<8x8xf32>
    %67 = arith.truncf %66 : vector<8x8xf32> to vector<8x8xbf16>
    %68 = vector.extract_strided_slice %22 {offsets = [0, 32], sizes = [8, 32], strides = [1, 1]} : vector<8x128xf32> to vector<8x32xf32>
    %69 = arith.truncf %68 : vector<8x32xf32> to vector<8x32xbf16>
    %cst_32 = arith.constant dense<0.000000e+00> : vector<8x32xf32>
    %70 = tpu.matmul %67, %69, %cst_32 {dimension_numbers = #tpu.dot_dimension_numbers<[1], [0], [0], [1], [0, 0, 1, 1], [], []>} : vector<8x8xbf16>, vector<8x32xbf16>, vector<8x32xf32> -> vector<8x32xf32>
    %71 = arith.truncf %70 : vector<8x32xf32> to vector<8x32xbf16>
    %72 = vector.extract_strided_slice %23 {offsets = [32, 0], sizes = [32, 128], strides = [1, 1]} : vector<128x128xbf16> to vector<32x128xbf16>
    %cst_33 = arith.constant dense<0.000000e+00> : vector<8x128xf32>
    %73 = tpu.matmul %71, %72, %cst_33 {dimension_numbers = #tpu.dot_dimension_numbers<[1], [0], [0], [1], [0, 0, 1, 1], [], []>} : vector<8x32xbf16>, vector<32x128xbf16>, vector<8x128xf32> -> vector<8x128xf32>
    %74 = arith.addf %49, %73 : vector<8x128xf32>
    %75 = vector.extract_strided_slice %20 {offsets = [0, 64], sizes = [8, 32], strides = [1, 1]} : vector<8x128xf32> to vector<8x32xf32>
    %76 = vector.extract_strided_slice %21 {offsets = [0, 64], sizes = [8, 32], strides = [1, 1]} : vector<8x128xf32> to vector<8x32xf32>
    %77 = arith.truncf %75 : vector<8x32xf32> to vector<8x32xbf16>
    %78 = arith.truncf %76 : vector<8x32xf32> to vector<8x32xbf16>
    %cst_34 = arith.constant dense<0.000000e+00> : vector<8x8xf32>
    %79 = tpu.matmul %77, %78, %cst_34 {dimension_numbers = #tpu.dot_dimension_numbers<[1], [1], [0], [0], [0, 0, 1, 0], [], []>} : vector<8x32xbf16>, vector<8x32xbf16>, vector<8x8xf32> -> vector<8x8xf32>
    %cst_35 = arith.constant 0.176776692 : f32
    %80 = vector.broadcast %cst_35 : f32 to vector<8x8xf32>
    %81 = arith.mulf %79, %80 : vector<8x8xf32>
    %cst_36 = arith.constant dense<0xFF800000> : vector<8xf32>
    %82 = vector.multi_reduction <maximumf>, %81, %cst_36 [1] : vector<8x8xf32> to vector<8xf32>
    %83 = vector.shape_cast %82 : vector<8xf32> to vector<8x1xf32>
    %84 = vector.broadcast %83 : vector<8x1xf32> to vector<8x8xf32>
    %85 = arith.subf %81, %84 : vector<8x8xf32>
    %86 = math.exp %85 : vector<8x8xf32>
    %cst_37 = arith.constant dense<0.000000e+00> : vector<8xf32>
    %87 = vector.multi_reduction <add>, %86, %cst_37 [1] : vector<8x8xf32> to vector<8xf32>
    %88 = vector.shape_cast %87 : vector<8xf32> to vector<8x1xf32>
    %89 = tpu.reciprocal %88 {approx = true} : vector<8x1xf32> -> vector<8x1xf32>
    %90 = vector.broadcast %89 : vector<8x1xf32> to vector<8x8xf32>
    %91 = arith.mulf %86, %90 : vector<8x8xf32>
    %92 = arith.truncf %91 : vector<8x8xf32> to vector<8x8xbf16>
    %93 = vector.extract_strided_slice %22 {offsets = [0, 64], sizes = [8, 32], strides = [1, 1]} : vector<8x128xf32> to vector<8x32xf32>
    %94 = arith.truncf %93 : vector<8x32xf32> to vector<8x32xbf16>
    %cst_38 = arith.constant dense<0.000000e+00> : vector<8x32xf32>
    %95 = tpu.matmul %92, %94, %cst_38 {dimension_numbers = #tpu.dot_dimension_numbers<[1], [0], [0], [1], [0, 0, 1, 1], [], []>} : vector<8x8xbf16>, vector<8x32xbf16>, vector<8x32xf32> -> vector<8x32xf32>
    %96 = arith.truncf %95 : vector<8x32xf32> to vector<8x32xbf16>
    %97 = vector.extract_strided_slice %23 {offsets = [64, 0], sizes = [32, 128], strides = [1, 1]} : vector<128x128xbf16> to vector<32x128xbf16>
    %cst_39 = arith.constant dense<0.000000e+00> : vector<8x128xf32>
    %98 = tpu.matmul %96, %97, %cst_39 {dimension_numbers = #tpu.dot_dimension_numbers<[1], [0], [0], [1], [0, 0, 1, 1], [], []>} : vector<8x32xbf16>, vector<32x128xbf16>, vector<8x128xf32> -> vector<8x128xf32>
    %99 = arith.addf %74, %98 : vector<8x128xf32>
    %100 = vector.extract_strided_slice %20 {offsets = [0, 96], sizes = [8, 32], strides = [1, 1]} : vector<8x128xf32> to vector<8x32xf32>
    %101 = vector.extract_strided_slice %21 {offsets = [0, 96], sizes = [8, 32], strides = [1, 1]} : vector<8x128xf32> to vector<8x32xf32>
    %102 = arith.truncf %100 : vector<8x32xf32> to vector<8x32xbf16>
    %103 = arith.truncf %101 : vector<8x32xf32> to vector<8x32xbf16>
    %cst_40 = arith.constant dense<0.000000e+00> : vector<8x8xf32>
    %104 = tpu.matmul %102, %103, %cst_40 {dimension_numbers = #tpu.dot_dimension_numbers<[1], [1], [0], [0], [0, 0, 1, 0], [], []>} : vector<8x32xbf16>, vector<8x32xbf16>, vector<8x8xf32> -> vector<8x8xf32>
    %cst_41 = arith.constant 0.176776692 : f32
    %105 = vector.broadcast %cst_41 : f32 to vector<8x8xf32>
    %106 = arith.mulf %104, %105 : vector<8x8xf32>
    %cst_42 = arith.constant dense<0xFF800000> : vector<8xf32>
    %107 = vector.multi_reduction <maximumf>, %106, %cst_42 [1] : vector<8x8xf32> to vector<8xf32>
    %108 = vector.shape_cast %107 : vector<8xf32> to vector<8x1xf32>
    %109 = vector.broadcast %108 : vector<8x1xf32> to vector<8x8xf32>
    %110 = arith.subf %106, %109 : vector<8x8xf32>
    %111 = math.exp %110 : vector<8x8xf32>
    %cst_43 = arith.constant dense<0.000000e+00> : vector<8xf32>
    %112 = vector.multi_reduction <add>, %111, %cst_43 [1] : vector<8x8xf32> to vector<8xf32>
    %113 = vector.shape_cast %112 : vector<8xf32> to vector<8x1xf32>
    %114 = tpu.reciprocal %113 {approx = true} : vector<8x1xf32> -> vector<8x1xf32>
    %115 = vector.broadcast %114 : vector<8x1xf32> to vector<8x8xf32>
    %116 = arith.mulf %111, %115 : vector<8x8xf32>
    %117 = arith.truncf %116 : vector<8x8xf32> to vector<8x8xbf16>
    %118 = vector.extract_strided_slice %22 {offsets = [0, 96], sizes = [8, 32], strides = [1, 1]} : vector<8x128xf32> to vector<8x32xf32>
    %119 = arith.truncf %118 : vector<8x32xf32> to vector<8x32xbf16>
    %cst_44 = arith.constant dense<0.000000e+00> : vector<8x32xf32>
    %120 = tpu.matmul %117, %119, %cst_44 {dimension_numbers = #tpu.dot_dimension_numbers<[1], [0], [0], [1], [0, 0, 1, 1], [], []>} : vector<8x8xbf16>, vector<8x32xbf16>, vector<8x32xf32> -> vector<8x32xf32>
    %121 = arith.truncf %120 : vector<8x32xf32> to vector<8x32xbf16>
    %122 = vector.extract_strided_slice %23 {offsets = [96, 0], sizes = [32, 128], strides = [1, 1]} : vector<128x128xbf16> to vector<32x128xbf16>
    %cst_45 = arith.constant dense<0.000000e+00> : vector<8x128xf32>
    %123 = tpu.matmul %121, %122, %cst_45 {dimension_numbers = #tpu.dot_dimension_numbers<[1], [0], [0], [1], [0, 0, 1, 1], [], []>} : vector<8x32xbf16>, vector<32x128xbf16>, vector<8x128xf32> -> vector<8x128xf32>
    %124 = arith.addf %99, %123 : vector<8x128xf32>
    %c0_46 = arith.constant 0 : index
    %c0_47 = arith.constant 0 : index
    %125 = vector.load %arg10[%c0_46, %c0_47] : memref<1x128xf32, #tpu.memory_space<vmem>>, vector<1x128xf32>
    %126 = vector.broadcast %125 : vector<1x128xf32> to vector<8x128xf32>
    %127 = arith.addf %124, %126 : vector<8x128xf32>
    %128 = arith.addf %6, %127 : vector<8x128xf32>
    %c0_48 = arith.constant 0 : index
    %c0_49 = arith.constant 0 : index
    %129 = vector.load %arg11[%c0_48, %c0_49] : memref<1x128xf32, #tpu.memory_space<vmem>>, vector<1x128xf32>
    %c0_50 = arith.constant 0 : index
    %c0_51 = arith.constant 0 : index
    %130 = vector.load %arg12[%c0_50, %c0_51] : memref<1x128xf32, #tpu.memory_space<vmem>>, vector<1x128xf32>
    %cst_52 = arith.constant dense<0.000000e+00> : vector<8xf32>
    %131 = vector.multi_reduction <add>, %128, %cst_52 [1] : vector<8x128xf32> to vector<8xf32>
    %132 = vector.shape_cast %131 : vector<8xf32> to vector<8x1xf32>
    %cst_53 = arith.constant 1.280000e+02 : f32
    %133 = vector.broadcast %cst_53 : f32 to vector<8x1xf32>
    %134 = arith.divf %132, %133 : vector<8x1xf32>
    %135 = vector.broadcast %134 : vector<8x1xf32> to vector<8x128xf32>
    %136 = arith.subf %128, %135 : vector<8x128xf32>
    %137 = arith.mulf %136, %136 : vector<8x128xf32>
    %cst_54 = arith.constant dense<0.000000e+00> : vector<8xf32>
    %138 = vector.multi_reduction <add>, %137, %cst_54 [1] : vector<8x128xf32> to vector<8xf32>
    %139 = vector.shape_cast %138 : vector<8xf32> to vector<8x1xf32>
    %cst_55 = arith.constant 1.280000e+02 : f32
    %140 = vector.broadcast %cst_55 : f32 to vector<8x1xf32>
    %141 = arith.divf %139, %140 : vector<8x1xf32>
    %142 = vector.broadcast %134 : vector<8x1xf32> to vector<8x128xf32>
    %143 = arith.subf %128, %142 : vector<8x128xf32>
    %cst_56 = arith.constant 9.99999974E-6 : f32
    %144 = vector.broadcast %cst_56 : f32 to vector<8x1xf32>
    %145 = arith.addf %141, %144 : vector<8x1xf32>
    %146 = math.rsqrt %145 : vector<8x1xf32>
    %147 = vector.broadcast %146 : vector<8x1xf32> to vector<8x128xf32>
    %148 = arith.mulf %143, %147 : vector<8x128xf32>
    %149 = vector.broadcast %129 : vector<1x128xf32> to vector<8x128xf32>
    %150 = arith.mulf %148, %149 : vector<8x128xf32>
    %151 = vector.broadcast %130 : vector<1x128xf32> to vector<8x128xf32>
    %152 = arith.addf %150, %151 : vector<8x128xf32>
    %c0_57 = arith.constant 0 : index
    %c0_58 = arith.constant 0 : index
    %153 = vector.load %arg13[%c0_57, %c0_58] : memref<128x256xbf16, #tpu.memory_space<vmem>>, vector<128x256xbf16>
    %154 = arith.truncf %152 : vector<8x128xf32> to vector<8x128xbf16>
    %cst_59 = arith.constant dense<0.000000e+00> : vector<8x256xf32>
    %155 = tpu.matmul %154, %153, %cst_59 {dimension_numbers = #tpu.dot_dimension_numbers<[1], [0], [0], [1], [0, 0, 1, 1], [], []>} : vector<8x128xbf16>, vector<128x256xbf16>, vector<8x256xf32> -> vector<8x256xf32>
    %c0_60 = arith.constant 0 : index
    %c0_61 = arith.constant 0 : index
    %156 = vector.load %arg14[%c0_60, %c0_61] : memref<1x256xf32, #tpu.memory_space<vmem>>, vector<1x256xf32>
    %157 = vector.broadcast %156 : vector<1x256xf32> to vector<8x256xf32>
    %158 = arith.addf %155, %157 : vector<8x256xf32>
    %cst_62 = arith.constant 5.000000e-01 : f32
    %159 = vector.broadcast %cst_62 : f32 to vector<8x256xf32>
    %160 = arith.mulf %159, %158 : vector<8x256xf32>
    %cst_63 = arith.constant 0.707106769 : f32
    %161 = vector.broadcast %cst_63 : f32 to vector<8x256xf32>
    %162 = arith.mulf %158, %161 : vector<8x256xf32>
    %163 = math.erf %162 : vector<8x256xf32>
    %cst_64 = arith.constant 1.000000e+00 : f32
    %164 = vector.broadcast %cst_64 : f32 to vector<8x256xf32>
    %165 = arith.addf %164, %163 : vector<8x256xf32>
    %166 = arith.mulf %160, %165 : vector<8x256xf32>
    %c0_65 = arith.constant 0 : index
    %c0_66 = arith.constant 0 : index
    %167 = vector.load %arg15[%c0_65, %c0_66] : memref<256x128xbf16, #tpu.memory_space<vmem>>, vector<256x128xbf16>
    %168 = arith.truncf %166 : vector<8x256xf32> to vector<8x256xbf16>
    %cst_67 = arith.constant dense<0.000000e+00> : vector<8x128xf32>
    %169 = tpu.matmul %168, %167, %cst_67 {dimension_numbers = #tpu.dot_dimension_numbers<[1], [0], [0], [1], [0, 0, 1, 1], [], []>} : vector<8x256xbf16>, vector<256x128xbf16>, vector<8x128xf32> -> vector<8x128xf32>
    %c0_68 = arith.constant 0 : index
    %c0_69 = arith.constant 0 : index
    %170 = vector.load %arg16[%c0_68, %c0_69] : memref<1x128xf32, #tpu.memory_space<vmem>>, vector<1x128xf32>
    %171 = vector.broadcast %170 : vector<1x128xf32> to vector<8x128xf32>
    %172 = arith.addf %169, %171 : vector<8x128xf32>
    %173 = arith.addf %152, %172 : vector<8x128xf32>
    %c0_70 = arith.constant 0 : index
    %c0_71 = arith.constant 0 : index
    %174 = vector.load %arg17[%c0_70, %c0_71] : memref<1x128xf32, #tpu.memory_space<vmem>>, vector<1x128xf32>
    %c0_72 = arith.constant 0 : index
    %c0_73 = arith.constant 0 : index
    %175 = vector.load %arg18[%c0_72, %c0_73] : memref<1x128xf32, #tpu.memory_space<vmem>>, vector<1x128xf32>
    %cst_74 = arith.constant dense<0.000000e+00> : vector<8xf32>
    %176 = vector.multi_reduction <add>, %173, %cst_74 [1] : vector<8x128xf32> to vector<8xf32>
    %177 = vector.shape_cast %176 : vector<8xf32> to vector<8x1xf32>
    %cst_75 = arith.constant 1.280000e+02 : f32
    %178 = vector.broadcast %cst_75 : f32 to vector<8x1xf32>
    %179 = arith.divf %177, %178 : vector<8x1xf32>
    %180 = vector.broadcast %179 : vector<8x1xf32> to vector<8x128xf32>
    %181 = arith.subf %173, %180 : vector<8x128xf32>
    %182 = arith.mulf %181, %181 : vector<8x128xf32>
    %cst_76 = arith.constant dense<0.000000e+00> : vector<8xf32>
    %183 = vector.multi_reduction <add>, %182, %cst_76 [1] : vector<8x128xf32> to vector<8xf32>
    %184 = vector.shape_cast %183 : vector<8xf32> to vector<8x1xf32>
    %cst_77 = arith.constant 1.280000e+02 : f32
    %185 = vector.broadcast %cst_77 : f32 to vector<8x1xf32>
    %186 = arith.divf %184, %185 : vector<8x1xf32>
    %187 = vector.broadcast %179 : vector<8x1xf32> to vector<8x128xf32>
    %188 = arith.subf %173, %187 : vector<8x128xf32>
    %cst_78 = arith.constant 9.99999974E-6 : f32
    %189 = vector.broadcast %cst_78 : f32 to vector<8x1xf32>
    %190 = arith.addf %186, %189 : vector<8x1xf32>
    %191 = math.rsqrt %190 : vector<8x1xf32>
    %192 = vector.broadcast %191 : vector<8x1xf32> to vector<8x128xf32>
    %193 = arith.mulf %188, %192 : vector<8x128xf32>
    %194 = vector.broadcast %174 : vector<1x128xf32> to vector<8x128xf32>
    %195 = arith.mulf %193, %194 : vector<8x128xf32>
    %196 = vector.broadcast %175 : vector<1x128xf32> to vector<8x128xf32>
    %197 = arith.addf %195, %196 : vector<8x128xf32>
    %c0_79 = arith.constant 0 : index
    %c0_80 = arith.constant 0 : index
    %198 = vector.load %arg19[%c0_79, %c0_80] : memref<128x384xbf16, #tpu.memory_space<vmem>>, vector<128x384xbf16>
    %199 = arith.truncf %197 : vector<8x128xf32> to vector<8x128xbf16>
    %cst_81 = arith.constant dense<0.000000e+00> : vector<8x384xf32>
    %200 = tpu.matmul %199, %198, %cst_81 {dimension_numbers = #tpu.dot_dimension_numbers<[1], [0], [0], [1], [0, 0, 1, 1], [], []>} : vector<8x128xbf16>, vector<128x384xbf16>, vector<8x384xf32> -> vector<8x384xf32>
    %c0_82 = arith.constant 0 : index
    %c0_83 = arith.constant 0 : index
    %201 = vector.load %arg20[%c0_82, %c0_83] : memref<1x384xf32, #tpu.memory_space<vmem>>, vector<1x384xf32>
    %202 = vector.broadcast %201 : vector<1x384xf32> to vector<8x384xf32>
    %203 = arith.addf %200, %202 : vector<8x384xf32>
    %204 = vector.extract_strided_slice %203 {offsets = [0, 0], sizes = [8, 128], strides = [1, 1]} : vector<8x384xf32> to vector<8x128xf32>
    %205 = vector.extract_strided_slice %203 {offsets = [0, 128], sizes = [8, 128], strides = [1, 1]} : vector<8x384xf32> to vector<8x128xf32>
    %206 = vector.extract_strided_slice %203 {offsets = [0, 256], sizes = [8, 128], strides = [1, 1]} : vector<8x384xf32> to vector<8x128xf32>
    %c0_84 = arith.constant 0 : index
    %c0_85 = arith.constant 0 : index
    %207 = vector.load %arg21[%c0_84, %c0_85] : memref<128x128xbf16, #tpu.memory_space<vmem>>, vector<128x128xbf16>
    %cst_86 = arith.constant 0.000000e+00 : f32
    %208 = vector.broadcast %cst_86 : f32 to vector<8x128xf32>
    %209 = vector.extract_strided_slice %204 {offsets = [0, 0], sizes = [8, 32], strides = [1, 1]} : vector<8x128xf32> to vector<8x32xf32>
    %210 = vector.extract_strided_slice %205 {offsets = [0, 0], sizes = [8, 32], strides = [1, 1]} : vector<8x128xf32> to vector<8x32xf32>
    %211 = arith.truncf %209 : vector<8x32xf32> to vector<8x32xbf16>
    %212 = arith.truncf %210 : vector<8x32xf32> to vector<8x32xbf16>
    %cst_87 = arith.constant dense<0.000000e+00> : vector<8x8xf32>
    %213 = tpu.matmul %211, %212, %cst_87 {dimension_numbers = #tpu.dot_dimension_numbers<[1], [1], [0], [0], [0, 0, 1, 0], [], []>} : vector<8x32xbf16>, vector<8x32xbf16>, vector<8x8xf32> -> vector<8x8xf32>
    %cst_88 = arith.constant 0.176776692 : f32
    %214 = vector.broadcast %cst_88 : f32 to vector<8x8xf32>
    %215 = arith.mulf %213, %214 : vector<8x8xf32>
    %cst_89 = arith.constant dense<0xFF800000> : vector<8xf32>
    %216 = vector.multi_reduction <maximumf>, %215, %cst_89 [1] : vector<8x8xf32> to vector<8xf32>
    %217 = vector.shape_cast %216 : vector<8xf32> to vector<8x1xf32>
    %218 = vector.broadcast %217 : vector<8x1xf32> to vector<8x8xf32>
    %219 = arith.subf %215, %218 : vector<8x8xf32>
    %220 = math.exp %219 : vector<8x8xf32>
    %cst_90 = arith.constant dense<0.000000e+00> : vector<8xf32>
    %221 = vector.multi_reduction <add>, %220, %cst_90 [1] : vector<8x8xf32> to vector<8xf32>
    %222 = vector.shape_cast %221 : vector<8xf32> to vector<8x1xf32>
    %223 = tpu.reciprocal %222 {approx = true} : vector<8x1xf32> -> vector<8x1xf32>
    %224 = vector.broadcast %223 : vector<8x1xf32> to vector<8x8xf32>
    %225 = arith.mulf %220, %224 : vector<8x8xf32>
    %226 = arith.truncf %225 : vector<8x8xf32> to vector<8x8xbf16>
    %227 = vector.extract_strided_slice %206 {offsets = [0, 0], sizes = [8, 32], strides = [1, 1]} : vector<8x128xf32> to vector<8x32xf32>
    %228 = arith.truncf %227 : vector<8x32xf32> to vector<8x32xbf16>
    %cst_91 = arith.constant dense<0.000000e+00> : vector<8x32xf32>
    %229 = tpu.matmul %226, %228, %cst_91 {dimension_numbers = #tpu.dot_dimension_numbers<[1], [0], [0], [1], [0, 0, 1, 1], [], []>} : vector<8x8xbf16>, vector<8x32xbf16>, vector<8x32xf32> -> vector<8x32xf32>
    %230 = arith.truncf %229 : vector<8x32xf32> to vector<8x32xbf16>
    %231 = vector.extract_strided_slice %207 {offsets = [0, 0], sizes = [32, 128], strides = [1, 1]} : vector<128x128xbf16> to vector<32x128xbf16>
    %cst_92 = arith.constant dense<0.000000e+00> : vector<8x128xf32>
    %232 = tpu.matmul %230, %231, %cst_92 {dimension_numbers = #tpu.dot_dimension_numbers<[1], [0], [0], [1], [0, 0, 1, 1], [], []>} : vector<8x32xbf16>, vector<32x128xbf16>, vector<8x128xf32> -> vector<8x128xf32>
    %233 = arith.addf %208, %232 : vector<8x128xf32>
    %234 = vector.extract_strided_slice %204 {offsets = [0, 32], sizes = [8, 32], strides = [1, 1]} : vector<8x128xf32> to vector<8x32xf32>
    %235 = vector.extract_strided_slice %205 {offsets = [0, 32], sizes = [8, 32], strides = [1, 1]} : vector<8x128xf32> to vector<8x32xf32>
    %236 = arith.truncf %234 : vector<8x32xf32> to vector<8x32xbf16>
    %237 = arith.truncf %235 : vector<8x32xf32> to vector<8x32xbf16>
    %cst_93 = arith.constant dense<0.000000e+00> : vector<8x8xf32>
    %238 = tpu.matmul %236, %237, %cst_93 {dimension_numbers = #tpu.dot_dimension_numbers<[1], [1], [0], [0], [0, 0, 1, 0], [], []>} : vector<8x32xbf16>, vector<8x32xbf16>, vector<8x8xf32> -> vector<8x8xf32>
    %cst_94 = arith.constant 0.176776692 : f32
    %239 = vector.broadcast %cst_94 : f32 to vector<8x8xf32>
    %240 = arith.mulf %238, %239 : vector<8x8xf32>
    %cst_95 = arith.constant dense<0xFF800000> : vector<8xf32>
    %241 = vector.multi_reduction <maximumf>, %240, %cst_95 [1] : vector<8x8xf32> to vector<8xf32>
    %242 = vector.shape_cast %241 : vector<8xf32> to vector<8x1xf32>
    %243 = vector.broadcast %242 : vector<8x1xf32> to vector<8x8xf32>
    %244 = arith.subf %240, %243 : vector<8x8xf32>
    %245 = math.exp %244 : vector<8x8xf32>
    %cst_96 = arith.constant dense<0.000000e+00> : vector<8xf32>
    %246 = vector.multi_reduction <add>, %245, %cst_96 [1] : vector<8x8xf32> to vector<8xf32>
    %247 = vector.shape_cast %246 : vector<8xf32> to vector<8x1xf32>
    %248 = tpu.reciprocal %247 {approx = true} : vector<8x1xf32> -> vector<8x1xf32>
    %249 = vector.broadcast %248 : vector<8x1xf32> to vector<8x8xf32>
    %250 = arith.mulf %245, %249 : vector<8x8xf32>
    %251 = arith.truncf %250 : vector<8x8xf32> to vector<8x8xbf16>
    %252 = vector.extract_strided_slice %206 {offsets = [0, 32], sizes = [8, 32], strides = [1, 1]} : vector<8x128xf32> to vector<8x32xf32>
    %253 = arith.truncf %252 : vector<8x32xf32> to vector<8x32xbf16>
    %cst_97 = arith.constant dense<0.000000e+00> : vector<8x32xf32>
    %254 = tpu.matmul %251, %253, %cst_97 {dimension_numbers = #tpu.dot_dimension_numbers<[1], [0], [0], [1], [0, 0, 1, 1], [], []>} : vector<8x8xbf16>, vector<8x32xbf16>, vector<8x32xf32> -> vector<8x32xf32>
    %255 = arith.truncf %254 : vector<8x32xf32> to vector<8x32xbf16>
    %256 = vector.extract_strided_slice %207 {offsets = [32, 0], sizes = [32, 128], strides = [1, 1]} : vector<128x128xbf16> to vector<32x128xbf16>
    %cst_98 = arith.constant dense<0.000000e+00> : vector<8x128xf32>
    %257 = tpu.matmul %255, %256, %cst_98 {dimension_numbers = #tpu.dot_dimension_numbers<[1], [0], [0], [1], [0, 0, 1, 1], [], []>} : vector<8x32xbf16>, vector<32x128xbf16>, vector<8x128xf32> -> vector<8x128xf32>
    %258 = arith.addf %233, %257 : vector<8x128xf32>
    %259 = vector.extract_strided_slice %204 {offsets = [0, 64], sizes = [8, 32], strides = [1, 1]} : vector<8x128xf32> to vector<8x32xf32>
    %260 = vector.extract_strided_slice %205 {offsets = [0, 64], sizes = [8, 32], strides = [1, 1]} : vector<8x128xf32> to vector<8x32xf32>
    %261 = arith.truncf %259 : vector<8x32xf32> to vector<8x32xbf16>
    %262 = arith.truncf %260 : vector<8x32xf32> to vector<8x32xbf16>
    %cst_99 = arith.constant dense<0.000000e+00> : vector<8x8xf32>
    %263 = tpu.matmul %261, %262, %cst_99 {dimension_numbers = #tpu.dot_dimension_numbers<[1], [1], [0], [0], [0, 0, 1, 0], [], []>} : vector<8x32xbf16>, vector<8x32xbf16>, vector<8x8xf32> -> vector<8x8xf32>
    %cst_100 = arith.constant 0.176776692 : f32
    %264 = vector.broadcast %cst_100 : f32 to vector<8x8xf32>
    %265 = arith.mulf %263, %264 : vector<8x8xf32>
    %cst_101 = arith.constant dense<0xFF800000> : vector<8xf32>
    %266 = vector.multi_reduction <maximumf>, %265, %cst_101 [1] : vector<8x8xf32> to vector<8xf32>
    %267 = vector.shape_cast %266 : vector<8xf32> to vector<8x1xf32>
    %268 = vector.broadcast %267 : vector<8x1xf32> to vector<8x8xf32>
    %269 = arith.subf %265, %268 : vector<8x8xf32>
    %270 = math.exp %269 : vector<8x8xf32>
    %cst_102 = arith.constant dense<0.000000e+00> : vector<8xf32>
    %271 = vector.multi_reduction <add>, %270, %cst_102 [1] : vector<8x8xf32> to vector<8xf32>
    %272 = vector.shape_cast %271 : vector<8xf32> to vector<8x1xf32>
    %273 = tpu.reciprocal %272 {approx = true} : vector<8x1xf32> -> vector<8x1xf32>
    %274 = vector.broadcast %273 : vector<8x1xf32> to vector<8x8xf32>
    %275 = arith.mulf %270, %274 : vector<8x8xf32>
    %276 = arith.truncf %275 : vector<8x8xf32> to vector<8x8xbf16>
    %277 = vector.extract_strided_slice %206 {offsets = [0, 64], sizes = [8, 32], strides = [1, 1]} : vector<8x128xf32> to vector<8x32xf32>
    %278 = arith.truncf %277 : vector<8x32xf32> to vector<8x32xbf16>
    %cst_103 = arith.constant dense<0.000000e+00> : vector<8x32xf32>
    %279 = tpu.matmul %276, %278, %cst_103 {dimension_numbers = #tpu.dot_dimension_numbers<[1], [0], [0], [1], [0, 0, 1, 1], [], []>} : vector<8x8xbf16>, vector<8x32xbf16>, vector<8x32xf32> -> vector<8x32xf32>
    %280 = arith.truncf %279 : vector<8x32xf32> to vector<8x32xbf16>
    %281 = vector.extract_strided_slice %207 {offsets = [64, 0], sizes = [32, 128], strides = [1, 1]} : vector<128x128xbf16> to vector<32x128xbf16>
    %cst_104 = arith.constant dense<0.000000e+00> : vector<8x128xf32>
    %282 = tpu.matmul %280, %281, %cst_104 {dimension_numbers = #tpu.dot_dimension_numbers<[1], [0], [0], [1], [0, 0, 1, 1], [], []>} : vector<8x32xbf16>, vector<32x128xbf16>, vector<8x128xf32> -> vector<8x128xf32>
    %283 = arith.addf %258, %282 : vector<8x128xf32>
    %284 = vector.extract_strided_slice %204 {offsets = [0, 96], sizes = [8, 32], strides = [1, 1]} : vector<8x128xf32> to vector<8x32xf32>
    %285 = vector.extract_strided_slice %205 {offsets = [0, 96], sizes = [8, 32], strides = [1, 1]} : vector<8x128xf32> to vector<8x32xf32>
    %286 = arith.truncf %284 : vector<8x32xf32> to vector<8x32xbf16>
    %287 = arith.truncf %285 : vector<8x32xf32> to vector<8x32xbf16>
    %cst_105 = arith.constant dense<0.000000e+00> : vector<8x8xf32>
    %288 = tpu.matmul %286, %287, %cst_105 {dimension_numbers = #tpu.dot_dimension_numbers<[1], [1], [0], [0], [0, 0, 1, 0], [], []>} : vector<8x32xbf16>, vector<8x32xbf16>, vector<8x8xf32> -> vector<8x8xf32>
    %cst_106 = arith.constant 0.176776692 : f32
    %289 = vector.broadcast %cst_106 : f32 to vector<8x8xf32>
    %290 = arith.mulf %288, %289 : vector<8x8xf32>
    %cst_107 = arith.constant dense<0xFF800000> : vector<8xf32>
    %291 = vector.multi_reduction <maximumf>, %290, %cst_107 [1] : vector<8x8xf32> to vector<8xf32>
    %292 = vector.shape_cast %291 : vector<8xf32> to vector<8x1xf32>
    %293 = vector.broadcast %292 : vector<8x1xf32> to vector<8x8xf32>
    %294 = arith.subf %290, %293 : vector<8x8xf32>
    %295 = math.exp %294 : vector<8x8xf32>
    %cst_108 = arith.constant dense<0.000000e+00> : vector<8xf32>
    %296 = vector.multi_reduction <add>, %295, %cst_108 [1] : vector<8x8xf32> to vector<8xf32>
    %297 = vector.shape_cast %296 : vector<8xf32> to vector<8x1xf32>
    %298 = tpu.reciprocal %297 {approx = true} : vector<8x1xf32> -> vector<8x1xf32>
    %299 = vector.broadcast %298 : vector<8x1xf32> to vector<8x8xf32>
    %300 = arith.mulf %295, %299 : vector<8x8xf32>
    %301 = arith.truncf %300 : vector<8x8xf32> to vector<8x8xbf16>
    %302 = vector.extract_strided_slice %206 {offsets = [0, 96], sizes = [8, 32], strides = [1, 1]} : vector<8x128xf32> to vector<8x32xf32>
    %303 = arith.truncf %302 : vector<8x32xf32> to vector<8x32xbf16>
    %cst_109 = arith.constant dense<0.000000e+00> : vector<8x32xf32>
    %304 = tpu.matmul %301, %303, %cst_109 {dimension_numbers = #tpu.dot_dimension_numbers<[1], [0], [0], [1], [0, 0, 1, 1], [], []>} : vector<8x8xbf16>, vector<8x32xbf16>, vector<8x32xf32> -> vector<8x32xf32>
    %305 = arith.truncf %304 : vector<8x32xf32> to vector<8x32xbf16>
    %306 = vector.extract_strided_slice %207 {offsets = [96, 0], sizes = [32, 128], strides = [1, 1]} : vector<128x128xbf16> to vector<32x128xbf16>
    %cst_110 = arith.constant dense<0.000000e+00> : vector<8x128xf32>
    %307 = tpu.matmul %305, %306, %cst_110 {dimension_numbers = #tpu.dot_dimension_numbers<[1], [0], [0], [1], [0, 0, 1, 1], [], []>} : vector<8x32xbf16>, vector<32x128xbf16>, vector<8x128xf32> -> vector<8x128xf32>
    %308 = arith.addf %283, %307 : vector<8x128xf32>
    %c0_111 = arith.constant 0 : index
    %c0_112 = arith.constant 0 : index
    %309 = vector.load %arg22[%c0_111, %c0_112] : memref<1x128xf32, #tpu.memory_space<vmem>>, vector<1x128xf32>
    %310 = vector.broadcast %309 : vector<1x128xf32> to vector<8x128xf32>
    %311 = arith.addf %308, %310 : vector<8x128xf32>
    %312 = arith.addf %197, %311 : vector<8x128xf32>
    %c0_113 = arith.constant 0 : index
    %c0_114 = arith.constant 0 : index
    %313 = vector.load %arg23[%c0_113, %c0_114] : memref<1x128xf32, #tpu.memory_space<vmem>>, vector<1x128xf32>
    %c0_115 = arith.constant 0 : index
    %c0_116 = arith.constant 0 : index
    %314 = vector.load %arg24[%c0_115, %c0_116] : memref<1x128xf32, #tpu.memory_space<vmem>>, vector<1x128xf32>
    %cst_117 = arith.constant dense<0.000000e+00> : vector<8xf32>
    %315 = vector.multi_reduction <add>, %312, %cst_117 [1] : vector<8x128xf32> to vector<8xf32>
    %316 = vector.shape_cast %315 : vector<8xf32> to vector<8x1xf32>
    %cst_118 = arith.constant 1.280000e+02 : f32
    %317 = vector.broadcast %cst_118 : f32 to vector<8x1xf32>
    %318 = arith.divf %316, %317 : vector<8x1xf32>
    %319 = vector.broadcast %318 : vector<8x1xf32> to vector<8x128xf32>
    %320 = arith.subf %312, %319 : vector<8x128xf32>
    %321 = arith.mulf %320, %320 : vector<8x128xf32>
    %cst_119 = arith.constant dense<0.000000e+00> : vector<8xf32>
    %322 = vector.multi_reduction <add>, %321, %cst_119 [1] : vector<8x128xf32> to vector<8xf32>
    %323 = vector.shape_cast %322 : vector<8xf32> to vector<8x1xf32>
    %cst_120 = arith.constant 1.280000e+02 : f32
    %324 = vector.broadcast %cst_120 : f32 to vector<8x1xf32>
    %325 = arith.divf %323, %324 : vector<8x1xf32>
    %326 = vector.broadcast %318 : vector<8x1xf32> to vector<8x128xf32>
    %327 = arith.subf %312, %326 : vector<8x128xf32>
    %cst_121 = arith.constant 9.99999974E-6 : f32
    %328 = vector.broadcast %cst_121 : f32 to vector<8x1xf32>
    %329 = arith.addf %325, %328 : vector<8x1xf32>
    %330 = math.rsqrt %329 : vector<8x1xf32>
    %331 = vector.broadcast %330 : vector<8x1xf32> to vector<8x128xf32>
    %332 = arith.mulf %327, %331 : vector<8x128xf32>
    %333 = vector.broadcast %313 : vector<1x128xf32> to vector<8x128xf32>
    %334 = arith.mulf %332, %333 : vector<8x128xf32>
    %335 = vector.broadcast %314 : vector<1x128xf32> to vector<8x128xf32>
    %336 = arith.addf %334, %335 : vector<8x128xf32>
    %c0_122 = arith.constant 0 : index
    %c0_123 = arith.constant 0 : index
    %337 = vector.load %arg25[%c0_122, %c0_123] : memref<128x256xbf16, #tpu.memory_space<vmem>>, vector<128x256xbf16>
    %338 = arith.truncf %336 : vector<8x128xf32> to vector<8x128xbf16>
    %cst_124 = arith.constant dense<0.000000e+00> : vector<8x256xf32>
    %339 = tpu.matmul %338, %337, %cst_124 {dimension_numbers = #tpu.dot_dimension_numbers<[1], [0], [0], [1], [0, 0, 1, 1], [], []>} : vector<8x128xbf16>, vector<128x256xbf16>, vector<8x256xf32> -> vector<8x256xf32>
    %c0_125 = arith.constant 0 : index
    %c0_126 = arith.constant 0 : index
    %340 = vector.load %arg26[%c0_125, %c0_126] : memref<1x256xf32, #tpu.memory_space<vmem>>, vector<1x256xf32>
    %341 = vector.broadcast %340 : vector<1x256xf32> to vector<8x256xf32>
    %342 = arith.addf %339, %341 : vector<8x256xf32>
    %cst_127 = arith.constant 5.000000e-01 : f32
    %343 = vector.broadcast %cst_127 : f32 to vector<8x256xf32>
    %344 = arith.mulf %343, %342 : vector<8x256xf32>
    %cst_128 = arith.constant 0.707106769 : f32
    %345 = vector.broadcast %cst_128 : f32 to vector<8x256xf32>
    %346 = arith.mulf %342, %345 : vector<8x256xf32>
    %347 = math.erf %346 : vector<8x256xf32>
    %cst_129 = arith.constant 1.000000e+00 : f32
    %348 = vector.broadcast %cst_129 : f32 to vector<8x256xf32>
    %349 = arith.addf %348, %347 : vector<8x256xf32>
    %350 = arith.mulf %344, %349 : vector<8x256xf32>
    %c0_130 = arith.constant 0 : index
    %c0_131 = arith.constant 0 : index
    %351 = vector.load %arg27[%c0_130, %c0_131] : memref<256x128xbf16, #tpu.memory_space<vmem>>, vector<256x128xbf16>
    %352 = arith.truncf %350 : vector<8x256xf32> to vector<8x256xbf16>
    %cst_132 = arith.constant dense<0.000000e+00> : vector<8x128xf32>
    %353 = tpu.matmul %352, %351, %cst_132 {dimension_numbers = #tpu.dot_dimension_numbers<[1], [0], [0], [1], [0, 0, 1, 1], [], []>} : vector<8x256xbf16>, vector<256x128xbf16>, vector<8x128xf32> -> vector<8x128xf32>
    %c0_133 = arith.constant 0 : index
    %c0_134 = arith.constant 0 : index
    %354 = vector.load %arg28[%c0_133, %c0_134] : memref<1x128xf32, #tpu.memory_space<vmem>>, vector<1x128xf32>
    %355 = vector.broadcast %354 : vector<1x128xf32> to vector<8x128xf32>
    %356 = arith.addf %353, %355 : vector<8x128xf32>
    %357 = arith.addf %336, %356 : vector<8x128xf32>
    %c0_135 = arith.constant 0 : index
    %c0_136 = arith.constant 0 : index
    %358 = vector.load %arg29[%c0_135, %c0_136] : memref<1x128xf32, #tpu.memory_space<vmem>>, vector<1x128xf32>
    %c0_137 = arith.constant 0 : index
    %c0_138 = arith.constant 0 : index
    %359 = vector.load %arg30[%c0_137, %c0_138] : memref<1x128xf32, #tpu.memory_space<vmem>>, vector<1x128xf32>
    %cst_139 = arith.constant dense<0.000000e+00> : vector<8xf32>
    %360 = vector.multi_reduction <add>, %357, %cst_139 [1] : vector<8x128xf32> to vector<8xf32>
    %361 = vector.shape_cast %360 : vector<8xf32> to vector<8x1xf32>
    %cst_140 = arith.constant 1.280000e+02 : f32
    %362 = vector.broadcast %cst_140 : f32 to vector<8x1xf32>
    %363 = arith.divf %361, %362 : vector<8x1xf32>
    %364 = vector.broadcast %363 : vector<8x1xf32> to vector<8x128xf32>
    %365 = arith.subf %357, %364 : vector<8x128xf32>
    %366 = arith.mulf %365, %365 : vector<8x128xf32>
    %cst_141 = arith.constant dense<0.000000e+00> : vector<8xf32>
    %367 = vector.multi_reduction <add>, %366, %cst_141 [1] : vector<8x128xf32> to vector<8xf32>
    %368 = vector.shape_cast %367 : vector<8xf32> to vector<8x1xf32>
    %cst_142 = arith.constant 1.280000e+02 : f32
    %369 = vector.broadcast %cst_142 : f32 to vector<8x1xf32>
    %370 = arith.divf %368, %369 : vector<8x1xf32>
    %371 = vector.broadcast %363 : vector<8x1xf32> to vector<8x128xf32>
    %372 = arith.subf %357, %371 : vector<8x128xf32>
    %cst_143 = arith.constant 9.99999974E-6 : f32
    %373 = vector.broadcast %cst_143 : f32 to vector<8x1xf32>
    %374 = arith.addf %370, %373 : vector<8x1xf32>
    %375 = math.rsqrt %374 : vector<8x1xf32>
    %376 = vector.broadcast %375 : vector<8x1xf32> to vector<8x128xf32>
    %377 = arith.mulf %372, %376 : vector<8x128xf32>
    %378 = vector.broadcast %358 : vector<1x128xf32> to vector<8x128xf32>
    %379 = arith.mulf %377, %378 : vector<8x128xf32>
    %380 = vector.broadcast %359 : vector<1x128xf32> to vector<8x128xf32>
    %381 = arith.addf %379, %380 : vector<8x128xf32>
    %c0_144 = arith.constant 0 : index
    %c0_145 = arith.constant 0 : index
    %382 = vector.load %arg31[%c0_144, %c0_145] : memref<1x128xf32, #tpu.memory_space<vmem>>, vector<1x128xf32>
    %c0_146 = arith.constant 0 : index
    %c0_147 = arith.constant 0 : index
    %383 = vector.load %arg32[%c0_146, %c0_147] : memref<1x128xf32, #tpu.memory_space<vmem>>, vector<1x128xf32>
    %cst_148 = arith.constant dense<0.000000e+00> : vector<8xf32>
    %384 = vector.multi_reduction <add>, %381, %cst_148 [1] : vector<8x128xf32> to vector<8xf32>
    %385 = vector.shape_cast %384 : vector<8xf32> to vector<8x1xf32>
    %cst_149 = arith.constant 1.280000e+02 : f32
    %386 = vector.broadcast %cst_149 : f32 to vector<8x1xf32>
    %387 = arith.divf %385, %386 : vector<8x1xf32>
    %388 = vector.broadcast %387 : vector<8x1xf32> to vector<8x128xf32>
    %389 = arith.subf %381, %388 : vector<8x128xf32>
    %390 = arith.mulf %389, %389 : vector<8x128xf32>
    %cst_150 = arith.constant dense<0.000000e+00> : vector<8xf32>
    %391 = vector.multi_reduction <add>, %390, %cst_150 [1] : vector<8x128xf32> to vector<8xf32>
    %392 = vector.shape_cast %391 : vector<8xf32> to vector<8x1xf32>
    %cst_151 = arith.constant 1.280000e+02 : f32
    %393 = vector.broadcast %cst_151 : f32 to vector<8x1xf32>
    %394 = arith.divf %392, %393 : vector<8x1xf32>
    %395 = vector.broadcast %387 : vector<8x1xf32> to vector<8x128xf32>
    %396 = arith.subf %381, %395 : vector<8x128xf32>
    %cst_152 = arith.constant 9.99999974E-6 : f32
    %397 = vector.broadcast %cst_152 : f32 to vector<8x1xf32>
    %398 = arith.addf %394, %397 : vector<8x1xf32>
    %399 = math.rsqrt %398 : vector<8x1xf32>
    %400 = vector.broadcast %399 : vector<8x1xf32> to vector<8x128xf32>
    %401 = arith.mulf %396, %400 : vector<8x128xf32>
    %402 = vector.broadcast %382 : vector<1x128xf32> to vector<8x128xf32>
    %403 = arith.mulf %401, %402 : vector<8x128xf32>
    %404 = vector.broadcast %383 : vector<1x128xf32> to vector<8x128xf32>
    %405 = arith.addf %403, %404 : vector<8x128xf32>
    %c0_153 = arith.constant 0 : index
    %c0_154 = arith.constant 0 : index
    %c0_155 = arith.constant 0 : index
    %406 = vector.load %arg57[%c0_153, %c0_154, %c0_155] : memref<1x8x128xf32, #tpu.memory_space<vmem>>, vector<1x8x128xf32>
    %407 = vector.shape_cast %406 : vector<1x8x128xf32> to vector<8x128xf32>
    %408 = vector.shape_cast %405 : vector<8x128xf32> to vector<1x8x128xf32>
    tpu.vector_store %arg57[%c0_153, %c0_154, %c0_155], %408 {strides = array<i32>} : memref<1x8x128xf32, #tpu.memory_space<vmem>>, vector<1x8x128xf32>,
    %c0_156 = arith.constant 0 : index
    %c0_157 = arith.constant 0 : index
    %409 = vector.load %arg33[%c0_156, %c0_157] : memref<128x384xbf16, #tpu.memory_space<vmem>>, vector<128x384xbf16>
    %410 = arith.truncf %13 : vector<8x128xf32> to vector<8x128xbf16>
    %cst_158 = arith.constant dense<0.000000e+00> : vector<8x384xf32>
    %411 = tpu.matmul %410, %409, %cst_158 {dimension_numbers = #tpu.dot_dimension_numbers<[1], [0], [0], [1], [0, 0, 1, 1], [], []>} : vector<8x128xbf16>, vector<128x384xbf16>, vector<8x384xf32> -> vector<8x384xf32>
    %c0_159 = arith.constant 0 : index
    %c0_160 = arith.constant 0 : index
    %412 = vector.load %arg34[%c0_159, %c0_160] : memref<1x384xf32, #tpu.memory_space<vmem>>, vector<1x384xf32>
    %413 = vector.broadcast %412 : vector<1x384xf32> to vector<8x384xf32>
    %414 = arith.addf %411, %413 : vector<8x384xf32>
    %415 = vector.extract_strided_slice %414 {offsets = [0, 0], sizes = [8, 128], strides = [1, 1]} : vector<8x384xf32> to vector<8x128xf32>
    %416 = vector.extract_strided_slice %414 {offsets = [0, 128], sizes = [8, 128], strides = [1, 1]} : vector<8x384xf32> to vector<8x128xf32>
    %417 = vector.extract_strided_slice %414 {offsets = [0, 256], sizes = [8, 128], strides = [1, 1]} : vector<8x384xf32> to vector<8x128xf32>
    %c0_161 = arith.constant 0 : index
    %c0_162 = arith.constant 0 : index
    %418 = vector.load %arg35[%c0_161, %c0_162] : memref<128x128xbf16, #tpu.memory_space<vmem>>, vector<128x128xbf16>
    %419 = tpu.iota {dimensions = array<i32: 0>} : vector<8x8xi32>
    %420 = tpu.iota {dimensions = array<i32: 1>} : vector<8x8xi32>
    %421 = arith.cmpi sle, %420, %419 : vector<8x8xi32>
    %cst_163 = arith.constant 0.000000e+00 : f32
    %422 = vector.broadcast %cst_163 : f32 to vector<8x128xf32>
    %423 = vector.extract_strided_slice %415 {offsets = [0, 0], sizes = [8, 32], strides = [1, 1]} : vector<8x128xf32> to vector<8x32xf32>
    %424 = vector.extract_strided_slice %416 {offsets = [0, 0], sizes = [8, 32], strides = [1, 1]} : vector<8x128xf32> to vector<8x32xf32>
    %425 = arith.truncf %423 : vector<8x32xf32> to vector<8x32xbf16>
    %426 = arith.truncf %424 : vector<8x32xf32> to vector<8x32xbf16>
    %cst_164 = arith.constant dense<0.000000e+00> : vector<8x8xf32>
    %427 = tpu.matmul %425, %426, %cst_164 {dimension_numbers = #tpu.dot_dimension_numbers<[1], [1], [0], [0], [0, 0, 1, 0], [], []>} : vector<8x32xbf16>, vector<8x32xbf16>, vector<8x8xf32> -> vector<8x8xf32>
    %cst_165 = arith.constant 0.176776692 : f32
    %428 = vector.broadcast %cst_165 : f32 to vector<8x8xf32>
    %429 = arith.mulf %427, %428 : vector<8x8xf32>
    %cst_166 = arith.constant -1.000000e+30 : f32
    %430 = vector.broadcast %cst_166 : f32 to vector<8x8xf32>
    %431 = arith.select %421, %429, %430 : vector<8x8xi1>, vector<8x8xf32>
    %cst_167 = arith.constant dense<0xFF800000> : vector<8xf32>
    %432 = vector.multi_reduction <maximumf>, %431, %cst_167 [1] : vector<8x8xf32> to vector<8xf32>
    %433 = vector.shape_cast %432 : vector<8xf32> to vector<8x1xf32>
    %434 = vector.broadcast %433 : vector<8x1xf32> to vector<8x8xf32>
    %435 = arith.subf %431, %434 : vector<8x8xf32>
    %436 = math.exp %435 : vector<8x8xf32>
    %cst_168 = arith.constant dense<0.000000e+00> : vector<8xf32>
    %437 = vector.multi_reduction <add>, %436, %cst_168 [1] : vector<8x8xf32> to vector<8xf32>
    %438 = vector.shape_cast %437 : vector<8xf32> to vector<8x1xf32>
    %439 = tpu.reciprocal %438 {approx = true} : vector<8x1xf32> -> vector<8x1xf32>
    %440 = vector.broadcast %439 : vector<8x1xf32> to vector<8x8xf32>
    %441 = arith.mulf %436, %440 : vector<8x8xf32>
    %442 = arith.truncf %441 : vector<8x8xf32> to vector<8x8xbf16>
    %443 = vector.extract_strided_slice %417 {offsets = [0, 0], sizes = [8, 32], strides = [1, 1]} : vector<8x128xf32> to vector<8x32xf32>
    %444 = arith.truncf %443 : vector<8x32xf32> to vector<8x32xbf16>
    %cst_169 = arith.constant dense<0.000000e+00> : vector<8x32xf32>
    %445 = tpu.matmul %442, %444, %cst_169 {dimension_numbers = #tpu.dot_dimension_numbers<[1], [0], [0], [1], [0, 0, 1, 1], [], []>} : vector<8x8xbf16>, vector<8x32xbf16>, vector<8x32xf32> -> vector<8x32xf32>
    %446 = arith.truncf %445 : vector<8x32xf32> to vector<8x32xbf16>
    %447 = vector.extract_strided_slice %418 {offsets = [0, 0], sizes = [32, 128], strides = [1, 1]} : vector<128x128xbf16> to vector<32x128xbf16>
    %cst_170 = arith.constant dense<0.000000e+00> : vector<8x128xf32>
    %448 = tpu.matmul %446, %447, %cst_170 {dimension_numbers = #tpu.dot_dimension_numbers<[1], [0], [0], [1], [0, 0, 1, 1], [], []>} : vector<8x32xbf16>, vector<32x128xbf16>, vector<8x128xf32> -> vector<8x128xf32>
    %449 = arith.addf %422, %448 : vector<8x128xf32>
    %450 = vector.extract_strided_slice %415 {offsets = [0, 32], sizes = [8, 32], strides = [1, 1]} : vector<8x128xf32> to vector<8x32xf32>
    %451 = vector.extract_strided_slice %416 {offsets = [0, 32], sizes = [8, 32], strides = [1, 1]} : vector<8x128xf32> to vector<8x32xf32>
    %452 = arith.truncf %450 : vector<8x32xf32> to vector<8x32xbf16>
    %453 = arith.truncf %451 : vector<8x32xf32> to vector<8x32xbf16>
    %cst_171 = arith.constant dense<0.000000e+00> : vector<8x8xf32>
    %454 = tpu.matmul %452, %453, %cst_171 {dimension_numbers = #tpu.dot_dimension_numbers<[1], [1], [0], [0], [0, 0, 1, 0], [], []>} : vector<8x32xbf16>, vector<8x32xbf16>, vector<8x8xf32> -> vector<8x8xf32>
    %cst_172 = arith.constant 0.176776692 : f32
    %455 = vector.broadcast %cst_172 : f32 to vector<8x8xf32>
    %456 = arith.mulf %454, %455 : vector<8x8xf32>
    %cst_173 = arith.constant -1.000000e+30 : f32
    %457 = vector.broadcast %cst_173 : f32 to vector<8x8xf32>
    %458 = arith.select %421, %456, %457 : vector<8x8xi1>, vector<8x8xf32>
    %cst_174 = arith.constant dense<0xFF800000> : vector<8xf32>
    %459 = vector.multi_reduction <maximumf>, %458, %cst_174 [1] : vector<8x8xf32> to vector<8xf32>
    %460 = vector.shape_cast %459 : vector<8xf32> to vector<8x1xf32>
    %461 = vector.broadcast %460 : vector<8x1xf32> to vector<8x8xf32>
    %462 = arith.subf %458, %461 : vector<8x8xf32>
    %463 = math.exp %462 : vector<8x8xf32>
    %cst_175 = arith.constant dense<0.000000e+00> : vector<8xf32>
    %464 = vector.multi_reduction <add>, %463, %cst_175 [1] : vector<8x8xf32> to vector<8xf32>
    %465 = vector.shape_cast %464 : vector<8xf32> to vector<8x1xf32>
    %466 = tpu.reciprocal %465 {approx = true} : vector<8x1xf32> -> vector<8x1xf32>
    %467 = vector.broadcast %466 : vector<8x1xf32> to vector<8x8xf32>
    %468 = arith.mulf %463, %467 : vector<8x8xf32>
    %469 = arith.truncf %468 : vector<8x8xf32> to vector<8x8xbf16>
    %470 = vector.extract_strided_slice %417 {offsets = [0, 32], sizes = [8, 32], strides = [1, 1]} : vector<8x128xf32> to vector<8x32xf32>
    %471 = arith.truncf %470 : vector<8x32xf32> to vector<8x32xbf16>
    %cst_176 = arith.constant dense<0.000000e+00> : vector<8x32xf32>
    %472 = tpu.matmul %469, %471, %cst_176 {dimension_numbers = #tpu.dot_dimension_numbers<[1], [0], [0], [1], [0, 0, 1, 1], [], []>} : vector<8x8xbf16>, vector<8x32xbf16>, vector<8x32xf32> -> vector<8x32xf32>
    %473 = arith.truncf %472 : vector<8x32xf32> to vector<8x32xbf16>
    %474 = vector.extract_strided_slice %418 {offsets = [32, 0], sizes = [32, 128], strides = [1, 1]} : vector<128x128xbf16> to vector<32x128xbf16>
    %cst_177 = arith.constant dense<0.000000e+00> : vector<8x128xf32>
    %475 = tpu.matmul %473, %474, %cst_177 {dimension_numbers = #tpu.dot_dimension_numbers<[1], [0], [0], [1], [0, 0, 1, 1], [], []>} : vector<8x32xbf16>, vector<32x128xbf16>, vector<8x128xf32> -> vector<8x128xf32>
    %476 = arith.addf %449, %475 : vector<8x128xf32>
    %477 = vector.extract_strided_slice %415 {offsets = [0, 64], sizes = [8, 32], strides = [1, 1]} : vector<8x128xf32> to vector<8x32xf32>
    %478 = vector.extract_strided_slice %416 {offsets = [0, 64], sizes = [8, 32], strides = [1, 1]} : vector<8x128xf32> to vector<8x32xf32>
    %479 = arith.truncf %477 : vector<8x32xf32> to vector<8x32xbf16>
    %480 = arith.truncf %478 : vector<8x32xf32> to vector<8x32xbf16>
    %cst_178 = arith.constant dense<0.000000e+00> : vector<8x8xf32>
    %481 = tpu.matmul %479, %480, %cst_178 {dimension_numbers = #tpu.dot_dimension_numbers<[1], [1], [0], [0], [0, 0, 1, 0], [], []>} : vector<8x32xbf16>, vector<8x32xbf16>, vector<8x8xf32> -> vector<8x8xf32>
    %cst_179 = arith.constant 0.176776692 : f32
    %482 = vector.broadcast %cst_179 : f32 to vector<8x8xf32>
    %483 = arith.mulf %481, %482 : vector<8x8xf32>
    %cst_180 = arith.constant -1.000000e+30 : f32
    %484 = vector.broadcast %cst_180 : f32 to vector<8x8xf32>
    %485 = arith.select %421, %483, %484 : vector<8x8xi1>, vector<8x8xf32>
    %cst_181 = arith.constant dense<0xFF800000> : vector<8xf32>
    %486 = vector.multi_reduction <maximumf>, %485, %cst_181 [1] : vector<8x8xf32> to vector<8xf32>
    %487 = vector.shape_cast %486 : vector<8xf32> to vector<8x1xf32>
    %488 = vector.broadcast %487 : vector<8x1xf32> to vector<8x8xf32>
    %489 = arith.subf %485, %488 : vector<8x8xf32>
    %490 = math.exp %489 : vector<8x8xf32>
    %cst_182 = arith.constant dense<0.000000e+00> : vector<8xf32>
    %491 = vector.multi_reduction <add>, %490, %cst_182 [1] : vector<8x8xf32> to vector<8xf32>
    %492 = vector.shape_cast %491 : vector<8xf32> to vector<8x1xf32>
    %493 = tpu.reciprocal %492 {approx = true} : vector<8x1xf32> -> vector<8x1xf32>
    %494 = vector.broadcast %493 : vector<8x1xf32> to vector<8x8xf32>
    %495 = arith.mulf %490, %494 : vector<8x8xf32>
    %496 = arith.truncf %495 : vector<8x8xf32> to vector<8x8xbf16>
    %497 = vector.extract_strided_slice %417 {offsets = [0, 64], sizes = [8, 32], strides = [1, 1]} : vector<8x128xf32> to vector<8x32xf32>
    %498 = arith.truncf %497 : vector<8x32xf32> to vector<8x32xbf16>
    %cst_183 = arith.constant dense<0.000000e+00> : vector<8x32xf32>
    %499 = tpu.matmul %496, %498, %cst_183 {dimension_numbers = #tpu.dot_dimension_numbers<[1], [0], [0], [1], [0, 0, 1, 1], [], []>} : vector<8x8xbf16>, vector<8x32xbf16>, vector<8x32xf32> -> vector<8x32xf32>
    %500 = arith.truncf %499 : vector<8x32xf32> to vector<8x32xbf16>
    %501 = vector.extract_strided_slice %418 {offsets = [64, 0], sizes = [32, 128], strides = [1, 1]} : vector<128x128xbf16> to vector<32x128xbf16>
    %cst_184 = arith.constant dense<0.000000e+00> : vector<8x128xf32>
    %502 = tpu.matmul %500, %501, %cst_184 {dimension_numbers = #tpu.dot_dimension_numbers<[1], [0], [0], [1], [0, 0, 1, 1], [], []>} : vector<8x32xbf16>, vector<32x128xbf16>, vector<8x128xf32> -> vector<8x128xf32>
    %503 = arith.addf %476, %502 : vector<8x128xf32>
    %504 = vector.extract_strided_slice %415 {offsets = [0, 96], sizes = [8, 32], strides = [1, 1]} : vector<8x128xf32> to vector<8x32xf32>
    %505 = vector.extract_strided_slice %416 {offsets = [0, 96], sizes = [8, 32], strides = [1, 1]} : vector<8x128xf32> to vector<8x32xf32>
    %506 = arith.truncf %504 : vector<8x32xf32> to vector<8x32xbf16>
    %507 = arith.truncf %505 : vector<8x32xf32> to vector<8x32xbf16>
    %cst_185 = arith.constant dense<0.000000e+00> : vector<8x8xf32>
    %508 = tpu.matmul %506, %507, %cst_185 {dimension_numbers = #tpu.dot_dimension_numbers<[1], [1], [0], [0], [0, 0, 1, 0], [], []>} : vector<8x32xbf16>, vector<8x32xbf16>, vector<8x8xf32> -> vector<8x8xf32>
    %cst_186 = arith.constant 0.176776692 : f32
    %509 = vector.broadcast %cst_186 : f32 to vector<8x8xf32>
    %510 = arith.mulf %508, %509 : vector<8x8xf32>
    %cst_187 = arith.constant -1.000000e+30 : f32
    %511 = vector.broadcast %cst_187 : f32 to vector<8x8xf32>
    %512 = arith.select %421, %510, %511 : vector<8x8xi1>, vector<8x8xf32>
    %cst_188 = arith.constant dense<0xFF800000> : vector<8xf32>
    %513 = vector.multi_reduction <maximumf>, %512, %cst_188 [1] : vector<8x8xf32> to vector<8xf32>
    %514 = vector.shape_cast %513 : vector<8xf32> to vector<8x1xf32>
    %515 = vector.broadcast %514 : vector<8x1xf32> to vector<8x8xf32>
    %516 = arith.subf %512, %515 : vector<8x8xf32>
    %517 = math.exp %516 : vector<8x8xf32>
    %cst_189 = arith.constant dense<0.000000e+00> : vector<8xf32>
    %518 = vector.multi_reduction <add>, %517, %cst_189 [1] : vector<8x8xf32> to vector<8xf32>
    %519 = vector.shape_cast %518 : vector<8xf32> to vector<8x1xf32>
    %520 = tpu.reciprocal %519 {approx = true} : vector<8x1xf32> -> vector<8x1xf32>
    %521 = vector.broadcast %520 : vector<8x1xf32> to vector<8x8xf32>
    %522 = arith.mulf %517, %521 : vector<8x8xf32>
    %523 = arith.truncf %522 : vector<8x8xf32> to vector<8x8xbf16>
    %524 = vector.extract_strided_slice %417 {offsets = [0, 96], sizes = [8, 32], strides = [1, 1]} : vector<8x128xf32> to vector<8x32xf32>
    %525 = arith.truncf %524 : vector<8x32xf32> to vector<8x32xbf16>
    %cst_190 = arith.constant dense<0.000000e+00> : vector<8x32xf32>
    %526 = tpu.matmul %523, %525, %cst_190 {dimension_numbers = #tpu.dot_dimension_numbers<[1], [0], [0], [1], [0, 0, 1, 1], [], []>} : vector<8x8xbf16>, vector<8x32xbf16>, vector<8x32xf32> -> vector<8x32xf32>
    %527 = arith.truncf %526 : vector<8x32xf32> to vector<8x32xbf16>
    %528 = vector.extract_strided_slice %418 {offsets = [96, 0], sizes = [32, 128], strides = [1, 1]} : vector<128x128xbf16> to vector<32x128xbf16>
    %cst_191 = arith.constant dense<0.000000e+00> : vector<8x128xf32>
    %529 = tpu.matmul %527, %528, %cst_191 {dimension_numbers = #tpu.dot_dimension_numbers<[1], [0], [0], [1], [0, 0, 1, 1], [], []>} : vector<8x32xbf16>, vector<32x128xbf16>, vector<8x128xf32> -> vector<8x128xf32>
    %530 = arith.addf %503, %529 : vector<8x128xf32>
    %c0_192 = arith.constant 0 : index
    %c0_193 = arith.constant 0 : index
    %531 = vector.load %arg36[%c0_192, %c0_193] : memref<1x128xf32, #tpu.memory_space<vmem>>, vector<1x128xf32>
    %532 = vector.broadcast %531 : vector<1x128xf32> to vector<8x128xf32>
    %533 = arith.addf %530, %532 : vector<8x128xf32>
    %534 = arith.addf %13, %533 : vector<8x128xf32>
    %c0_194 = arith.constant 0 : index
    %c0_195 = arith.constant 0 : index
    %535 = vector.load %arg43[%c0_194, %c0_195] : memref<1x128xf32, #tpu.memory_space<vmem>>, vector<1x128xf32>
    %c0_196 = arith.constant 0 : index
    %c0_197 = arith.constant 0 : index
    %536 = vector.load %arg44[%c0_196, %c0_197] : memref<1x128xf32, #tpu.memory_space<vmem>>, vector<1x128xf32>
    %cst_198 = arith.constant dense<0.000000e+00> : vector<8xf32>
    %537 = vector.multi_reduction <add>, %534, %cst_198 [1] : vector<8x128xf32> to vector<8xf32>
    %538 = vector.shape_cast %537 : vector<8xf32> to vector<8x1xf32>
    %cst_199 = arith.constant 1.280000e+02 : f32
    %539 = vector.broadcast %cst_199 : f32 to vector<8x1xf32>
    %540 = arith.divf %538, %539 : vector<8x1xf32>
    %541 = vector.broadcast %540 : vector<8x1xf32> to vector<8x128xf32>
    %542 = arith.subf %534, %541 : vector<8x128xf32>
    %543 = arith.mulf %542, %542 : vector<8x128xf32>
    %cst_200 = arith.constant dense<0.000000e+00> : vector<8xf32>
    %544 = vector.multi_reduction <add>, %543, %cst_200 [1] : vector<8x128xf32> to vector<8xf32>
    %545 = vector.shape_cast %544 : vector<8xf32> to vector<8x1xf32>
    %cst_201 = arith.constant 1.280000e+02 : f32
    %546 = vector.broadcast %cst_201 : f32 to vector<8x1xf32>
    %547 = arith.divf %545, %546 : vector<8x1xf32>
    %548 = vector.broadcast %540 : vector<8x1xf32> to vector<8x128xf32>
    %549 = arith.subf %534, %548 : vector<8x128xf32>
    %cst_202 = arith.constant 9.99999974E-6 : f32
    %550 = vector.broadcast %cst_202 : f32 to vector<8x1xf32>
    %551 = arith.addf %547, %550 : vector<8x1xf32>
    %552 = math.rsqrt %551 : vector<8x1xf32>
    %553 = vector.broadcast %552 : vector<8x1xf32> to vector<8x128xf32>
    %554 = arith.mulf %549, %553 : vector<8x128xf32>
    %555 = vector.broadcast %535 : vector<1x128xf32> to vector<8x128xf32>
    %556 = arith.mulf %554, %555 : vector<8x128xf32>
    %557 = vector.broadcast %536 : vector<1x128xf32> to vector<8x128xf32>
    %558 = arith.addf %556, %557 : vector<8x128xf32>
    %c0_203 = arith.constant 0 : index
    %c0_204 = arith.constant 0 : index
    %559 = vector.load %arg37[%c0_203, %c0_204] : memref<128x128xbf16, #tpu.memory_space<vmem>>, vector<128x128xbf16>
    %560 = arith.truncf %558 : vector<8x128xf32> to vector<8x128xbf16>
    %cst_205 = arith.constant dense<0.000000e+00> : vector<8x128xf32>
    %561 = tpu.matmul %560, %559, %cst_205 {dimension_numbers = #tpu.dot_dimension_numbers<[1], [0], [0], [1], [0, 0, 1, 1], [], []>} : vector<8x128xbf16>, vector<128x128xbf16>, vector<8x128xf32> -> vector<8x128xf32>
    %c0_206 = arith.constant 0 : index
    %c0_207 = arith.constant 0 : index
    %562 = vector.load %arg38[%c0_206, %c0_207] : memref<1x128xf32, #tpu.memory_space<vmem>>, vector<1x128xf32>
    %563 = vector.broadcast %562 : vector<1x128xf32> to vector<8x128xf32>
    %564 = arith.addf %561, %563 : vector<8x128xf32>
    %c0_208 = arith.constant 0 : index
    %c0_209 = arith.constant 0 : index
    %565 = vector.load %arg39[%c0_208, %c0_209] : memref<128x256xbf16, #tpu.memory_space<vmem>>, vector<128x256xbf16>
    %566 = arith.truncf %405 : vector<8x128xf32> to vector<8x128xbf16>
    %cst_210 = arith.constant dense<0.000000e+00> : vector<8x256xf32>
    %567 = tpu.matmul %566, %565, %cst_210 {dimension_numbers = #tpu.dot_dimension_numbers<[1], [0], [0], [1], [0, 0, 1, 1], [], []>} : vector<8x128xbf16>, vector<128x256xbf16>, vector<8x256xf32> -> vector<8x256xf32>
    %c0_211 = arith.constant 0 : index
    %c0_212 = arith.constant 0 : index
    %568 = vector.load %arg40[%c0_211, %c0_212] : memref<1x256xf32, #tpu.memory_space<vmem>>, vector<1x256xf32>
    %569 = vector.broadcast %568 : vector<1x256xf32> to vector<8x256xf32>
    %570 = arith.addf %567, %569 : vector<8x256xf32>
    %571 = vector.extract_strided_slice %570 {offsets = [0, 0], sizes = [8, 128], strides = [1, 1]} : vector<8x256xf32> to vector<8x128xf32>
    %572 = vector.extract_strided_slice %570 {offsets = [0, 128], sizes = [8, 128], strides = [1, 1]} : vector<8x256xf32> to vector<8x128xf32>
    %c0_213 = arith.constant 0 : index
    %c0_214 = arith.constant 0 : index
    %573 = vector.load %arg41[%c0_213, %c0_214] : memref<128x128xbf16, #tpu.memory_space<vmem>>, vector<128x128xbf16>
    %cst_215 = arith.constant 0.000000e+00 : f32
    %574 = vector.broadcast %cst_215 : f32 to vector<8x128xf32>
    %575 = vector.extract_strided_slice %564 {offsets = [0, 0], sizes = [8, 32], strides = [1, 1]} : vector<8x128xf32> to vector<8x32xf32>
    %576 = vector.extract_strided_slice %571 {offsets = [0, 0], sizes = [8, 32], strides = [1, 1]} : vector<8x128xf32> to vector<8x32xf32>
    %577 = arith.truncf %575 : vector<8x32xf32> to vector<8x32xbf16>
    %578 = arith.truncf %576 : vector<8x32xf32> to vector<8x32xbf16>
    %cst_216 = arith.constant dense<0.000000e+00> : vector<8x8xf32>
    %579 = tpu.matmul %577, %578, %cst_216 {dimension_numbers = #tpu.dot_dimension_numbers<[1], [1], [0], [0], [0, 0, 1, 0], [], []>} : vector<8x32xbf16>, vector<8x32xbf16>, vector<8x8xf32> -> vector<8x8xf32>
    %cst_217 = arith.constant 0.176776692 : f32
    %580 = vector.broadcast %cst_217 : f32 to vector<8x8xf32>
    %581 = arith.mulf %579, %580 : vector<8x8xf32>
    %cst_218 = arith.constant dense<0xFF800000> : vector<8xf32>
    %582 = vector.multi_reduction <maximumf>, %581, %cst_218 [1] : vector<8x8xf32> to vector<8xf32>
    %583 = vector.shape_cast %582 : vector<8xf32> to vector<8x1xf32>
    %584 = vector.broadcast %583 : vector<8x1xf32> to vector<8x8xf32>
    %585 = arith.subf %581, %584 : vector<8x8xf32>
    %586 = math.exp %585 : vector<8x8xf32>
    %cst_219 = arith.constant dense<0.000000e+00> : vector<8xf32>
    %587 = vector.multi_reduction <add>, %586, %cst_219 [1] : vector<8x8xf32> to vector<8xf32>
    %588 = vector.shape_cast %587 : vector<8xf32> to vector<8x1xf32>
    %589 = tpu.reciprocal %588 {approx = true} : vector<8x1xf32> -> vector<8x1xf32>
    %590 = vector.broadcast %589 : vector<8x1xf32> to vector<8x8xf32>
    %591 = arith.mulf %586, %590 : vector<8x8xf32>
    %592 = arith.truncf %591 : vector<8x8xf32> to vector<8x8xbf16>
    %593 = vector.extract_strided_slice %572 {offsets = [0, 0], sizes = [8, 32], strides = [1, 1]} : vector<8x128xf32> to vector<8x32xf32>
    %594 = arith.truncf %593 : vector<8x32xf32> to vector<8x32xbf16>
    %cst_220 = arith.constant dense<0.000000e+00> : vector<8x32xf32>
    %595 = tpu.matmul %592, %594, %cst_220 {dimension_numbers = #tpu.dot_dimension_numbers<[1], [0], [0], [1], [0, 0, 1, 1], [], []>} : vector<8x8xbf16>, vector<8x32xbf16>, vector<8x32xf32> -> vector<8x32xf32>
    %596 = arith.truncf %595 : vector<8x32xf32> to vector<8x32xbf16>
    %597 = vector.extract_strided_slice %573 {offsets = [0, 0], sizes = [32, 128], strides = [1, 1]} : vector<128x128xbf16> to vector<32x128xbf16>
    %cst_221 = arith.constant dense<0.000000e+00> : vector<8x128xf32>
    %598 = tpu.matmul %596, %597, %cst_221 {dimension_numbers = #tpu.dot_dimension_numbers<[1], [0], [0], [1], [0, 0, 1, 1], [], []>} : vector<8x32xbf16>, vector<32x128xbf16>, vector<8x128xf32> -> vector<8x128xf32>
    %599 = arith.addf %574, %598 : vector<8x128xf32>
    %600 = vector.extract_strided_slice %564 {offsets = [0, 32], sizes = [8, 32], strides = [1, 1]} : vector<8x128xf32> to vector<8x32xf32>
    %601 = vector.extract_strided_slice %571 {offsets = [0, 32], sizes = [8, 32], strides = [1, 1]} : vector<8x128xf32> to vector<8x32xf32>
    %602 = arith.truncf %600 : vector<8x32xf32> to vector<8x32xbf16>
    %603 = arith.truncf %601 : vector<8x32xf32> to vector<8x32xbf16>
    %cst_222 = arith.constant dense<0.000000e+00> : vector<8x8xf32>
    %604 = tpu.matmul %602, %603, %cst_222 {dimension_numbers = #tpu.dot_dimension_numbers<[1], [1], [0], [0], [0, 0, 1, 0], [], []>} : vector<8x32xbf16>, vector<8x32xbf16>, vector<8x8xf32> -> vector<8x8xf32>
    %cst_223 = arith.constant 0.176776692 : f32
    %605 = vector.broadcast %cst_223 : f32 to vector<8x8xf32>
    %606 = arith.mulf %604, %605 : vector<8x8xf32>
    %cst_224 = arith.constant dense<0xFF800000> : vector<8xf32>
    %607 = vector.multi_reduction <maximumf>, %606, %cst_224 [1] : vector<8x8xf32> to vector<8xf32>
    %608 = vector.shape_cast %607 : vector<8xf32> to vector<8x1xf32>
    %609 = vector.broadcast %608 : vector<8x1xf32> to vector<8x8xf32>
    %610 = arith.subf %606, %609 : vector<8x8xf32>
    %611 = math.exp %610 : vector<8x8xf32>
    %cst_225 = arith.constant dense<0.000000e+00> : vector<8xf32>
    %612 = vector.multi_reduction <add>, %611, %cst_225 [1] : vector<8x8xf32> to vector<8xf32>
    %613 = vector.shape_cast %612 : vector<8xf32> to vector<8x1xf32>
    %614 = tpu.reciprocal %613 {approx = true} : vector<8x1xf32> -> vector<8x1xf32>
    %615 = vector.broadcast %614 : vector<8x1xf32> to vector<8x8xf32>
    %616 = arith.mulf %611, %615 : vector<8x8xf32>
    %617 = arith.truncf %616 : vector<8x8xf32> to vector<8x8xbf16>
    %618 = vector.extract_strided_slice %572 {offsets = [0, 32], sizes = [8, 32], strides = [1, 1]} : vector<8x128xf32> to vector<8x32xf32>
    %619 = arith.truncf %618 : vector<8x32xf32> to vector<8x32xbf16>
    %cst_226 = arith.constant dense<0.000000e+00> : vector<8x32xf32>
    %620 = tpu.matmul %617, %619, %cst_226 {dimension_numbers = #tpu.dot_dimension_numbers<[1], [0], [0], [1], [0, 0, 1, 1], [], []>} : vector<8x8xbf16>, vector<8x32xbf16>, vector<8x32xf32> -> vector<8x32xf32>
    %621 = arith.truncf %620 : vector<8x32xf32> to vector<8x32xbf16>
    %622 = vector.extract_strided_slice %573 {offsets = [32, 0], sizes = [32, 128], strides = [1, 1]} : vector<128x128xbf16> to vector<32x128xbf16>
    %cst_227 = arith.constant dense<0.000000e+00> : vector<8x128xf32>
    %623 = tpu.matmul %621, %622, %cst_227 {dimension_numbers = #tpu.dot_dimension_numbers<[1], [0], [0], [1], [0, 0, 1, 1], [], []>} : vector<8x32xbf16>, vector<32x128xbf16>, vector<8x128xf32> -> vector<8x128xf32>
    %624 = arith.addf %599, %623 : vector<8x128xf32>
    %625 = vector.extract_strided_slice %564 {offsets = [0, 64], sizes = [8, 32], strides = [1, 1]} : vector<8x128xf32> to vector<8x32xf32>
    %626 = vector.extract_strided_slice %571 {offsets = [0, 64], sizes = [8, 32], strides = [1, 1]} : vector<8x128xf32> to vector<8x32xf32>
    %627 = arith.truncf %625 : vector<8x32xf32> to vector<8x32xbf16>
    %628 = arith.truncf %626 : vector<8x32xf32> to vector<8x32xbf16>
    %cst_228 = arith.constant dense<0.000000e+00> : vector<8x8xf32>
    %629 = tpu.matmul %627, %628, %cst_228 {dimension_numbers = #tpu.dot_dimension_numbers<[1], [1], [0], [0], [0, 0, 1, 0], [], []>} : vector<8x32xbf16>, vector<8x32xbf16>, vector<8x8xf32> -> vector<8x8xf32>
    %cst_229 = arith.constant 0.176776692 : f32
    %630 = vector.broadcast %cst_229 : f32 to vector<8x8xf32>
    %631 = arith.mulf %629, %630 : vector<8x8xf32>
    %cst_230 = arith.constant dense<0xFF800000> : vector<8xf32>
    %632 = vector.multi_reduction <maximumf>, %631, %cst_230 [1] : vector<8x8xf32> to vector<8xf32>
    %633 = vector.shape_cast %632 : vector<8xf32> to vector<8x1xf32>
    %634 = vector.broadcast %633 : vector<8x1xf32> to vector<8x8xf32>
    %635 = arith.subf %631, %634 : vector<8x8xf32>
    %636 = math.exp %635 : vector<8x8xf32>
    %cst_231 = arith.constant dense<0.000000e+00> : vector<8xf32>
    %637 = vector.multi_reduction <add>, %636, %cst_231 [1] : vector<8x8xf32> to vector<8xf32>
    %638 = vector.shape_cast %637 : vector<8xf32> to vector<8x1xf32>
    %639 = tpu.reciprocal %638 {approx = true} : vector<8x1xf32> -> vector<8x1xf32>
    %640 = vector.broadcast %639 : vector<8x1xf32> to vector<8x8xf32>
    %641 = arith.mulf %636, %640 : vector<8x8xf32>
    %642 = arith.truncf %641 : vector<8x8xf32> to vector<8x8xbf16>
    %643 = vector.extract_strided_slice %572 {offsets = [0, 64], sizes = [8, 32], strides = [1, 1]} : vector<8x128xf32> to vector<8x32xf32>
    %644 = arith.truncf %643 : vector<8x32xf32> to vector<8x32xbf16>
    %cst_232 = arith.constant dense<0.000000e+00> : vector<8x32xf32>
    %645 = tpu.matmul %642, %644, %cst_232 {dimension_numbers = #tpu.dot_dimension_numbers<[1], [0], [0], [1], [0, 0, 1, 1], [], []>} : vector<8x8xbf16>, vector<8x32xbf16>, vector<8x32xf32> -> vector<8x32xf32>
    %646 = arith.truncf %645 : vector<8x32xf32> to vector<8x32xbf16>
    %647 = vector.extract_strided_slice %573 {offsets = [64, 0], sizes = [32, 128], strides = [1, 1]} : vector<128x128xbf16> to vector<32x128xbf16>
    %cst_233 = arith.constant dense<0.000000e+00> : vector<8x128xf32>
    %648 = tpu.matmul %646, %647, %cst_233 {dimension_numbers = #tpu.dot_dimension_numbers<[1], [0], [0], [1], [0, 0, 1, 1], [], []>} : vector<8x32xbf16>, vector<32x128xbf16>, vector<8x128xf32> -> vector<8x128xf32>
    %649 = arith.addf %624, %648 : vector<8x128xf32>
    %650 = vector.extract_strided_slice %564 {offsets = [0, 96], sizes = [8, 32], strides = [1, 1]} : vector<8x128xf32> to vector<8x32xf32>
    %651 = vector.extract_strided_slice %571 {offsets = [0, 96], sizes = [8, 32], strides = [1, 1]} : vector<8x128xf32> to vector<8x32xf32>
    %652 = arith.truncf %650 : vector<8x32xf32> to vector<8x32xbf16>
    %653 = arith.truncf %651 : vector<8x32xf32> to vector<8x32xbf16>
    %cst_234 = arith.constant dense<0.000000e+00> : vector<8x8xf32>
    %654 = tpu.matmul %652, %653, %cst_234 {dimension_numbers = #tpu.dot_dimension_numbers<[1], [1], [0], [0], [0, 0, 1, 0], [], []>} : vector<8x32xbf16>, vector<8x32xbf16>, vector<8x8xf32> -> vector<8x8xf32>
    %cst_235 = arith.constant 0.176776692 : f32
    %655 = vector.broadcast %cst_235 : f32 to vector<8x8xf32>
    %656 = arith.mulf %654, %655 : vector<8x8xf32>
    %cst_236 = arith.constant dense<0xFF800000> : vector<8xf32>
    %657 = vector.multi_reduction <maximumf>, %656, %cst_236 [1] : vector<8x8xf32> to vector<8xf32>
    %658 = vector.shape_cast %657 : vector<8xf32> to vector<8x1xf32>
    %659 = vector.broadcast %658 : vector<8x1xf32> to vector<8x8xf32>
    %660 = arith.subf %656, %659 : vector<8x8xf32>
    %661 = math.exp %660 : vector<8x8xf32>
    %cst_237 = arith.constant dense<0.000000e+00> : vector<8xf32>
    %662 = vector.multi_reduction <add>, %661, %cst_237 [1] : vector<8x8xf32> to vector<8xf32>
    %663 = vector.shape_cast %662 : vector<8xf32> to vector<8x1xf32>
    %664 = tpu.reciprocal %663 {approx = true} : vector<8x1xf32> -> vector<8x1xf32>
    %665 = vector.broadcast %664 : vector<8x1xf32> to vector<8x8xf32>
    %666 = arith.mulf %661, %665 : vector<8x8xf32>
    %667 = arith.truncf %666 : vector<8x8xf32> to vector<8x8xbf16>
    %668 = vector.extract_strided_slice %572 {offsets = [0, 96], sizes = [8, 32], strides = [1, 1]} : vector<8x128xf32> to vector<8x32xf32>
    %669 = arith.truncf %668 : vector<8x32xf32> to vector<8x32xbf16>
    %cst_238 = arith.constant dense<0.000000e+00> : vector<8x32xf32>
    %670 = tpu.matmul %667, %669, %cst_238 {dimension_numbers = #tpu.dot_dimension_numbers<[1], [0], [0], [1], [0, 0, 1, 1], [], []>} : vector<8x8xbf16>, vector<8x32xbf16>, vector<8x32xf32> -> vector<8x32xf32>
    %671 = arith.truncf %670 : vector<8x32xf32> to vector<8x32xbf16>
    %672 = vector.extract_strided_slice %573 {offsets = [96, 0], sizes = [32, 128], strides = [1, 1]} : vector<128x128xbf16> to vector<32x128xbf16>
    %cst_239 = arith.constant dense<0.000000e+00> : vector<8x128xf32>
    %673 = tpu.matmul %671, %672, %cst_239 {dimension_numbers = #tpu.dot_dimension_numbers<[1], [0], [0], [1], [0, 0, 1, 1], [], []>} : vector<8x32xbf16>, vector<32x128xbf16>, vector<8x128xf32> -> vector<8x128xf32>
    %674 = arith.addf %649, %673 : vector<8x128xf32>
    %c0_240 = arith.constant 0 : index
    %c0_241 = arith.constant 0 : index
    %675 = vector.load %arg42[%c0_240, %c0_241] : memref<1x128xf32, #tpu.memory_space<vmem>>, vector<1x128xf32>
    %676 = vector.broadcast %675 : vector<1x128xf32> to vector<8x128xf32>
    %677 = arith.addf %674, %676 : vector<8x128xf32>
    %678 = arith.addf %558, %677 : vector<8x128xf32>
    %c0_242 = arith.constant 0 : index
    %c0_243 = arith.constant 0 : index
    %679 = vector.load %arg45[%c0_242, %c0_243] : memref<1x128xf32, #tpu.memory_space<vmem>>, vector<1x128xf32>
    %c0_244 = arith.constant 0 : index
    %c0_245 = arith.constant 0 : index
    %680 = vector.load %arg46[%c0_244, %c0_245] : memref<1x128xf32, #tpu.memory_space<vmem>>, vector<1x128xf32>
    %cst_246 = arith.constant dense<0.000000e+00> : vector<8xf32>
    %681 = vector.multi_reduction <add>, %678, %cst_246 [1] : vector<8x128xf32> to vector<8xf32>
    %682 = vector.shape_cast %681 : vector<8xf32> to vector<8x1xf32>
    %cst_247 = arith.constant 1.280000e+02 : f32
    %683 = vector.broadcast %cst_247 : f32 to vector<8x1xf32>
    %684 = arith.divf %682, %683 : vector<8x1xf32>
    %685 = vector.broadcast %684 : vector<8x1xf32> to vector<8x128xf32>
    %686 = arith.subf %678, %685 : vector<8x128xf32>
    %687 = arith.mulf %686, %686 : vector<8x128xf32>
    %cst_248 = arith.constant dense<0.000000e+00> : vector<8xf32>
    %688 = vector.multi_reduction <add>, %687, %cst_248 [1] : vector<8x128xf32> to vector<8xf32>
    %689 = vector.shape_cast %688 : vector<8xf32> to vector<8x1xf32>
    %cst_249 = arith.constant 1.280000e+02 : f32
    %690 = vector.broadcast %cst_249 : f32 to vector<8x1xf32>
    %691 = arith.divf %689, %690 : vector<8x1xf32>
    %692 = vector.broadcast %684 : vector<8x1xf32> to vector<8x128xf32>
    %693 = arith.subf %678, %692 : vector<8x128xf32>
    %cst_250 = arith.constant 9.99999974E-6 : f32
    %694 = vector.broadcast %cst_250 : f32 to vector<8x1xf32>
    %695 = arith.addf %691, %694 : vector<8x1xf32>
    %696 = math.rsqrt %695 : vector<8x1xf32>
    %697 = vector.broadcast %696 : vector<8x1xf32> to vector<8x128xf32>
    %698 = arith.mulf %693, %697 : vector<8x128xf32>
    %699 = vector.broadcast %679 : vector<1x128xf32> to vector<8x128xf32>
    %700 = arith.mulf %698, %699 : vector<8x128xf32>
    %701 = vector.broadcast %680 : vector<1x128xf32> to vector<8x128xf32>
    %702 = arith.addf %700, %701 : vector<8x128xf32>
    %c0_251 = arith.constant 0 : index
    %c0_252 = arith.constant 0 : index
    %703 = vector.load %arg49[%c0_251, %c0_252] : memref<128x256xbf16, #tpu.memory_space<vmem>>, vector<128x256xbf16>
    %704 = arith.truncf %702 : vector<8x128xf32> to vector<8x128xbf16>
    %cst_253 = arith.constant dense<0.000000e+00> : vector<8x256xf32>
    %705 = tpu.matmul %704, %703, %cst_253 {dimension_numbers = #tpu.dot_dimension_numbers<[1], [0], [0], [1], [0, 0, 1, 1], [], []>} : vector<8x128xbf16>, vector<128x256xbf16>, vector<8x256xf32> -> vector<8x256xf32>
    %c0_254 = arith.constant 0 : index
    %c0_255 = arith.constant 0 : index
    %706 = vector.load %arg50[%c0_254, %c0_255] : memref<1x256xf32, #tpu.memory_space<vmem>>, vector<1x256xf32>
    %707 = vector.broadcast %706 : vector<1x256xf32> to vector<8x256xf32>
    %708 = arith.addf %705, %707 : vector<8x256xf32>
    %cst_256 = arith.constant 5.000000e-01 : f32
    %709 = vector.broadcast %cst_256 : f32 to vector<8x256xf32>
    %710 = arith.mulf %709, %708 : vector<8x256xf32>
    %cst_257 = arith.constant 0.707106769 : f32
    %711 = vector.broadcast %cst_257 : f32 to vector<8x256xf32>
    %712 = arith.mulf %708, %711 : vector<8x256xf32>
    %713 = math.erf %712 : vector<8x256xf32>
    %cst_258 = arith.constant 1.000000e+00 : f32
    %714 = vector.broadcast %cst_258 : f32 to vector<8x256xf32>
    %715 = arith.addf %714, %713 : vector<8x256xf32>
    %716 = arith.mulf %710, %715 : vector<8x256xf32>
    %c0_259 = arith.constant 0 : index
    %c0_260 = arith.constant 0 : index
    %717 = vector.load %arg51[%c0_259, %c0_260] : memref<256x128xbf16, #tpu.memory_space<vmem>>, vector<256x128xbf16>
    %718 = arith.truncf %716 : vector<8x256xf32> to vector<8x256xbf16>
    %cst_261 = arith.constant dense<0.000000e+00> : vector<8x128xf32>
    %719 = tpu.matmul %718, %717, %cst_261 {dimension_numbers = #tpu.dot_dimension_numbers<[1], [0], [0], [1], [0, 0, 1, 1], [], []>} : vector<8x256xbf16>, vector<256x128xbf16>, vector<8x128xf32> -> vector<8x128xf32>
    %c0_262 = arith.constant 0 : index
    %c0_263 = arith.constant 0 : index
    %720 = vector.load %arg52[%c0_262, %c0_263] : memref<1x128xf32, #tpu.memory_space<vmem>>, vector<1x128xf32>
    %721 = vector.broadcast %720 : vector<1x128xf32> to vector<8x128xf32>
    %722 = arith.addf %719, %721 : vector<8x128xf32>
    %723 = arith.addf %702, %722 : vector<8x128xf32>
    %c0_264 = arith.constant 0 : index
    %c0_265 = arith.constant 0 : index
    %724 = vector.load %arg47[%c0_264, %c0_265] : memref<1x128xf32, #tpu.memory_space<vmem>>, vector<1x128xf32>
    %c0_266 = arith.constant 0 : index
    %c0_267 = arith.constant 0 : index
    %725 = vector.load %arg48[%c0_266, %c0_267] : memref<1x128xf32, #tpu.memory_space<vmem>>, vector<1x128xf32>
    %cst_268 = arith.constant dense<0.000000e+00> : vector<8xf32>
    %726 = vector.multi_reduction <add>, %723, %cst_268 [1] : vector<8x128xf32> to vector<8xf32>
    %727 = vector.shape_cast %726 : vector<8xf32> to vector<8x1xf32>
    %cst_269 = arith.constant 1.280000e+02 : f32
    %728 = vector.broadcast %cst_269 : f32 to vector<8x1xf32>
    %729 = arith.divf %727, %728 : vector<8x1xf32>
    %730 = vector.broadcast %729 : vector<8x1xf32> to vector<8x128xf32>
    %731 = arith.subf %723, %730 : vector<8x128xf32>
    %732 = arith.mulf %731, %731 : vector<8x128xf32>
    %cst_270 = arith.constant dense<0.000000e+00> : vector<8xf32>
    %733 = vector.multi_reduction <add>, %732, %cst_270 [1] : vector<8x128xf32> to vector<8xf32>
    %734 = vector.shape_cast %733 : vector<8xf32> to vector<8x1xf32>
    %cst_271 = arith.constant 1.280000e+02 : f32
    %735 = vector.broadcast %cst_271 : f32 to vector<8x1xf32>
    %736 = arith.divf %734, %735 : vector<8x1xf32>
    %737 = vector.broadcast %729 : vector<8x1xf32> to vector<8x128xf32>
    %738 = arith.subf %723, %737 : vector<8x128xf32>
    %cst_272 = arith.constant 9.99999974E-6 : f32
    %739 = vector.broadcast %cst_272 : f32 to vector<8x1xf32>
    %740 = arith.addf %736, %739 : vector<8x1xf32>
    %741 = math.rsqrt %740 : vector<8x1xf32>
    %742 = vector.broadcast %741 : vector<8x1xf32> to vector<8x128xf32>
    %743 = arith.mulf %738, %742 : vector<8x128xf32>
    %744 = vector.broadcast %724 : vector<1x128xf32> to vector<8x128xf32>
    %745 = arith.mulf %743, %744 : vector<8x128xf32>
    %746 = vector.broadcast %725 : vector<1x128xf32> to vector<8x128xf32>
    %747 = arith.addf %745, %746 : vector<8x128xf32>
    %c0_273 = arith.constant 0 : index
    %c0_274 = arith.constant 0 : index
    %748 = vector.load %arg53[%c0_273, %c0_274] : memref<1x128xf32, #tpu.memory_space<vmem>>, vector<1x128xf32>
    %c0_275 = arith.constant 0 : index
    %c0_276 = arith.constant 0 : index
    %749 = vector.load %arg54[%c0_275, %c0_276] : memref<1x128xf32, #tpu.memory_space<vmem>>, vector<1x128xf32>
    %cst_277 = arith.constant dense<0.000000e+00> : vector<8xf32>
    %750 = vector.multi_reduction <add>, %747, %cst_277 [1] : vector<8x128xf32> to vector<8xf32>
    %751 = vector.shape_cast %750 : vector<8xf32> to vector<8x1xf32>
    %cst_278 = arith.constant 1.280000e+02 : f32
    %752 = vector.broadcast %cst_278 : f32 to vector<8x1xf32>
    %753 = arith.divf %751, %752 : vector<8x1xf32>
    %754 = vector.broadcast %753 : vector<8x1xf32> to vector<8x128xf32>
    %755 = arith.subf %747, %754 : vector<8x128xf32>
    %756 = arith.mulf %755, %755 : vector<8x128xf32>
    %cst_279 = arith.constant dense<0.000000e+00> : vector<8xf32>
    %757 = vector.multi_reduction <add>, %756, %cst_279 [1] : vector<8x128xf32> to vector<8xf32>
    %758 = vector.shape_cast %757 : vector<8xf32> to vector<8x1xf32>
    %cst_280 = arith.constant 1.280000e+02 : f32
    %759 = vector.broadcast %cst_280 : f32 to vector<8x1xf32>
    %760 = arith.divf %758, %759 : vector<8x1xf32>
    %761 = vector.broadcast %753 : vector<8x1xf32> to vector<8x128xf32>
    %762 = arith.subf %747, %761 : vector<8x128xf32>
    %cst_281 = arith.constant 9.99999974E-6 : f32
    %763 = vector.broadcast %cst_281 : f32 to vector<8x1xf32>
    %764 = arith.addf %760, %763 : vector<8x1xf32>
    %765 = math.rsqrt %764 : vector<8x1xf32>
    %766 = vector.broadcast %765 : vector<8x1xf32> to vector<8x128xf32>
    %767 = arith.mulf %762, %766 : vector<8x128xf32>
    %768 = vector.broadcast %748 : vector<1x128xf32> to vector<8x128xf32>
    %769 = arith.mulf %767, %768 : vector<8x128xf32>
    %770 = vector.broadcast %749 : vector<1x128xf32> to vector<8x128xf32>
    %771 = arith.addf %769, %770 : vector<8x128xf32>
    %c0_282 = arith.constant 0 : index
    %c0_283 = arith.constant 0 : index
    %c0_284 = arith.constant 0 : index
    %772 = vector.load %arg58[%c0_282, %c0_283, %c0_284] : memref<1x8x128xf32, #tpu.memory_space<vmem>>, vector<1x8x128xf32>
    %773 = vector.shape_cast %772 : vector<1x8x128xf32> to vector<8x128xf32>
    %774 = vector.shape_cast %771 : vector<8x128xf32> to vector<1x8x128xf32>
    tpu.vector_store %arg58[%c0_282, %c0_283, %c0_284], %774 {strides = array<i32>} : memref<1x8x128xf32, #tpu.memory_space<vmem>>, vector<1x8x128xf32>,
    %c0_285 = arith.constant 0 : index
    %c0_286 = arith.constant 0 : index
    %775 = vector.load %arg55[%c0_285, %c0_286] : memref<128x128xbf16, #tpu.memory_space<vmem>>, vector<128x128xbf16>
    %776 = arith.truncf %771 : vector<8x128xf32> to vector<8x128xbf16>
    %cst_287 = arith.constant dense<0.000000e+00> : vector<8x128xf32>
    %777 = tpu.matmul %776, %775, %cst_287 {dimension_numbers = #tpu.dot_dimension_numbers<[1], [0], [0], [1], [0, 0, 1, 1], [], []>} : vector<8x128xbf16>, vector<128x128xbf16>, vector<8x128xf32> -> vector<8x128xf32>
    %c0_288 = arith.constant 0 : index
    %c0_289 = arith.constant 0 : index
    %778 = vector.load %arg56[%c0_288, %c0_289] : memref<1x128xf32, #tpu.memory_space<vmem>>, vector<1x128xf32>
    %779 = vector.broadcast %778 : vector<1x128xf32> to vector<8x128xf32>
    %780 = arith.addf %777, %779 : vector<8x128xf32>
    %c0_290 = arith.constant 0 : index
    %c0_291 = arith.constant 0 : index
    %c0_292 = arith.constant 0 : index
    %781 = vector.load %arg59[%c0_290, %c0_291, %c0_292] : memref<1x8x128xf32, #tpu.memory_space<vmem>>, vector<1x8x128xf32>
    %782 = vector.shape_cast %781 : vector<1x8x128xf32> to vector<8x128xf32>
    %783 = vector.shape_cast %780 : vector<8x128xf32> to vector<1x8x128xf32>
    tpu.vector_store %arg59[%c0_290, %c0_291, %c0_292], %783 {strides = array<i32>} : memref<1x8x128xf32, #tpu.memory_space<vmem>>, vector<1x8x128xf32>,
    return
  }
  func.func @transform_0(%arg0: i32) -> (i32, i32, i32) {
    %c0_i32 = arith.constant 0 : i32
    %c0_i32_0 = arith.constant 0 : i32
    %c0_i32_1 = arith.constant 0 : i32
    return %arg0, %c0_i32, %c0_i32_0 : i32, i32, i32
  }
  func.func @transform_1(%arg0: i32) -> (i32, i32, i32) {
    %c0_i32 = arith.constant 0 : i32
    %c0_i32_0 = arith.constant 0 : i32
    %c0_i32_1 = arith.constant 0 : i32
    return %arg0, %c0_i32, %c0_i32_0 : i32, i32, i32
  }
  func.func @transform_2(%arg0: i32) -> (i32, i32) {
    %c0_i32 = arith.constant 0 : i32
    %c0_i32_0 = arith.constant 0 : i32
    %c0_i32_1 = arith.constant 0 : i32
    return %c0_i32, %c0_i32_0 : i32, i32
  }
  func.func @transform_3(%arg0: i32) -> (i32, i32) {
    %c0_i32 = arith.constant 0 : i32
    %c0_i32_0 = arith.constant 0 : i32
    %c0_i32_1 = arith.constant 0 : i32
    return %c0_i32, %c0_i32_0 : i32, i32
  }
  func.func @transform_4(%arg0: i32) -> (i32, i32) {
    %c0_i32 = arith.constant 0 : i32
    %c0_i32_0 = arith.constant 0 : i32
    %c0_i32_1 = arith.constant 0 : i32
    return %c0_i32, %c0_i32_0 : i32, i32
  }
  func.func @transform_5(%arg0: i32) -> (i32, i32) {
    %c0_i32 = arith.constant 0 : i32
    %c0_i32_0 = arith.constant 0 : i32
    %c0_i32_1 = arith.constant 0 : i32
    return %c0_i32, %c0_i32_0 : i32, i32
  }
  func.func @transform_6(%arg0: i32) -> (i32, i32) {
    %c0_i32 = arith.constant 0 : i32
    %c0_i32_0 = arith.constant 0 : i32
    %c0_i32_1 = arith.constant 0 : i32
    return %c0_i32, %c0_i32_0 : i32, i32
  }
  func.func @transform_7(%arg0: i32) -> (i32, i32) {
    %c0_i32 = arith.constant 0 : i32
    %c0_i32_0 = arith.constant 0 : i32
    %c0_i32_1 = arith.constant 0 : i32
    return %c0_i32, %c0_i32_0 : i32, i32
  }
  func.func @transform_8(%arg0: i32) -> (i32, i32) {
    %c0_i32 = arith.constant 0 : i32
    %c0_i32_0 = arith.constant 0 : i32
    %c0_i32_1 = arith.constant 0 : i32
    return %c0_i32, %c0_i32_0 : i32, i32
  }
  func.func @transform_9(%arg0: i32) -> (i32, i32) {
    %c0_i32 = arith.constant 0 : i32
    %c0_i32_0 = arith.constant 0 : i32
    %c0_i32_1 = arith.constant 0 : i32
    return %c0_i32, %c0_i32_0 : i32, i32
  }
  func.func @transform_10(%arg0: i32) -> (i32, i32) {
    %c0_i32 = arith.constant 0 : i32
    %c0_i32_0 = arith.constant 0 : i32
    %c0_i32_1 = arith.constant 0 : i32
    return %c0_i32, %c0_i32_0 : i32, i32
  }
  func.func @transform_11(%arg0: i32) -> (i32, i32) {
    %c0_i32 = arith.constant 0 : i32
    %c0_i32_0 = arith.constant 0 : i32
    %c0_i32_1 = arith.constant 0 : i32
    return %c0_i32, %c0_i32_0 : i32, i32
  }
  func.func @transform_12(%arg0: i32) -> (i32, i32) {
    %c0_i32 = arith.constant 0 : i32
    %c0_i32_0 = arith.constant 0 : i32
    %c0_i32_1 = arith.constant 0 : i32
    return %c0_i32, %c0_i32_0 : i32, i32
  }
  func.func @transform_13(%arg0: i32) -> (i32, i32) {
    %c0_i32 = arith.constant 0 : i32
    %c0_i32_0 = arith.constant 0 : i32
    %c0_i32_1 = arith.constant 0 : i32
    return %c0_i32, %c0_i32_0 : i32, i32
  }
  func.func @transform_14(%arg0: i32) -> (i32, i32) {
    %c0_i32 = arith.constant 0 : i32
    %c0_i32_0 = arith.constant 0 : i32
    %c0_i32_1 = arith.constant 0 : i32
    return %c0_i32, %c0_i32_0 : i32, i32
  }
  func.func @transform_15(%arg0: i32) -> (i32, i32) {
    %c0_i32 = arith.constant 0 : i32
    %c0_i32_0 = arith.constant 0 : i32
    %c0_i32_1 = arith.constant 0 : i32
    return %c0_i32, %c0_i32_0 : i32, i32
  }
  func.func @transform_16(%arg0: i32) -> (i32, i32) {
    %c0_i32 = arith.constant 0 : i32
    %c0_i32_0 = arith.constant 0 : i32
    %c0_i32_1 = arith.constant 0 : i32
    return %c0_i32, %c0_i32_0 : i32, i32
  }
  func.func @transform_17(%arg0: i32) -> (i32, i32) {
    %c0_i32 = arith.constant 0 : i32
    %c0_i32_0 = arith.constant 0 : i32
    %c0_i32_1 = arith.constant 0 : i32
    return %c0_i32, %c0_i32_0 : i32, i32
  }
  func.func @transform_18(%arg0: i32) -> (i32, i32) {
    %c0_i32 = arith.constant 0 : i32
    %c0_i32_0 = arith.constant 0 : i32
    %c0_i32_1 = arith.constant 0 : i32
    return %c0_i32, %c0_i32_0 : i32, i32
  }
  func.func @transform_19(%arg0: i32) -> (i32, i32) {
    %c0_i32 = arith.constant 0 : i32
    %c0_i32_0 = arith.constant 0 : i32
    %c0_i32_1 = arith.constant 0 : i32
    return %c0_i32, %c0_i32_0 : i32, i32
  }
  func.func @transform_20(%arg0: i32) -> (i32, i32) {
    %c0_i32 = arith.constant 0 : i32
    %c0_i32_0 = arith.constant 0 : i32
    %c0_i32_1 = arith.constant 0 : i32
    return %c0_i32, %c0_i32_0 : i32, i32
  }
  func.func @transform_21(%arg0: i32) -> (i32, i32) {
    %c0_i32 = arith.constant 0 : i32
    %c0_i32_0 = arith.constant 0 : i32
    %c0_i32_1 = arith.constant 0 : i32
    return %c0_i32, %c0_i32_0 : i32, i32
  }
  func.func @transform_22(%arg0: i32) -> (i32, i32) {
    %c0_i32 = arith.constant 0 : i32
    %c0_i32_0 = arith.constant 0 : i32
    %c0_i32_1 = arith.constant 0 : i32
    return %c0_i32, %c0_i32_0 : i32, i32
  }
  func.func @transform_23(%arg0: i32) -> (i32, i32) {
    %c0_i32 = arith.constant 0 : i32
    %c0_i32_0 = arith.constant 0 : i32
    %c0_i32_1 = arith.constant 0 : i32
    return %c0_i32, %c0_i32_0 : i32, i32
  }
  func.func @transform_24(%arg0: i32) -> (i32, i32) {
    %c0_i32 = arith.constant 0 : i32
    %c0_i32_0 = arith.constant 0 : i32
    %c0_i32_1 = arith.constant 0 : i32
    return %c0_i32, %c0_i32_0 : i32, i32
  }
  func.func @transform_25(%arg0: i32) -> (i32, i32) {
    %c0_i32 = arith.constant 0 : i32
    %c0_i32_0 = arith.constant 0 : i32
    %c0_i32_1 = arith.constant 0 : i32
    return %c0_i32, %c0_i32_0 : i32, i32
  }
  func.func @transform_26(%arg0: i32) -> (i32, i32) {
    %c0_i32 = arith.constant 0 : i32
    %c0_i32_0 = arith.constant 0 : i32
    %c0_i32_1 = arith.constant 0 : i32
    return %c0_i32, %c0_i32_0 : i32, i32
  }
  func.func @transform_27(%arg0: i32) -> (i32, i32) {
    %c0_i32 = arith.constant 0 : i32
    %c0_i32_0 = arith.constant 0 : i32
    %c0_i32_1 = arith.constant 0 : i32
    return %c0_i32, %c0_i32_0 : i32, i32
  }
  func.func @transform_28(%arg0: i32) -> (i32, i32) {
    %c0_i32 = arith.constant 0 : i32
    %c0_i32_0 = arith.constant 0 : i32
    %c0_i32_1 = arith.constant 0 : i32
    return %c0_i32, %c0_i32_0 : i32, i32
  }
  func.func @transform_29(%arg0: i32) -> (i32, i32) {
    %c0_i32 = arith.constant 0 : i32
    %c0_i32_0 = arith.constant 0 : i32
    %c0_i32_1 = arith.constant 0 : i32
    return %c0_i32, %c0_i32_0 : i32, i32
  }
  func.func @transform_30(%arg0: i32) -> (i32, i32) {
    %c0_i32 = arith.constant 0 : i32
    %c0_i32_0 = arith.constant 0 : i32
    %c0_i32_1 = arith.constant 0 : i32
    return %c0_i32, %c0_i32_0 : i32, i32
  }
  func.func @transform_31(%arg0: i32) -> (i32, i32) {
    %c0_i32 = arith.constant 0 : i32
    %c0_i32_0 = arith.constant 0 : i32
    %c0_i32_1 = arith.constant 0 : i32
    return %c0_i32, %c0_i32_0 : i32, i32
  }
  func.func @transform_32(%arg0: i32) -> (i32, i32) {
    %c0_i32 = arith.constant 0 : i32
    %c0_i32_0 = arith.constant 0 : i32
    %c0_i32_1 = arith.constant 0 : i32
    return %c0_i32, %c0_i32_0 : i32, i32
  }
  func.func @transform_33(%arg0: i32) -> (i32, i32) {
    %c0_i32 = arith.constant 0 : i32
    %c0_i32_0 = arith.constant 0 : i32
    %c0_i32_1 = arith.constant 0 : i32
    return %c0_i32, %c0_i32_0 : i32, i32
  }
  func.func @transform_34(%arg0: i32) -> (i32, i32) {
    %c0_i32 = arith.constant 0 : i32
    %c0_i32_0 = arith.constant 0 : i32
    %c0_i32_1 = arith.constant 0 : i32
    return %c0_i32, %c0_i32_0 : i32, i32
  }
  func.func @transform_35(%arg0: i32) -> (i32, i32) {
    %c0_i32 = arith.constant 0 : i32
    %c0_i32_0 = arith.constant 0 : i32
    %c0_i32_1 = arith.constant 0 : i32
    return %c0_i32, %c0_i32_0 : i32, i32
  }
  func.func @transform_36(%arg0: i32) -> (i32, i32) {
    %c0_i32 = arith.constant 0 : i32
    %c0_i32_0 = arith.constant 0 : i32
    %c0_i32_1 = arith.constant 0 : i32
    return %c0_i32, %c0_i32_0 : i32, i32
  }
  func.func @transform_37(%arg0: i32) -> (i32, i32) {
    %c0_i32 = arith.constant 0 : i32
    %c0_i32_0 = arith.constant 0 : i32
    %c0_i32_1 = arith.constant 0 : i32
    return %c0_i32, %c0_i32_0 : i32, i32
  }
  func.func @transform_38(%arg0: i32) -> (i32, i32) {
    %c0_i32 = arith.constant 0 : i32
    %c0_i32_0 = arith.constant 0 : i32
    %c0_i32_1 = arith.constant 0 : i32
    return %c0_i32, %c0_i32_0 : i32, i32
  }
  func.func @transform_39(%arg0: i32) -> (i32, i32) {
    %c0_i32 = arith.constant 0 : i32
    %c0_i32_0 = arith.constant 0 : i32
    %c0_i32_1 = arith.constant 0 : i32
    return %c0_i32, %c0_i32_0 : i32, i32
  }
  func.func @transform_40(%arg0: i32) -> (i32, i32) {
    %c0_i32 = arith.constant 0 : i32
    %c0_i32_0 = arith.constant 0 : i32
    %c0_i32_1 = arith.constant 0 : i32
    return %c0_i32, %c0_i32_0 : i32, i32
  }
  func.func @transform_41(%arg0: i32) -> (i32, i32) {
    %c0_i32 = arith.constant 0 : i32
    %c0_i32_0 = arith.constant 0 : i32
    %c0_i32_1 = arith.constant 0 : i32
    return %c0_i32, %c0_i32_0 : i32, i32
  }
  func.func @transform_42(%arg0: i32) -> (i32, i32) {
    %c0_i32 = arith.constant 0 : i32
    %c0_i32_0 = arith.constant 0 : i32
    %c0_i32_1 = arith.constant 0 : i32
    return %c0_i32, %c0_i32_0 : i32, i32
  }
  func.func @transform_43(%arg0: i32) -> (i32, i32) {
    %c0_i32 = arith.constant 0 : i32
    %c0_i32_0 = arith.constant 0 : i32
    %c0_i32_1 = arith.constant 0 : i32
    return %c0_i32, %c0_i32_0 : i32, i32
  }
  func.func @transform_44(%arg0: i32) -> (i32, i32) {
    %c0_i32 = arith.constant 0 : i32
    %c0_i32_0 = arith.constant 0 : i32
    %c0_i32_1 = arith.constant 0 : i32
    return %c0_i32, %c0_i32_0 : i32, i32
  }
  func.func @transform_45(%arg0: i32) -> (i32, i32) {
    %c0_i32 = arith.constant 0 : i32
    %c0_i32_0 = arith.constant 0 : i32
    %c0_i32_1 = arith.constant 0 : i32
    return %c0_i32, %c0_i32_0 : i32, i32
  }
  func.func @transform_46(%arg0: i32) -> (i32, i32) {
    %c0_i32 = arith.constant 0 : i32
    %c0_i32_0 = arith.constant 0 : i32
    %c0_i32_1 = arith.constant 0 : i32
    return %c0_i32, %c0_i32_0 : i32, i32
  }
  func.func @transform_47(%arg0: i32) -> (i32, i32) {
    %c0_i32 = arith.constant 0 : i32
    %c0_i32_0 = arith.constant 0 : i32
    %c0_i32_1 = arith.constant 0 : i32
    return %c0_i32, %c0_i32_0 : i32, i32
  }
  func.func @transform_48(%arg0: i32) -> (i32, i32) {
    %c0_i32 = arith.constant 0 : i32
    %c0_i32_0 = arith.constant 0 : i32
    %c0_i32_1 = arith.constant 0 : i32
    return %c0_i32, %c0_i32_0 : i32, i32
  }
  func.func @transform_49(%arg0: i32) -> (i32, i32) {
    %c0_i32 = arith.constant 0 : i32
    %c0_i32_0 = arith.constant 0 : i32
    %c0_i32_1 = arith.constant 0 : i32
    return %c0_i32, %c0_i32_0 : i32, i32
  }
  func.func @transform_50(%arg0: i32) -> (i32, i32) {
    %c0_i32 = arith.constant 0 : i32
    %c0_i32_0 = arith.constant 0 : i32
    %c0_i32_1 = arith.constant 0 : i32
    return %c0_i32, %c0_i32_0 : i32, i32
  }
  func.func @transform_51(%arg0: i32) -> (i32, i32) {
    %c0_i32 = arith.constant 0 : i32
    %c0_i32_0 = arith.constant 0 : i32
    %c0_i32_1 = arith.constant 0 : i32
    return %c0_i32, %c0_i32_0 : i32, i32
  }
  func.func @transform_52(%arg0: i32) -> (i32, i32) {
    %c0_i32 = arith.constant 0 : i32
    %c0_i32_0 = arith.constant 0 : i32
    %c0_i32_1 = arith.constant 0 : i32
    return %c0_i32, %c0_i32_0 : i32, i32
  }
  func.func @transform_53(%arg0: i32) -> (i32, i32) {
    %c0_i32 = arith.constant 0 : i32
    %c0_i32_0 = arith.constant 0 : i32
    %c0_i32_1 = arith.constant 0 : i32
    return %c0_i32, %c0_i32_0 : i32, i32
  }
  func.func @transform_54(%arg0: i32) -> (i32, i32) {
    %c0_i32 = arith.constant 0 : i32
    %c0_i32_0 = arith.constant 0 : i32
    %c0_i32_1 = arith.constant 0 : i32
    return %c0_i32, %c0_i32_0 : i32, i32
  }
  func.func @transform_55(%arg0: i32) -> (i32, i32) {
    %c0_i32 = arith.constant 0 : i32
    %c0_i32_0 = arith.constant 0 : i32
    %c0_i32_1 = arith.constant 0 : i32
    return %c0_i32, %c0_i32_0 : i32, i32
  }
  func.func @transform_56(%arg0: i32) -> (i32, i32, i32) {
    %c0_i32 = arith.constant 0 : i32
    %c0_i32_0 = arith.constant 0 : i32
    %c0_i32_1 = arith.constant 0 : i32
    return %arg0, %c0_i32, %c0_i32_0 : i32, i32, i32
  }
  func.func @transform_57(%arg0: i32) -> (i32, i32, i32) {
    %c0_i32 = arith.constant 0 : i32
    %c0_i32_0 = arith.constant 0 : i32
    %c0_i32_1 = arith.constant 0 : i32
    return %arg0, %c0_i32, %c0_i32_0 : i32, i32, i32
  }
  func.func @transform_58(%arg0: i32) -> (i32, i32, i32) {
    %c0_i32 = arith.constant 0 : i32
    %c0_i32_0 = arith.constant 0 : i32
    %c0_i32_1 = arith.constant 0 : i32
    return %arg0, %c0_i32, %c0_i32_0 : i32, i32, i32
  }
}

</mosaic_0001>

<bundles_post_ra>
// kernel: transformer_base_forward.1
= control target key start
LH: loop header
LB: loop body
LE: loop exit
PB: predicated region body
PF: predicated region fallthrough
CT: control target
= control target key end

     0   :  { %s8864_s6 = smov 1   ;;  %s8865_s10 = smov 2   ;;  %s10171_s0 = inlined_call_operand.smem [shape: u32[59], index: -1, kind: input, shape index: {}] }
   0x1   :  { %s8938_s5 = sld [smem:[%s10171_s0]]   ;;  %s8866_s14 = smov 3  }
   0x2   :  { %s8943_s9 = sld [smem:[%s10171_s0 + %s8864_s6]]   ;;  %s8867_s18 = smov 4  }
   0x3   :  { %s8948_s13 = sld [smem:[%s10171_s0 + %s8865_s10]]   ;;  %s8868_s22 = smov 5  }
   0x4   :  { %s8953_s17 = sld [smem:[%s10171_s0 + %s8866_s14]]   ;;  %s8869_s26 = smov 6  }
   0x5   :  { %s8958_s21 = sld [smem:[%s10171_s0 + %s8867_s18]]   ;;  %s8870_s30 = smov 7  }
   0x6   :  { %s8963_s25 = sld [smem:[%s10171_s0 + %s8868_s22]]   ;;  %s8871_s4 = smov 8  }
   0x7   :  { %10204 = sst [smem:[#allocation8_spill]] %s8938_s5  ;;  %s8872_s10 = smov 9  }
   0x8   :  { %10205 = sst [smem:[#allocation9_spill]] %s8943_s9  ;;  %s8873_s15 = smov 10  }
   0x9   :  { %10206 = sst [smem:[#allocation10_spill]] %s8948_s13  ;;  %s8874_s20 = smov 11  }
   0xa   :  { %10207 = sst [smem:[#allocation11_spill]] %s8953_s17  ;;  %s8876_s1 = smov 13  }
   0xb   :  { %10208 = sst [smem:[#allocation12_spill]] %s8958_s21  ;;  %s8877_s7 = smov 14  }
   0xc   :  { %10209 = sst [smem:[#allocation13_spill]] %s8963_s25  ;;  %s8879_s22 = smov 16  }
   0xd   :  { %s8968_s29 = sld [smem:[%s10171_s0 + %s8869_s26]]   ;;  %s8875_s26 = smov 12  }
   0xe   :  { %s8973_s3 = sld [smem:[%s10171_s0 + %s8870_s30]]   ;;  %s8880_s28 = smov 17  }
   0xf   :  { %s8978_s8 = sld [smem:[%s10171_s0 + %s8871_s4]]  }
  0x10   :  { %s8983_s14 = sld [smem:[%s10171_s0 + %s8872_s10]]  }
  0x11   :  { %s8988_s19 = sld [smem:[%s10171_s0 + %s8873_s15]]   ;;  %s8878_s15 = smov 15  }
  0x12   :  { %s8993_s24 = sld [smem:[%s10171_s0 + %s8874_s20]]  }
  0x13   :  { %s8998_s30 = sld [smem:[%s10171_s0 + %s8875_s26]]  }
  0x14   :  { %10210 = sst [smem:[#allocation14_spill]] %s8973_s3 }
  0x15   :  { %10211 = sst [smem:[#allocation15_spill]] %s8978_s8 }
  0x16   :  { %10212 = sst [smem:[#allocation16_spill]] %s8983_s14 }
  0x17   :  { %10213 = sst [smem:[#allocation17_spill]] %s8988_s19 }
  0x18   :  { %s9003_s6 = sld [smem:[%s10171_s0 + %s8876_s1]]  }
  0x19   :  { %s9008_s12 = sld [smem:[%s10171_s0 + %s8877_s7]]   ;;  %s8881_s7 = smov 18  }
  0x1a   :  { %s9013_s20 = sld [smem:[%s10171_s0 + %s8878_s15]]   ;;  %s8882_s15 = smov 19  }
  0x1b   :  { %s9018_s27 = sld [smem:[%s10171_s0 + %s8879_s22]]   ;;  %s8883_s22 = smov 20  }
  0x1c   :  { %s9023_s4 = sld [smem:[%s10171_s0 + %s8880_s28]]   ;;  %s8884_s28 = smov 21  }
  0x1d   :  { %s9028_s25 = sld [smem:[%s10171_s0 + %s8881_s7]]   ;;  %s8885_s7 = smov 22  }
  0x1e   :  { %10214 = sst [smem:[#allocation18_spill]] %s9003_s6 }
  0x1f   :  { %10215 = sst [smem:[#allocation19_spill]] %s9008_s12 }
  0x20   :  { %10216 = sst [smem:[#allocation20_spill]] %s9013_s20 }
  0x21   :  { %10217 = sst [smem:[#allocation21_spill]] %s9018_s27 }
  0x22   :  { %10218 = sst [smem:[#allocation22_spill]] %s9023_s4 }
  0x23   :  { %10219 = sst [smem:[#allocation23_spill]] %s9028_s25 }
  0x24   :  { %s9033_s20 = sld [smem:[%s10171_s0 + %s8882_s15]]   ;;  %s8886_s15 = smov 23  }
  0x25   :  { %s9038_s27 = sld [smem:[%s10171_s0 + %s8883_s22]]   ;;  %s8887_s22 = smov 24  }
  0x26   :  { %s9043_s4 = sld [smem:[%s10171_s0 + %s8884_s28]]   ;;  %s8888_s28 = smov 25  }
  0x27   :  { %s9048_s25 = sld [smem:[%s10171_s0 + %s8885_s7]]   ;;  %s8889_s7 = smov 26  }
  0x2a   :  { %10220 = sst [smem:[#allocation24_spill]] %s9033_s20 }
  0x2b   :  { %10221 = sst [smem:[#allocation25_spill]] %s9038_s27 }
  0x2c   :  { %10222 = sst [smem:[#allocation26_spill]] %s9043_s4 }
  0x2d   :  { %10223 = sst [smem:[#allocation27_spill]] %s9048_s25 }
  0x2e   :  { %s9053_s20 = sld [smem:[%s10171_s0 + %s8886_s15]]   ;;  %s8890_s15 = smov 27  }
  0x2f   :  { %s9058_s27 = sld [smem:[%s10171_s0 + %s8887_s22]]   ;;  %s8891_s22 = smov 28  }
  0x30   :  { %s9063_s4 = sld [smem:[%s10171_s0 + %s8888_s28]]   ;;  %s8892_s28 = smov 29  }
  0x31   :  { %s9068_s25 = sld [smem:[%s10171_s0 + %s8889_s7]]   ;;  %s8893_s7 = smov 30  }
  0x34   :  { %10224 = sst [smem:[#allocation28_spill]] %s9053_s20 }
  0x35   :  { %10225 = sst [smem:[#allocation29_spill]] %s9058_s27 }
  0x36   :  { %10226 = sst [smem:[#allocation30_spill]] %s9063_s4 }
  0x37   :  { %10227 = sst [smem:[#allocation31_spill]] %s9068_s25 }
  0x38   :  { %s9073_s20 = sld [smem:[%s10171_s0 + %s8890_s15]]   ;;  %s8894_s15 = smov 31  }
  0x39   :  { %s9078_s27 = sld [smem:[%s10171_s0 + %s8891_s22]]   ;;  %s8895_s22 = smov 32  }
  0x3a   :  { %s9083_s4 = sld [smem:[%s10171_s0 + %s8892_s28]]   ;;  %s8896_s28 = smov 33  }
  0x3b   :  { %s9088_s25 = sld [smem:[%s10171_s0 + %s8893_s7]]   ;;  %s8897_s7 = smov 34  }
  0x3e   :  { %10228 = sst [smem:[#allocation32_spill]] %s9073_s20 }
  0x3f   :  { %10229 = sst [smem:[#allocation33_spill]] %s9078_s27 }
  0x40   :  { %10230 = sst [smem:[#allocation34_spill]] %s9083_s4 }
  0x41   :  { %10231 = sst [smem:[#allocation35_spill]] %s9088_s25 }
  0x42   :  { %s9093_s20 = sld [smem:[%s10171_s0 + %s8894_s15]]   ;;  %s8898_s15 = smov 35  }
  0x43   :  { %s9098_s27 = sld [smem:[%s10171_s0 + %s8895_s22]]   ;;  %s8899_s22 = smov 36  }
  0x44   :  { %s9103_s4 = sld [smem:[%s10171_s0 + %s8896_s28]]   ;;  %s8900_s28 = smov 37  }
  0x45   :  { %s9108_s25 = sld [smem:[%s10171_s0 + %s8897_s7]]   ;;  %s8901_s7 = smov 38  }
  0x48   :  { %10232 = sst [smem:[#allocation36_spill]] %s9093_s20 }
  0x49   :  { %10233 = sst [smem:[#allocation37_spill]] %s9098_s27 }
  0x4a   :  { %10234 = sst [smem:[#allocation38_spill]] %s9103_s4 }
  0x4b   :  { %10235 = sst [smem:[#allocation39_spill]] %s9108_s25 }
  0x4c   :  { %s9113_s20 = sld [smem:[%s10171_s0 + %s8898_s15]]   ;;  %s8902_s15 = smov 39  }
  0x4d   :  { %s9118_s27 = sld [smem:[%s10171_s0 + %s8899_s22]]   ;;  %s8903_s22 = smov 40  }
  0x4e   :  { %s9123_s4 = sld [smem:[%s10171_s0 + %s8900_s28]]   ;;  %s8904_s28 = smov 41  }
  0x4f   :  { %s9128_s25 = sld [smem:[%s10171_s0 + %s8901_s7]]   ;;  %s8905_s7 = smov 42  }
  0x52   :  { %10236 = sst [smem:[#allocation40_spill]] %s9113_s20 }
  0x53   :  { %10237 = sst [smem:[#allocation41_spill]] %s9118_s27 }
  0x54   :  { %10238 = sst [smem:[#allocation42_spill]] %s9123_s4 }
  0x55   :  { %10239 = sst [smem:[#allocation43_spill]] %s9128_s25 }
  0x56   :  { %s9133_s20 = sld [smem:[%s10171_s0 + %s8902_s15]]   ;;  %s8906_s15 = smov 43  }
  0x57   :  { %s9138_s27 = sld [smem:[%s10171_s0 + %s8903_s22]]   ;;  %s8907_s22 = smov 44  }
  0x58   :  { %s9143_s4 = sld [smem:[%s10171_s0 + %s8904_s28]]   ;;  %s8908_s28 = smov 45  }
  0x59   :  { %s9148_s25 = sld [smem:[%s10171_s0 + %s8905_s7]]   ;;  %s8909_s7 = smov 46  }
  0x5c   :  { %10240 = sst [smem:[#allocation44_spill]] %s9133_s20 }
  0x5d   :  { %10241 = sst [smem:[#allocation45_spill]] %s9138_s27 }
  0x5e   :  { %10242 = sst [smem:[#allocation46_spill]] %s9143_s4 }
  0x5f   :  { %10243 = sst [smem:[#allocation47_spill]] %s9148_s25 }
  0x60   :  { %s9153_s20 = sld [smem:[%s10171_s0 + %s8906_s15]]   ;;  %s8910_s15 = smov 47  }
  0x61   :  { %s9158_s27 = sld [smem:[%s10171_s0 + %s8907_s22]]   ;;  %s8911_s22 = smov 48  }
  0x62   :  { %s9163_s4 = sld [smem:[%s10171_s0 + %s8908_s28]]   ;;  %s8912_s28 = smov 49  }
  0x63   :  { %s9168_s25 = sld [smem:[%s10171_s0 + %s8909_s7]]   ;;  %s8913_s7 = smov 50  }
  0x66   :  { %10244 = sst [smem:[#allocation48_spill]] %s9153_s20 }
  0x67   :  { %10245 = sst [smem:[#allocation49_spill]] %s9158_s27 }
  0x68   :  { %10246 = sst [smem:[#allocation50_spill]] %s9163_s4 }
  0x69   :  { %10247 = sst [smem:[#allocation51_spill]] %s9168_s25 }
  0x6a   :  { %s9173_s20 = sld [smem:[%s10171_s0 + %s8910_s15]]   ;;  %s8914_s15 = smov 51  }
  0x6b   :  { %s9178_s27 = sld [smem:[%s10171_s0 + %s8911_s22]]   ;;  %s8915_s22 = smov 52  }
  0x6c   :  { %s9183_s4 = sld [smem:[%s10171_s0 + %s8912_s28]]   ;;  %s8916_s28 = smov 53  }
  0x6d   :  { %s9188_s25 = sld [smem:[%s10171_s0 + %s8913_s7]]   ;;  %s8917_s7 = smov 54  }
  0x70   :  { %10248 = sst [smem:[#allocation52_spill]] %s9173_s20 }
  0x71   :  { %10249 = sst [smem:[#allocation53_spill]] %s9178_s27 }
  0x72   :  { %10250 = sst [smem:[#allocation54_spill]] %s9183_s4 }
  0x73   :  { %10251 = sst [smem:[#allocation55_spill]] %s9188_s25 }
  0x74   :  { %s9193_s20 = sld [smem:[%s10171_s0 + %s8914_s15]]   ;;  %s8918_s15 = smov 55  }
  0x75   :  { %s9198_s27 = sld [smem:[%s10171_s0 + %s8915_s22]]   ;;  %s8919_s22 = smov 56  }
  0x76   :  { %s9203_s4 = sld [smem:[%s10171_s0 + %s8916_s28]]   ;;  %s8920_s28 = smov 57  }
  0x77   :  { %s9208_s25 = sld [smem:[%s10171_s0 + %s8917_s7]]   ;;  %s8921_s7 = smov 58  }
  0x7a   :  { %10252 = sst [smem:[#allocation56_spill]] %s9193_s20 }
  0x7b   :  { %10253 = sst [smem:[#allocation57_spill]] %s9198_s27 }
  0x7c   :  { %10254 = sst [smem:[#allocation58_spill]] %s9203_s4 }
  0x7d   :  { %10255 = sst [smem:[#allocation59_spill]] %s9208_s25 }
  0x7e   :  { %s9213_s20 = sld [smem:[%s10171_s0 + %s8918_s15]]  }
  0x7f   :  { %s9218_s27 = sld [smem:[%s10171_s0 + %s8919_s22]]  }
  0x80   :  { %s9223_s4 = sld [smem:[%s10171_s0 + %s8920_s28]]  }
  0x81   :  { %s9228_s25 = sld [smem:[%s10171_s0 + %s8921_s7]]  }
  0x82   :  { %123 = vsyncpa [#allocation3], 0 }
  0x83   :  { %125 = vsyncpa [#allocation3 + $0x1], 0 }
  0x84   :  { %126 = vsyncpa [#allocation5], 0 }
  0x85   :  { %128 = vsyncpa [#allocation5 + $0x1], 0  ;;  %s9230_s15 = smov 0   ;;  %s9232_s16 = smov 0  }
  0x86   :  { %s9234_s18 = smov 0   ;;  %s9236_s22 = smov 0  }
  0x87 LB: > { %s10256_s12 = sld [smem:[#allocation19_spill]]  ;;  %s10257_s8 = sld [smem:[#allocation15_spill]]  ;;  %s8854_s16 = sphi %s9232_s16, %s10315_s16   ;;  %s8850_s15 = sphi %s9230_s15, %s10314_s15   ;;  %s8862_s22 = sphi %s9236_s22, %s10317_s22   ;;  %s8858_s18 = sphi %s9234_s18, %s10316_s18  }
  0x88   : > { %s9251_s0 = sadd.s32 4294967295, %s8862_s22   ;;  %s7291_s23 = sadd.s32 4294967294, %s8862_s22  }
  0x89   : > { %s9255_s26 = sadd.s32 1, %s8862_s22   ;;  %s1327_s28 = sadd.s32 1, %s8858_s18 }
  0x8a   : > { %s1324_s1 = ssub.s32 %s8862_s22, %s9255_s26  ;;  %p1337_p0 = scmp.ne.s32.totalorder %s8858_s18, %s8854_s16 }
  0x8b   : > { %p1325_p1 = scmp.eq.s32.totalorder %s1324_s1, 0  ;;  %p1338_p2 = scmp.eq.s32.totalorder %s9251_s0, 1 }
  0x8c   : > { %p1343_p3 = scmp.ne.s32.totalorder %s8854_s16, %s8850_s15  ;;  %p1344_p4 = scmp.eq.s32.totalorder %s7291_s23, 1 }
  0x8d   : > { %s9266_s2 = scalar_select %p1325_p1, %s8858_s18, %s1327_s28  }
  0x8e   : > { %p9268_p5 = por %p1338_p2, %p1337_p0  ;;  %p9272_p6 = por %p1344_p4, %p1343_p3 }
  0x8f   : > { %p7294_p7 = scmp.ge.s32.totalorder %s8862_s22, 1  ;;  %p1590_p8 = scmp.lt.s32.totalorder %s8862_s22, 3 }
  0x91   : > { %p1591_p9 = pnand %p7294_p7, %p1590_p8 }
  0x92   : > { %vm1763_vm0 = vcmask (!%p1591_p9), 1045504   ;;  %s10260_s13 = sld [smem:[#allocation10_spill]] (!%p1591_p9)  ;;  %s10261_s21 = sld [smem:[#allocation12_spill]] (!%p1591_p9)  ;;  %v8922_v0 = vmov (!%p1591_p9), 0.0   ;;  %vm8923_vm1 = vmmov (!%p1591_p9), 0   ;;  %vm1759_vm2 = vcmask (!%p1591_p9), 97280  }
  0x93   : > { %1594 = sbr.rel (%p1591_p9) target bundleno = 14506 (0x38aa), region = 244  ;;  %s10262_s5 = sld [smem:[#allocation8_spill]] (!%p1591_p9)  ;;  %7844 = vmatprep.subr.bf16.mxu0 (!%p1591_p9), %v8922_v0  ;;  %7850 = vmatprep.subr.bf16.mxu1 (!%p1591_p9), %v8922_v0  ;;  %v8388_v5 = vld [vmem:[%s8968_s29 + $0x4] ss:$12 sps:$4 sm:$0xff] (!%p1591_p9)   ;;  %v8386_v6 = vld [vmem:[%s8968_s29] ss:$12 sps:$4 sm:$0xff] (!%p1591_p9)   ;;  %v1898_v45 = vlaneseq (!%p1591_p9) }
  0x94   : > { %p1736_p10 = scmp.lt.s32.totalorder (!%p1591_p9), %s9251_s0, 1  ;;  %s10263_s9 = sld [smem:[#allocation9_spill]] (!%p1591_p9)  ;;  %7846 = vmatprep.mubr.msk.bf16.mxu0 (!%p1591_p9), %vm8923_vm1, %v8922_v0  ;;  %7852 = vmatprep.mubr.msk.bf16.mxu1 (!%p1591_p9), %vm8923_vm1, %v8922_v0  ;;  %v8389_v7 = vld [vmem:[%s8968_s29 + $0x8] ss:$12 sps:$4 sm:$0xff] (!%p1591_p9)   ;;  %v8390_v13 = vld [vmem:[%s8968_s29 + $0x18] ss:$12 sps:$4 sm:$0xff] (!%p1591_p9)  }
  0x95   : > { %v8392_v12 = vld [vmem:[%s8968_s29 + $0x1c] ss:$12 sps:$4 sm:$0xff] (!%p1591_p9)   ;;  %v8393_v14 = vld [vmem:[%s8968_s29 + $0x20] ss:$12 sps:$4 sm:$0xff] (!%p1591_p9)   ;;  %v8397_v17 = vld [vmem:[%s8968_s29 + $0x38] ss:$12 sps:$4 sm:$0xff] (!%p1591_p9)  }
  0x96   : > { %v8396_v15 = vld [vmem:[%s8968_s29 + $0x34] ss:$12 sps:$4 sm:$0xff] (!%p1591_p9)   ;;  %v8394_v16 = vld [vmem:[%s8968_s29 + $0x30] ss:$12 sps:$4 sm:$0xff] (!%p1591_p9)   ;;  %v8400_v18 = vld [vmem:[%s8968_s29 + $0x4c] ss:$12 sps:$4 sm:$0xff] (!%p1591_p9)  }
  0x97   : > { %v8398_v19 = vld [vmem:[%s8968_s29 + $0x48] ss:$12 sps:$4 sm:$0xff] (!%p1591_p9)   ;;  %v8401_v20 = vld [vmem:[%s8968_s29 + $0x50] ss:$12 sps:$4 sm:$0xff] (!%p1591_p9)   ;;  %v8402_v22 = vld [vmem:[%s8968_s29 + $0x60] ss:$12 sps:$4 sm:$0xff] (!%p1591_p9)  }
  0x98   : > { %v8384_v1 = vld [vmem:[%s10260_s13] sm:$0x3f] (!%p1591_p9)   ;;  %v8405_v23 = vld [vmem:[%s8968_s29 + $0x68] ss:$12 sps:$4 sm:$0xff] (!%p1591_p9)   ;;  %v8410_v28 = vld [vmem:[%s8968_s29 + $0x90] ss:$12 sps:$4 sm:$0xff] (!%p1591_p9)  }
  0x99   : > { %v8385_v2 = vld [vmem:[%s10261_s21] sm:$0x3f] (!%p1591_p9)   ;;  %v1765_v3 = vsel (!%p1591_p9), %vm1763_vm0, %v8384_v1, 0  ;;  %v8408_v24 = vld [vmem:[%s8968_s29 + $0x7c] ss:$12 sps:$4 sm:$0xff] (!%p1591_p9)   ;;  %s10264_s17 = sld [smem:[#allocation11_spill]] (!%p1591_p9) }
  0x9a   : > { %s1737_s11 = scalar_select %p1736_p10, %s9251_s0, 1  ;;  %7845 = vmatpush3.bf16.msra.mxu0 %v1765_v3  ;;  %v1821_v4 = vsel %vm1763_vm0, %v8385_v2, 0  ;;  %v8404_v21 = vld [vmem:[%s8968_s29 + $0x64] ss:$12 sps:$4 sm:$0xff]   ;;  %v8409_v26 = vld [vmem:[%s8968_s29 + $0x80] ss:$12 sps:$4 sm:$0xff]  }
  0x9b   : > { %7851 = vmatpush3.bf16.msra.mxu1 %v1821_v4  ;;  %2041 = vmatprep.subr.bf16.mxu0 %v8388_v5  ;;  %v8406_v25 = vld [vmem:[%s8968_s29 + $0x78] ss:$12 sps:$4 sm:$0xff]   ;;  %v8412_v27 = vld [vmem:[%s8968_s29 + $0x94] ss:$12 sps:$4 sm:$0xff]   ;;  %v8417_v32 = vld [vmem:[%s8968_s29 + $0xb0] ss:$12 sps:$4 sm:$0xff]  }
  0x9c   : > { %s9289_s23 = sshll.u32 %s1737_s11, 3  ;;  %7856 = vmatprep.subr.bf16.mxu1 %v8922_v0  ;;  %v8413_v29 = vld [vmem:[%s8968_s29 + $0x98] ss:$12 sps:$4 sm:$0xff]   ;;  %v8414_v31 = vld [vmem:[%s8968_s29 + $0xa8] ss:$12 sps:$4 sm:$0xff]   ;;  %v8924_v33 = vmov 0  }
  0x9d   : > { %s1739_s28 = scalar_lea.vmem %s10262_s5, %s9289_s23  ;;  %s1743_s1 = scalar_lea.vmem %s10263_s9, %s9289_s23  ;;  %v8416_v30 = vld [vmem:[%s8968_s29 + $0xac] ss:$12 sps:$4 sm:$0xff]   ;;  %v9343_v46 = vshrl.u32 %v1898_v45, 7  ;;  %vm2140_vm3 = vcmask 261120   ;;  %vm2205_vm4 = vcmask 1043456   ;;  %vm2188_vm5 = vcmask 64512  }
  0x9e   : > { %v1749_v8 = vld [vmem:[%s1739_s28] sm:$0xff]  ;;  %s10265_s3 = sld [smem:[#allocation14_spill]]  ;;  %s10188_s11 = smov 96  }
  0x9f   : > { %v1807_v9 = vld [vmem:[%s1743_s1] sm:$0xff]  ;;  %v1752_v10 = vpack.c.bf16 %v1749_v8, %v1749_v8  ;;  %v9346_v47 = vsub.s32 1, %v9343_v46  ;;  %v9350_v49 = vsub.s32 0, %v9343_v46  ;;  %v9353_v50 = vsub.s32 2, %v9343_v46  ;;  %s10186_s28 = smov 64   ;;  %s10184_s1 = smov 32  }
  0xa0   : > { %v1810_v11 = vpack.c.bf16 %v1807_v9, %v1807_v9  ;;  %v1753_v34 = vld [vmem:[%s10264_s17] sm:$0xff]  ;;  %s10266_s14 = sld [smem:[#allocation16_spill]]  ;;  %s10267_s19 = sld [smem:[#allocation17_spill]] }
  0xa1   : > { %7847 = vmatmul.mubr.msk.bf16.vlgmr.msra.gmra.mrb[0].mxu0 %vm1759_vm2, %v1752_v10  ;;  %s10268_s6 = sld [smem:[#allocation18_spill]]  ;;  %s10277_s5 = smov 32  }
  0xa2   : > { %7853 = vmatmul.mubr.msk.bf16.vlgmr.msra.gmra.mrb[0].mxu1 %vm1759_vm2, %v1810_v11  ;;  %2042 = vmatpush1.bf16.msra.mxu0 %v8386_v6  ;;  %s10282_s9 = sld [smem:[#allocation27_spill]] }
  0xa3   : > { %7857 = vmatpush3.bf16.msra.mxu1 %v8389_v7  ;;  %2043 = vmatprep.subr.bf16.mxu0 %v8392_v12 }
  0xa4   : > { %7858 = vmatprep.subr.bf16.mxu1 %v8922_v0  ;;  %7872 = vmatprep.mubr.msk.bf16.mxu1 %vm8923_vm1, %v8922_v0  ;;  %v1896_v48 = vld [vmem:[%s10265_s3] sm:$0x7]  ;;  %s10273_s3 = sld [smem:[#allocation24_spill]] }
  0xa5   : > { %2073 = vmatprep.mubr.bf16.mxu0 %v8924_v33  ;;  %v1905_v51 = vrot.slane %v1896_v48, %v9346_v47  ;;  %v1901_v52 = vrot.slane %v1896_v48, %v9350_v49  ;;  %v1909_v57 = vrot.slane %v1896_v48, %v9353_v50  ;;  %v8420_v48 = vld [vmem:[%s10257_s8 + $0x10] sm:$0xff]  }
  0xa6   : > { %2044 = vmatpush1.bf16.msra.mxu0 %v8390_v13 }
  0xa7   : > { %7859 = vmatpush3.bf16.msra.mxu1 %v8393_v14  ;;  %2045 = vmatprep.subr.bf16.mxu0 %v8396_v15 }
  0xa8   : > { %7860 = vmatprep.subr.bf16.mxu1 %v8922_v0 }
  0xaa   : > { %2046 = vmatpush1.bf16.msra.mxu0 %v8394_v16 }
  0xab   : > { %7861 = vmatpush3.bf16.msra.mxu1 %v8397_v17  ;;  %2047 = vmatprep.subr.bf16.mxu0 %v8400_v18 }
  0xac   : > { %7862 = vmatprep.subr.bf16.mxu1 %v8922_v0 }
  0xae   : > { %2048 = vmatpush1.bf16.msra.mxu0 %v8398_v19 }
  0xaf   : > { %7863 = vmatpush3.bf16.msra.mxu1 %v8401_v20  ;;  %2049 = vmatprep.subr.bf16.mxu0 %v8404_v21 }
  0xb0   : > { %7864 = vmatprep.subr.bf16.mxu1 %v8922_v0 }
  0xb2   : > { %2050 = vmatpush1.bf16.msra.mxu0 %v8402_v22 }
  0xb3   : > { %7865 = vmatpush3.bf16.msra.mxu1 %v8405_v23  ;;  %2051 = vmatprep.subr.bf16.mxu0 %v8408_v24 }
  0xb4   : > { %7866 = vmatprep.subr.bf16.mxu1 %v8922_v0 }
  0xb6   : > { %2052 = vmatpush1.bf16.msra.mxu0 %v8406_v25 }
  0xb7   : > { %7867 = vmatpush3.bf16.msra.mxu1 %v8409_v26  ;;  %2053 = vmatprep.subr.bf16.mxu0 %v8412_v27 }
  0xb8   : > { %7868 = vmatprep.subr.bf16.mxu1 %v8922_v0 }
  0xba   : > { %2054 = vmatpush1.bf16.msra.mxu0 %v8410_v28 }
  0xbb   : > { %7869 = vmatpush3.bf16.msra.mxu1 %v8413_v29  ;;  %2055 = vmatprep.subr.bf16.mxu0 %v8416_v30 }
  0xbc   : > { %7870 = vmatprep.subr.bf16.mxu1 %v8922_v0 }
  0xbe   : > { %2056 = vmatpush1.bf16.msra.mxu0 %v8414_v31 }
  0xbf   : > { %7871 = vmatpush3.bf16.msra.mxu1 %v8417_v32  ;;  %7900 = vmatprep.subr.bf16.mxu0 %v8922_v0 }
  0xc0   : > { %7876 = vmatprep.subr.bf16.mxu1 %v8922_v0 }
 0x174   : > { %v1801_v35 = vpop.f32.mrb[0].mxu0 }
 0x175   : > { %v9332_v36 = vpop.f32.mrb[0].mxu1  ;;  %v9334_v37 = vadd.f32 %v1801_v35, %v1753_v34  ;;  %v7848_v38 = vpop.f32.mrb[1].mxu0 }
 0x176   : > { %v7854_v39 = vpop.f32.mrb[1].mxu1  ;;  %v1804_v40 = vpop.f32.mrb[2].mxu0 }
 0x177   : > { %v1860_v41 = vpop.f32.mrb[2].mxu1  ;;  %v1895_v42 = vpack.c.bf16 %v9334_v37, %v9334_v37  ;;  %v7849_v43 = vpop.f32.mrb[3].mxu0 }
 0x178   : > { %v7855_v44 = vpop.f32.mrb[3].mxu1 }
 0x179   : > { %2074 = vmatmul.mubr.bf16.vlgmr.msra.gmra.mrb[4].mxu0 %v1895_v42  ;;  %7873 = vmatmul.mubr.bf16.vlgmr.msra.gmra.mrb[4].mxu1 %v1895_v42 }
 0x17a   : > { %7878 = vmatprep.mubr.msk.bf16.mxu1 %vm8923_vm1, %v8922_v0  ;;  %7904 = vmatprep.mubr.msk.bf16.mxu0 %vm8923_vm1, %v8922_v0 }
 0x17b   : > { %7901 = vmatpush3.bf16.msra.mxu0 %v8420_v48 }
 0x17c   : > { %7902 = vmatprep.subr.bf16.mxu0 %v8922_v0 }
 0x24c   : > { %v2075_v53 = vpop.f32.mrb[4].mxu0  ;;  %v2116_v54 = vpop.f32.mrb[4].mxu1 }
 0x24d   : > { %v2077_v55 = vpop.f32.mrb[5].mxu0  ;;  %v7874_v56 = vpop.f32.mrb[5].mxu1  ;;  %v2076_v63 = vadd.f32 %v2075_v53, %v1901_v52  ;;  %v2117_v2 = vadd.f32 %v2116_v54, %v1909_v57  ;;  %v8419_v57 = vld [vmem:[%s10257_s8 + $0x8] sm:$0xff]  }
 0x24e   : > { %v2078_v58 = vadd.f32 %v2077_v55, %v1905_v51  ;;  %v2079_v59 = vpop.f32.mrb[6].mxu0  ;;  %v2119_v60 = vpop.f32.mrb[6].mxu1  ;;  %v8421_v51 = vld [vmem:[%s10257_s8 + $0x18] sm:$0xff]   ;;  %v8418_v55 = vld [vmem:[%s10257_s8] sm:$0xff]  }
 0x24f   : > { %v2080_v61 = vpop.f32.mrb[7].mxu0  ;;  %v7875_v62 = vpop.f32.mrb[7].mxu1  ;;  %v9364_v4 = vpack.c.bf16 %v2076_v63, %v2076_v63  ;;  %v9367_v5 = vpack.c.bf16 %v2117_v2, %v2117_v2  ;;  %7903 = vmatpush3.bf16.msra.mxu0 %v8421_v51 }
 0x250   : > { %v9358_v1 = vpack.c.bf16 %v2078_v58, %v2078_v58  ;;  %7916 = vmatprep.subr.bf16.mxu0 %v8922_v0 }
 0x251   : > { %v2207_v6 = vsel %vm2205_vm4, %v9367_v5, 0 }
 0x252   : > { %2254 = vrot.lane.b32.xlu1 %v9358_v1, %s10188_s11  ;;  %v2145_v3 = vsel %vm2140_vm3, %v9358_v1, 0 }
 0x253   : > { %7877 = vmatpush3.bf16.xpose.msra.mxu1 %v2145_v3 }
 0x254   : > { %7882 = vmatprep.subr.bf16.mxu1 %v8922_v0 }
 0x256   : > { %2251 = vrot.lane.b32.xlu1 %v9364_v4, %s10188_s11 }
 0x25a   : > { %7879 = vmatmul.mubr.msk.bf16.vlgmr.msra.gmra.mrb[8].mxu1 %vm2140_vm3, %v9364_v4 }
 0x25b   : > { %7883 = vmatpush3.bf16.msra.mxu1 %v2207_v6  ;;  %7884 = vmatprep.mubr.msk.bf16.mxu1 %vm8923_vm1, %v8922_v0 }
 0x25c   : > { %7888 = vmatprep.subr.bf16.mxu1 %v8922_v0 }
 0x2c4   : > { %v2255_v21 = vpop.permute.xlu1 %2254 }
 0x2c5   : > { %v2260_v23 = vsel %vm2140_vm3, %v2255_v21, 0 }
 0x2c8   : > { %v2252_v24 = vpop.permute.xlu1 %2251 }
 0x32d   : > { %v2181_v7 = vpop.f32.mrb[8].mxu1 }
 0x32e   : > { %v2187_v8 = vmul.f32 0.17677669, %v2181_v7  ;;  %v7880_v9 = vpop.f32.mrb[9].mxu1 }
 0x32f   : > { %v2184_v10 = vpop.f32.mrb[10].mxu1 }
 0x330   : > { %v7881_v11 = vpop.f32.mrb[11].mxu1  ;;  %v2189_v12 = vsel %vm2188_vm5, %v2187_v8, -inf }
 0x331   : > { %2190 = vmax.xlane.f32.xlu0 %v2189_v12 }
 0x3be   : > { %v2191_v13 = vpop.xlane.xlu0 %2190 }
 0x3bf   : > { %v2192_v14 = vsub.f32 %v2187_v8, %v2191_v13 }
 0x3c1   : > { %v2193_v15 = vmul.f32 1.442695, %v2192_v14 }
 0x3c3   : > { %8674 = vpow2.f32 %v2193_v15 }
 0x3cd   : > { %v8675_v16 = vpop.eup %8674 }
 0x3ce   : > { %v2195_v17 = vsel %vm2188_vm5, %v8675_v16, 0.0 }
 0x3cf   : > { %2196 = vadd.xlane.f32.xlu0 %v2195_v17 }
 0x45c   : > { %v2197_v18 = vpop.xlane.xlu0 %2196 }
 0x45d   : > { %8676 = vrcp.f32 %v2197_v18 }
 0x467   : > { %v8677_v19 = vpop.eup %8676 }
 0x468   : > { %v2199_v20 = vmul.f32 %v8677_v19, %v8675_v16 }
 0x46a   : > { %v2200_v22 = vpack.c.bf16 %v2199_v20, %v2199_v20 }
 0x46c   : > { %7885 = vmatmul.mubr.msk.bf16.vlgmr.msra.gmra.mrb[12].mxu1 %vm2188_vm5, %v2200_v22 }
 0x46d   : > { %7889 = vmatpush3.bf16.xpose.msra.mxu1 %v2260_v23  ;;  %7890 = vmatprep.mubr.msk.bf16.mxu1 %vm8923_vm1, %v8922_v0 }
 0x46e   : > { %7894 = vmatprep.subr.bf16.mxu1 %v8922_v0 }
 0x474   : > { %7891 = vmatmul.mubr.msk.bf16.vlgmr.msra.gmra.mrb[16].mxu1 %vm2140_vm3, %v2252_v24 }
 0x475   : > { %7896 = vmatprep.mubr.msk.bf16.mxu1 %vm8923_vm1, %v8922_v0 }
 0x53f   : > { %v2243_v25 = vpop.f32.mrb[12].mxu1 }
 0x540   : > { %v7886_v26 = vpop.f32.mrb[13].mxu1  ;;  %v2249_v59 = vpack.c.bf16 %v2243_v25, %v2243_v25 }
 0x541   : > { %v2246_v27 = vpop.f32.mrb[14].mxu1 }
 0x542   : > { %v7887_v28 = vpop.f32.mrb[15].mxu1 }
 0x547   : > { %v2296_v29 = vpop.f32.mrb[16].mxu1 }
 0x548   : > { %v2302_v30 = vmul.f32 0.17677669, %v2296_v29  ;;  %v7892_v31 = vpop.f32.mrb[17].mxu1  ;;  %v8422_v29 = vld [vmem:[%s10257_s8 + $0x20] sm:$0xff]  }
 0x549   : > { %v2299_v32 = vpop.f32.mrb[18].mxu1 }
 0x54a   : > { %v7893_v34 = vpop.f32.mrb[19].mxu1  ;;  %v2303_v35 = vsel %vm2188_vm5, %v2302_v30, -inf }
 0x54b   : > { %2304 = vmax.xlane.f32.xlu0 %v2303_v35 }
 0x561   : > { %2316 = vrot.lane.b32.xlu0 %v9367_v5, %s10188_s11  ;;  %s10272_s11 = sld [smem:[#allocation22_spill]] }
 0x565   : > { %2477 = vrot.lane.b32.xlu0 %v9358_v1, %s10186_s28 }
 0x569   : > { %2475 = vrot.lane.b32.xlu0 %v9364_v4, %s10186_s28 }
 0x5d8   : > { %v2305_v38 = vpop.xlane.xlu0 %2304 }
 0x5d9   : > { %v2306_v39 = vsub.f32 %v2302_v30, %v2305_v38 }
 0x5db   : > { %v2307_v40 = vmul.f32 1.442695, %v2306_v39 }
 0x5dc   : > { %v2317_v41 = vpop.permute.xlu0 %2316 }
 0x5dd   : > { %8678 = vpow2.f32 %v2307_v40  ;;  %v2322_v42 = vsel %vm2205_vm4, %v2317_v41, 0 }
 0x5de   : > { %7895 = vmatpush3.bf16.msra.mxu1 %v2322_v42 }
 0x5df   : > { %7908 = vmatprep.subr.bf16.mxu1 %v8922_v0 }
 0x5e0   : > { %v2478_v61 = vpop.permute.xlu0 %2477 }
 0x5e1   : > { %v2483_v6 = vsel %vm2140_vm3, %v2478_v61, 0 }
 0x5e4   : > { %v2476_v10 = vpop.permute.xlu0 %2475 }
 0x5e7   : > { %v8679_v43 = vpop.eup %8678 }
 0x5e8   : > { %v2309_v44 = vsel %vm2188_vm5, %v8679_v43, 0.0 }
 0x5e9   : > { %2310 = vadd.xlane.f32.xlu1 %v2309_v44 }
 0x5fa   : > { %2538 = vrot.lane.b32.xlu1 %v9367_v5, %s10186_s28  ;;  %s10270_s28 = sld [smem:[#allocation23_spill]] }
 0x676   : > { %v2311_v52 = vpop.xlane.xlu1 %2310 }
 0x677   : > { %8680 = vrcp.f32 %v2311_v52 }
 0x67a   : > { %v2539_v58 = vpop.permute.xlu1 %2538 }
 0x67b   : > { %v2544_v60 = vsel %vm2205_vm4, %v2539_v58, 0 }
 0x681   : > { %v8681_v53 = vpop.eup %8680 }
 0x682   : > { %v2313_v54 = vmul.f32 %v8681_v53, %v8679_v43 }
 0x684   : > { %v2314_v56 = vpack.c.bf16 %v2313_v54, %v2313_v54 }
 0x686   : > { %7897 = vmatmul.mubr.msk.bf16.vlgmr.msra.gmra.mrb[20].mxu1 %vm2188_vm5, %v2314_v56 }
 0x687   : > { %7909 = vmatpush3.bf16.msra.mxu1 %v8418_v55  ;;  %7912 = vmatprep.mubr.msk.bf16.mxu1 %vm8923_vm1, %v8922_v0 }
 0x688   : > { %7910 = vmatprep.subr.bf16.mxu1 %v8922_v0 }
 0x68b   : > { %7911 = vmatpush3.bf16.msra.mxu1 %v8419_v57 }
 0x68c   : > { %7922 = vmatprep.subr.bf16.mxu1 %v8922_v0 }
 0x68e   : > { %7913 = vmatmul.mubr.msk.bf16.vlgmr.msra.gmra.mrb[24].mxu1 %vm2140_vm3, %v2249_v59 }
 0x68f   : > { %7923 = vmatpush3.bf16.msra.mxu1 %v2544_v60  ;;  %7924 = vmatprep.mubr.msk.bf16.mxu1 %vm8923_vm1, %v8922_v0 }
 0x690   : > { %7936 = vmatprep.subr.bf16.mxu1 %v8922_v0 }
 0x759   : > { %v2358_v62 = vpop.f32.mrb[20].mxu1 }
 0x75a   : > { %v2364_v63 = vpack.c.bf16 %v2358_v62, %v2358_v62  ;;  %v7898_v2 = vpop.f32.mrb[21].mxu1  ;;  %v8424_v62 = vld [vmem:[%s10257_s8 + $0x30] sm:$0xff]  }
 0x75b   : > { %v2361_v3 = vpop.f32.mrb[22].mxu1 }
 0x75c   : > { %v7899_v7 = vpop.f32.mrb[23].mxu1  ;;  %7905 = vmatmul.mubr.msk.bf16.vlgmr.msra.gmra.mrb[8].mxu0 %vm2140_vm3, %v2364_v63 }
 0x75d   : > { %7917 = vmatpush3.bf16.xpose.msra.mxu0 %v2483_v6  ;;  %7918 = vmatprep.mubr.msk.bf16.mxu0 %vm8923_vm1, %v8922_v0 }
 0x75e   : > { %7928 = vmatprep.subr.bf16.mxu0 %v8922_v0 }
 0x761   : > { %v2469_v8 = vpop.f32.mrb[24].mxu1 }
 0x762   : > { %v7914_v9 = vpop.f32.mrb[25].mxu1 }
 0x763   : > { %v2472_v11 = vpop.f32.mrb[26].mxu1 }
 0x764   : > { %v7915_v12 = vpop.f32.mrb[27].mxu1  ;;  %7919 = vmatmul.mubr.msk.bf16.vlgmr.msra.gmra.mrb[12].mxu0 %vm2140_vm3, %v2476_v10  ;;  %v8425_v11 = vld [vmem:[%s10257_s8 + $0x38] sm:$0xff]  }
 0x765   : > { %7932 = vmatprep.mubr.msk.bf16.mxu0 %vm8923_vm1, %v8922_v0  ;;  %7929 = vmatpush3.bf16.msra.mxu0 %v8422_v29  ;;  %v8434_v29 = vld [vmem:[%s8998_s30 + $0x24] ss:$8 sps:$4 sm:$0xff]  }
 0x766   : > { %7930 = vmatprep.subr.bf16.mxu0 %v8922_v0 }
 0x82f   : > { %v2414_v13 = vpop.f32.mrb[8].mxu0 }
 0x830   : > { %v9424_v14 = vadd.f32 %v2469_v8, %v2414_v13  ;;  %v7906_v15 = vpop.f32.mrb[9].mxu0 }
 0x831   : > { %v2417_v16 = vpop.f32.mrb[10].mxu0 }
 0x832   : > { %v7907_v17 = vpop.f32.mrb[11].mxu0 }
 0x837   : > { %v2519_v18 = vpop.f32.mrb[12].mxu0 }
 0x838   : > { %v2525_v19 = vmul.f32 0.17677669, %v2519_v18  ;;  %v7920_v20 = vpop.f32.mrb[13].mxu0  ;;  %v7348_v18 = vld [vmem:[%s10266_s14] ss:$0 sm:$0xff] }
 0x839   : > { %v2522_v21 = vpop.f32.mrb[14].mxu0 }
 0x83a   : > { %v7921_v22 = vpop.f32.mrb[15].mxu0  ;;  %v2526_v23 = vsel %vm2188_vm5, %v2525_v19, -inf }
 0x83b   : > { %2527 = vmax.xlane.f32.xlu0 %v2526_v23 }
 0x8c8   : > { %v2528_v24 = vpop.xlane.xlu0 %2527 }
 0x8c9   : > { %v2529_v25 = vsub.f32 %v2525_v19, %v2528_v24 }
 0x8cb   : > { %v2530_v26 = vmul.f32 1.442695, %v2529_v25  ;;  %v8426_v25 = vld [vmem:[%s8998_s30] ss:$8 sps:$4 sm:$0xff]  }
 0x8cd   : > { %8682 = vpow2.f32 %v2530_v26  ;;  %v8428_v26 = vld [vmem:[%s8998_s30 + $0x4] ss:$8 sps:$4 sm:$0xff]  }
 0x8d7   : > { %v8683_v27 = vpop.eup %8682 }
 0x8d8   : > { %v2532_v28 = vsel %vm2188_vm5, %v8683_v27, 0.0 }
 0x8d9   : > { %2533 = vadd.xlane.f32.xlu1 %v2532_v28  ;;  %v8429_v28 = vld [vmem:[%s8998_s30 + $0x10] ss:$8 sps:$4 sm:$0xff]  }
 0x8ea   : > { %2645 = vrot.lane.b32.xlu1 %v9358_v1, %s10184_s1 }
 0x8ee   : > { %2643 = vrot.lane.b32.xlu1 %v9364_v4, %s10184_s1  ;;  %v8423_v4 = vld [vmem:[%s10257_s8 + $0x28] sm:$0xff]   ;;  %s10279_s8 = sld [smem:[#allocation29_spill]] }
 0x8ef   : > { %7931 = vmatpush3.bf16.msra.mxu0 %v8423_v4  ;;  %v8438_v4 = vld [vmem:[%s8998_s30 + $0x40] ss:$8 sps:$4 sm:$0xff]  }
 0x8f0   : > { %7942 = vmatprep.subr.bf16.mxu0 %v8922_v0 }
 0x966   : > { %v2534_v30 = vpop.xlane.xlu1 %2533 }
 0x967   : > { %8684 = vrcp.f32 %v2534_v30  ;;  %v8432_v30 = vld [vmem:[%s8998_s30 + $0x20] ss:$8 sps:$4 sm:$0xff]  }
 0x96a   : > { %v2646_v34 = vpop.permute.xlu1 %2645 }
 0x96b   : > { %v2651_v38 = vsel %vm2140_vm3, %v2646_v34, 0 }
 0x96e   : > { %v2644_v1 = vpop.permute.xlu1 %2643 }
 0x971   : > { %v8685_v31 = vpop.eup %8684 }
 0x972   : > { %v2536_v32 = vmul.f32 %v8685_v31, %v8683_v27  ;;  %v8431_v27 = vld [vmem:[%s8998_s30 + $0x14] ss:$8 sps:$4 sm:$0xff]  }
 0x974   : > { %v2537_v35 = vpack.c.bf16 %v2536_v32, %v2536_v32 }
 0x976   : > { %7925 = vmatmul.mubr.msk.bf16.vlgmr.msra.gmra.mrb[28].mxu1 %vm2188_vm5, %v2537_v35  ;;  %v8437_v35 = vld [vmem:[%s8998_s30 + $0x34] ss:$8 sps:$4 sm:$0xff]  }
 0x977   : > { %7937 = vmatpush3.bf16.xpose.msra.mxu1 %v2651_v38  ;;  %7938 = vmatprep.mubr.msk.bf16.mxu1 %vm8923_vm1, %v8922_v0  ;;  %v8435_v38 = vld [vmem:[%s8998_s30 + $0x30] ss:$8 sps:$4 sm:$0xff]  }
 0x978   : > { %7948 = vmatprep.subr.bf16.mxu1 %v8922_v0 }
 0x97e   : > { %7939 = vmatmul.mubr.msk.bf16.vlgmr.msra.gmra.mrb[32].mxu1 %vm2140_vm3, %v2644_v1  ;;  %v8440_v1 = vld [vmem:[%s8998_s30 + $0x44] ss:$8 sps:$4 sm:$0xff]  }
 0x97f   : > { %7952 = vmatprep.mubr.msk.bf16.mxu1 %vm8923_vm1, %v8922_v0  ;;  %7949 = vmatpush3.bf16.msra.mxu1 %v8424_v62 }
 0x980   : > { %7950 = vmatprep.subr.bf16.mxu1 %v8922_v0 }
 0x983   : > { %7951 = vmatpush3.bf16.msra.mxu1 %v8425_v11  ;;  %v8462_v11 = vld [vmem:[%s10256_s12 + $0x70] sm:$0xff]  }
 0xa49   : > { %v2580_v39 = vpop.f32.mrb[28].mxu1 }
 0xa4a   : > { %v2586_v40 = vpack.c.bf16 %v2580_v39, %v2580_v39  ;;  %v7926_v41 = vpop.f32.mrb[29].mxu1  ;;  %v8443_v39 = vld [vmem:[%s8998_s30 + $0x54] ss:$8 sps:$4 sm:$0xff]  }
 0xa4b   : > { %v2583_v42 = vpop.f32.mrb[30].mxu1  ;;  %v8446_v41 = vld [vmem:[%s8998_s30 + $0x64] ss:$8 sps:$4 sm:$0xff]  }
 0xa4c   : > { %v7927_v43 = vpop.f32.mrb[31].mxu1  ;;  %7933 = vmatmul.mubr.msk.bf16.vlgmr.msra.gmra.mrb[16].mxu0 %vm2140_vm3, %v2586_v40  ;;  %v8441_v40 = vld [vmem:[%s8998_s30 + $0x50] ss:$8 sps:$4 sm:$0xff]   ;;  %v8444_v42 = vld [vmem:[%s8998_s30 + $0x60] ss:$8 sps:$4 sm:$0xff]  }
 0xa4d   : > { %7944 = vmatprep.mubr.msk.bf16.mxu0 %vm8923_vm1, %v8922_v0  ;;  %v8449_v43 = vld [vmem:[%s8998_s30 + $0x74] ss:$8 sps:$4 sm:$0xff]  }
 0xa51   : > { %v2687_v44 = vpop.f32.mrb[32].mxu1 }
 0xa52   : > { %v2693_v48 = vmul.f32 0.17677669, %v2687_v44  ;;  %v7940_v51 = vpop.f32.mrb[33].mxu1  ;;  %v8447_v44 = vld [vmem:[%s8998_s30 + $0x70] ss:$8 sps:$4 sm:$0xff]  }
 0xa53   : > { %v2690_v52 = vpop.f32.mrb[34].mxu1  ;;  %v8451_v51 = vld [vmem:[%s10256_s12] sm:$0xff]  }
 0xa54   : > { %v7941_v53 = vpop.f32.mrb[35].mxu1  ;;  %v2694_v54 = vsel %vm2188_vm5, %v2693_v48, -inf  ;;  %v8452_v52 = vld [vmem:[%s10256_s12 + $0x48] sm:$0xff]  }
 0xa55   : > { %2695 = vmax.xlane.f32.xlu0 %v2694_v54  ;;  %v8453_v53 = vld [vmem:[%s10256_s12 + $0x8] sm:$0xff]  }
 0xa6b   : > { %2706 = vrot.lane.b32.xlu0 %v9367_v5, %s10184_s1  ;;  %s10269_s1 = sld [smem:[#allocation20_spill]] }
 0xae2   : > { %v2696_v55 = vpop.xlane.xlu0 %2695 }
 0xae3   : > { %v2697_v56 = vsub.f32 %v2693_v48, %v2696_v55  ;;  %v8450_v48 = vld [vmem:[%s10256_s12 + $0x40] sm:$0xff]  }
 0xae4   : > { %7658 = vmatprep.subr.bf16.mxu1 %v8450_v48  ;;  %v8468_v48 = vld [vmem:[%s10270_s28 + $0x4] ss:$12 sps:$4 sm:$0xff]  }
 0xae5   : > { %v2698_v57 = vmul.f32 1.442695, %v2697_v56 }
 0xae6   : > { %v2707_v58 = vpop.permute.xlu0 %2706 }
 0xae7   : > { %8686 = vpow2.f32 %v2698_v57  ;;  %v2712_v59 = vsel %vm2205_vm4, %v2707_v58, 0  ;;  %v7349_v58 = vld [vmem:[%s10267_s19] ss:$0 sm:$0xff] }
 0xae8   : > { %7943 = vmatpush3.bf16.msra.mxu0 %v2712_v59 }
 0xae9   : > { %2957 = vmatprep.subr.bf16.mxu0 %v8428_v26 }
 0xaf1   : > { %v8687_v60 = vpop.eup %8686 }
 0xaf2   : > { %v2700_v61 = vsel %vm2188_vm5, %v8687_v60, 0.0 }
 0xaf3   : > { %2701 = vadd.xlane.f32.xlu1 %v2700_v61 }
 0xb1f   : > { %v2636_v63 = vpop.f32.mrb[16].mxu0 }
 0xb20   : > { %v2642_v5 = vadd.f32 %v2636_v63, %v9424_v14  ;;  %v7934_v2 = vpop.f32.mrb[17].mxu0 }
 0xb21   : > { %v2639_v3 = vpop.f32.mrb[18].mxu0  ;;  %v8455_v2 = vld [vmem:[%s10256_s12 + $0x10] sm:$0xff]  }
 0xb22   : > { %v7935_v6 = vpop.f32.mrb[19].mxu0  ;;  %v8456_v3 = vld [vmem:[%s10256_s12 + $0x58] sm:$0xff]  }
 0xb23   : > { %v8457_v6 = vld [vmem:[%s10256_s12 + $0x18] sm:$0xff]  }
 0xb80   : > { %v2702_v7 = vpop.xlane.xlu1 %2701 }
 0xb81   : > { %8688 = vrcp.f32 %v2702_v7  ;;  %v8458_v7 = vld [vmem:[%s10256_s12 + $0x60] sm:$0xff]  }
 0xb8b   : > { %v8689_v8 = vpop.eup %8688 }
 0xb8c   : > { %v2704_v9 = vmul.f32 %v8689_v8, %v8687_v60  ;;  %v7350_v60 = vld [vmem:[%s8993_s24] ss:$0 sm:$0xff] }
 0xb8d   : > { %v8459_v8 = vld [vmem:[%s10256_s12 + $0x20] sm:$0xff]  }
 0xb8e   : > { %v2705_v10 = vpack.c.bf16 %v2704_v9, %v2704_v9  ;;  %v8460_v9 = vld [vmem:[%s10256_s12 + $0x68] sm:$0xff]  }
 0xb90   : > { %7945 = vmatmul.mubr.msk.bf16.vlgmr.msra.gmra.mrb[20].mxu0 %vm2188_vm5, %v2705_v10  ;;  %v8461_v10 = vld [vmem:[%s10256_s12 + $0x28] sm:$0xff]  }
 0xb91   : > { %2989 = vmatprep.mubr.bf16.mxu0 %v8924_v33  ;;  %2958 = vmatpush1.bf16.msra.mxu0 %v8426_v25 }
 0xb92   : > { %2959 = vmatprep.subr.bf16.mxu0 %v8431_v27 }
 0xb95   : > { %2960 = vmatpush1.bf16.msra.mxu0 %v8429_v28 }
 0xb96   : > { %2961 = vmatprep.subr.bf16.mxu0 %v8434_v29 }
 0xb99   : > { %2962 = vmatpush1.bf16.msra.mxu0 %v8432_v30 }
 0xb9a   : > { %2963 = vmatprep.subr.bf16.mxu0 %v8437_v35 }
 0xb9d   : > { %2964 = vmatpush1.bf16.msra.mxu0 %v8435_v38 }
 0xb9e   : > { %2965 = vmatprep.subr.bf16.mxu0 %v8440_v1  ;;  %v7367_v1 = vld [vmem:[%s10269_s1] ss:$0 sm:$0xff]  ;;  %s10271_s1 = sld [smem:[#allocation21_spill]] }
 0xba1   : > { %2966 = vmatpush1.bf16.msra.mxu0 %v8438_v4 }
 0xba2   : > { %2967 = vmatprep.subr.bf16.mxu0 %v8443_v39 }
 0xba5   : > { %2968 = vmatpush1.bf16.msra.mxu0 %v8441_v40 }
 0xba6   : > { %2969 = vmatprep.subr.bf16.mxu0 %v8446_v41 }
 0xba9   : > { %2970 = vmatpush1.bf16.msra.mxu0 %v8444_v42 }
 0xbaa   : > { %2971 = vmatprep.subr.bf16.mxu0 %v8449_v43 }
 0xbad   : > { %2972 = vmatpush1.bf16.msra.mxu0 %v8447_v44  ;;  %v8466_v44 = vld [vmem:[%s10270_s28] ss:$12 sps:$4 sm:$0xff]  }
 0xbae   : > { %3391 = vmatprep.subr.bf16.mxu0 %v8468_v48 }
 0xc63   : > { %v2748_v12 = vpop.f32.mrb[20].mxu0 }
 0xc64   : > { %v2754_v13 = vpack.c.bf16 %v2748_v12, %v2748_v12  ;;  %v7946_v14 = vpop.f32.mrb[21].mxu0  ;;  %v8463_v12 = vld [vmem:[%s10256_s12 + $0x30] sm:$0xff]  }
 0xc65   : > { %v2751_v15 = vpop.f32.mrb[22].mxu0  ;;  %v8465_v14 = vld [vmem:[%s10256_s12 + $0x38] sm:$0xff]  }
 0xc66   : > { %v7947_v16 = vpop.f32.mrb[23].mxu0  ;;  %7953 = vmatmul.mubr.msk.bf16.vlgmr.msra.gmra.mrb[36].mxu1 %vm2140_vm3, %v2754_v13  ;;  %v8464_v13 = vld [vmem:[%s10256_s12 + $0x78] sm:$0xff]   ;;  %v2865_v15 = vld [vmem:[%s10268_s6] sm:$0x3]  ;;  %s10278_s6 = sld [smem:[#allocation26_spill]] }
 0xc67   : > { %7659 = vmatpush3.bf16.msra.mxu1 %v8451_v51  ;;  %v2870_v16 = vrot.slane %v2865_v15, %v9350_v49  ;;  %v8469_v51 = vld [vmem:[%s10270_s28 + $0x8] ss:$12 sps:$4 sm:$0xff]  }
 0xc68   : > { %7660 = vmatprep.subr.bf16.mxu1 %v8452_v52  ;;  %v8472_v52 = vld [vmem:[%s10270_s28 + $0x1c] ss:$12 sps:$4 sm:$0xff]  }
 0xc6b   : > { %7661 = vmatpush3.bf16.msra.mxu1 %v8453_v53  ;;  %v8473_v53 = vld [vmem:[%s10270_s28 + $0x20] ss:$12 sps:$4 sm:$0xff]  }
 0xd39   : > { %v2804_v17 = vpop.f32.mrb[36].mxu1 }
 0xd3a   : > { %v2810_v19 = vadd.f32 %v2804_v17, %v2642_v5  ;;  %v7954_v20 = vpop.f32.mrb[37].mxu1  ;;  %v8454_v5 = vld [vmem:[%s10256_s12 + $0x50] sm:$0xff]   ;;  %v2874_v17 = vrot.slane %v2865_v15, %v9346_v47  ;;  %s10283_s12 = sld [smem:[#allocation28_spill]] }
 0xd3b   : > { %v2807_v21 = vpop.f32.mrb[38].mxu1  ;;  %7662 = vmatprep.subr.bf16.mxu1 %v8454_v5  ;;  %v8481_v5 = vld [vmem:[%s10270_s28 + $0x50] ss:$12 sps:$4 sm:$0xff]  }
 0xd3c   : > { %v2818_v22 = vadd.f32 %v7348_v18, %v2810_v19  ;;  %v7955_v23 = vpop.f32.mrb[39].mxu1  ;;  %7663 = vmatpush3.bf16.msra.mxu1 %v8455_v2  ;;  %v8484_v2 = vld [vmem:[%s10270_s28 + $0x64] ss:$12 sps:$4 sm:$0xff]  }
 0xd3d   : > { %7664 = vmatprep.subr.bf16.mxu1 %v8456_v3  ;;  %v8482_v3 = vld [vmem:[%s10270_s28 + $0x60] ss:$12 sps:$4 sm:$0xff]   ;;  %v8497_v15 = vld [vmem:[%s10270_s28 + $0xb0] ss:$12 sps:$4 sm:$0xff]  }
 0xd3e   : > { %v2819_v24 = vadd.f32 %v2818_v22, %v9334_v37 }
 0xd40   : > { %2822 = vadd.xlane.f32.xlu0 %v2819_v24  ;;  %7665 = vmatpush3.bf16.msra.mxu1 %v8457_v6  ;;  %v8485_v6 = vld [vmem:[%s10270_s28 + $0x68] ss:$12 sps:$4 sm:$0xff]  }
 0xd41   : > { %7666 = vmatprep.subr.bf16.mxu1 %v8458_v7  ;;  %v8488_v7 = vld [vmem:[%s10270_s28 + $0x7c] ss:$12 sps:$4 sm:$0xff]  }
 0xd44   : > { %7667 = vmatpush3.bf16.msra.mxu1 %v8459_v8  ;;  %v8486_v8 = vld [vmem:[%s10270_s28 + $0x78] ss:$12 sps:$4 sm:$0xff]  }
 0xd45   : > { %7668 = vmatprep.subr.bf16.mxu1 %v8460_v9  ;;  %v8489_v9 = vld [vmem:[%s10270_s28 + $0x80] ss:$12 sps:$4 sm:$0xff]  }
 0xd48   : > { %7669 = vmatpush3.bf16.msra.mxu1 %v8461_v10  ;;  %v8492_v10 = vld [vmem:[%s10270_s28 + $0x94] ss:$12 sps:$4 sm:$0xff]  }
 0xd49   : > { %7670 = vmatprep.subr.bf16.mxu1 %v8462_v11  ;;  %v8490_v11 = vld [vmem:[%s10270_s28 + $0x90] ss:$12 sps:$4 sm:$0xff]  }
 0xd4c   : > { %7671 = vmatpush3.bf16.msra.mxu1 %v8463_v12  ;;  %v8493_v12 = vld [vmem:[%s10270_s28 + $0x98] ss:$12 sps:$4 sm:$0xff]  }
 0xd4d   : > { %7672 = vmatprep.subr.bf16.mxu1 %v8464_v13  ;;  %v8496_v13 = vld [vmem:[%s10270_s28 + $0xac] ss:$12 sps:$4 sm:$0xff]  }
 0xd50   : > { %7673 = vmatpush3.bf16.msra.mxu1 %v8465_v14  ;;  %v8494_v14 = vld [vmem:[%s10270_s28 + $0xa8] ss:$12 sps:$4 sm:$0xff]  }
 0xd51   : > { %7956 = vmatprep.subr.bf16.mxu1 %v8922_v0 }
 0xdcd   : > { %v2823_v37 = vpop.xlane.xlu0 %2822 }
 0xdce   : > { %v2825_v31 = vmul.f32 0.0078125, %v2823_v37 }
 0xdd0   : > { %v2826_v32 = vsub.f32 %v2819_v24, %v2825_v31 }
 0xdd2   : > { %v2827_v34 = vmul.f32 %v2826_v32, %v2826_v32 }
 0xdd4   : > { %2828 = vadd.xlane.f32.xlu1 %v2827_v34 }
 0xe61   : > { %v2829_v54 = vpop.xlane.xlu1 %2828 }
 0xe62   : > { %v2830_v55 = vmul.f32 0.0078125, %v2829_v54  ;;  %v8470_v54 = vld [vmem:[%s10270_s28 + $0x18] ss:$12 sps:$4 sm:$0xff]  }
 0xe64   : > { %v2831_v56 = vadd.f32 1e-05, %v2830_v55  ;;  %v8476_v55 = vld [vmem:[%s10270_s28 + $0x34] ss:$12 sps:$4 sm:$0xff]  }
 0xe66   : > { %8690 = vrsqrt.f32 %v2831_v56  ;;  %v8474_v56 = vld [vmem:[%s10270_s28 + $0x30] ss:$12 sps:$4 sm:$0xff]  }
 0xe70   : > { %v8691_v57 = vpop.eup %8690 }
 0xe71   : > { %v2833_v59 = vmul.f32 %v8691_v57, %v2826_v32 }
 0xe73   : > { %v2840_v61 = vmul.f32 %v7349_v58, %v2833_v59 }
 0xe75   : > { %v2847_v62 = vadd.f32 %v7350_v60, %v2840_v61  ;;  %v8477_v61 = vld [vmem:[%s10270_s28 + $0x38] ss:$12 sps:$4 sm:$0xff]  }
 0xe77   : > { %v2864_v63 = vpack.c.bf16 %v2847_v62, %v2847_v62 }
 0xe79   : > { %2990 = vmatmul.mubr.bf16.vlgmr.msra.gmra.mrb[24].mxu0 %v2864_v63  ;;  %v8478_v63 = vld [vmem:[%s10270_s28 + $0x48] ss:$12 sps:$4 sm:$0xff]  }
 0xe7a   : > { %3423 = vmatprep.mubr.bf16.mxu0 %v8924_v33  ;;  %3392 = vmatpush1.bf16.msra.mxu0 %v8466_v44 }
 0xe7b   : > { %3393 = vmatprep.subr.bf16.mxu0 %v8472_v52 }
 0xe7e   : > { %3394 = vmatpush1.bf16.msra.mxu0 %v8470_v54 }
 0xe7f   : > { %3395 = vmatprep.subr.bf16.mxu0 %v8476_v55 }
 0xe82   : > { %3396 = vmatpush1.bf16.msra.mxu0 %v8474_v56 }
 0xf4c   : > { %v2991_v18 = vpop.f32.mrb[24].mxu0 }
 0xf4d   : > { %v2992_v19 = vadd.f32 %v2991_v18, %v2870_v16  ;;  %v2993_v20 = vpop.f32.mrb[25].mxu0 }
 0xf4e   : > { %v2994_v21 = vadd.f32 %v2993_v20, %v2874_v17  ;;  %v2995_v22 = vpop.f32.mrb[26].mxu0  ;;  %v7384_v20 = vld [vmem:[%s10271_s1] ss:$0 sm:$0xff]  ;;  %s10276_s1 = sld [smem:[#allocation25_spill]] }
 0xf4f   : > { %v3000_v23 = vmul.f32 0.70710677, %v2992_v19  ;;  %v2996_v24 = vpop.f32.mrb[27].mxu0  ;;  %v2998_v28 = vmul.f32 0.5, %v2992_v19  ;;  %v7385_v22 = vld [vmem:[%s10272_s11] ss:$0 sm:$0xff] }
 0xf50   : > { %v3001_v25 = vmul.f32 0.70710677, %v2994_v21  ;;  %v2999_v30 = vmul.f32 0.5, %v2994_v21  ;;  %s10275_s11 = smov 64  }
 0xf51   : > { %8692 = verf.f32 %v3000_v23 }
 0xf52   : > { %8694 = verf.f32 %v3001_v25 }
 0xf5b   : > { %v8693_v26 = vpop.eup %8692 }
 0xf5c   : > { %v8695_v27 = vpop.eup %8694  ;;  %v3004_v29 = vadd.f32 1.0, %v8693_v26  ;;  %v3246_v26 = vld [vmem:[%s10273_s3] sm:$0x7]  ;;  %s10274_s3 = smov 96  }
 0xf5d   : > { %v3005_v37 = vadd.f32 1.0, %v8695_v27  ;;  %v3251_v27 = vrot.slane %v3246_v26, %v9350_v49 }
 0xf5e   : > { %v3006_v31 = vmul.f32 %v3004_v29, %v2998_v28  ;;  %v3259_v28 = vrot.slane %v3246_v26, %v9353_v50  ;;  %v3255_v29 = vrot.slane %v3246_v26, %v9346_v47 }
 0xf5f   : > { %v3007_v32 = vmul.f32 %v3005_v37, %v2999_v30 }
 0xf60   : > { %v3040_v35 = vpack.c.bf16 %v3006_v31, %v3006_v31 }
 0xf61   : > { %v3041_v34 = vpack.c.bf16 %v3007_v32, %v3007_v32 }
 0xf63   : > { %3177 = vmatprep.mubr.bf16.mxu1 %v3041_v34 }
 0xf64   : > { %3178 = vmatmul.mubr.bf16.vlgmr.msra.gmra.mrb[40].mxu1 %v3040_v35 }
 0xf65   : > { %7972 = vmatprep.mubr.msk.bf16.mxu1 %vm8923_vm1, %v8922_v0  ;;  %7957 = vmatpush3.bf16.msra.mxu1 %v8469_v51 }
 0xf66   : > { %7958 = vmatprep.subr.bf16.mxu1 %v8922_v0 }
 0xf69   : > { %7959 = vmatpush3.bf16.msra.mxu1 %v8473_v53 }
 0xf6a   : > { %7960 = vmatprep.subr.bf16.mxu1 %v8922_v0 }
 0xf6d   : > { %7961 = vmatpush3.bf16.msra.mxu1 %v8477_v61 }
 0xf6e   : > { %7962 = vmatprep.subr.bf16.mxu1 %v8922_v0 }
 0xf71   : > { %7963 = vmatpush3.bf16.msra.mxu1 %v8481_v5 }
 0xf72   : > { %7964 = vmatprep.subr.bf16.mxu1 %v8922_v0 }
 0xf75   : > { %7965 = vmatpush3.bf16.msra.mxu1 %v8485_v6 }
 0xf76   : > { %7966 = vmatprep.subr.bf16.mxu1 %v8922_v0 }
 0xf79   : > { %7967 = vmatpush3.bf16.msra.mxu1 %v8489_v9 }
 0xf7a   : > { %7968 = vmatprep.subr.bf16.mxu1 %v8922_v0 }
 0xf7d   : > { %7969 = vmatpush3.bf16.msra.mxu1 %v8493_v12 }
 0xf7e   : > { %7970 = vmatprep.subr.bf16.mxu1 %v8922_v0 }
 0xf81   : > { %7971 = vmatpush3.bf16.msra.mxu1 %v8497_v15 }
 0xf82   : > { %7982 = vmatprep.subr.bf16.mxu1 %v8922_v0 }
0x1037   : > { %v7674_v38 = vpop.f32.mrb[40].mxu1 }
0x1038   : > { %v7675_v4 = vpop.f32.mrb[41].mxu1 }
0x1039   : > { %v7676_v39 = vadd.f32 %v7675_v4, %v7674_v38  ;;  %v7677_v40 = vpop.f32.mrb[42].mxu1 }
0x103a   : > { %v7678_v41 = vpop.f32.mrb[43].mxu1 }
0x103b   : > { %v3180_v42 = vadd.f32 %v7676_v39, %v7367_v1 }
0x103d   : > { %v3185_v43 = vadd.f32 %v3180_v42, %v2847_v62  ;;  %v8480_v62 = vld [vmem:[%s10270_s28 + $0x4c] ss:$12 sps:$4 sm:$0xff]  }
0x103e   : > { %3397 = vmatprep.subr.bf16.mxu0 %v8480_v62 }
0x103f   : > { %3188 = vadd.xlane.f32.xlu1 %v3185_v43  ;;  %3398 = vmatpush1.bf16.msra.mxu0 %v8478_v63 }
0x1040   : > { %3399 = vmatprep.subr.bf16.mxu0 %v8484_v2 }
0x1043   : > { %3400 = vmatpush1.bf16.msra.mxu0 %v8482_v3 }
0x1044   : > { %3401 = vmatprep.subr.bf16.mxu0 %v8488_v7 }
0x1047   : > { %3402 = vmatpush1.bf16.msra.mxu0 %v8486_v8 }
0x1048   : > { %3403 = vmatprep.subr.bf16.mxu0 %v8492_v10 }
0x104b   : > { %3404 = vmatpush1.bf16.msra.mxu0 %v8490_v11 }
0x104c   : > { %3405 = vmatprep.subr.bf16.mxu0 %v8496_v13 }
0x104f   : > { %3406 = vmatpush1.bf16.msra.mxu0 %v8494_v14 }
0x1050   : > { %7976 = vmatprep.subr.bf16.mxu0 %v8922_v0 }
0x10cc   : > { %v3189_v57 = vpop.xlane.xlu1 %3188 }
0x10cd   : > { %v3190_v58 = vmul.f32 0.0078125, %v3189_v57 }
0x10cf   : > { %v3191_v59 = vsub.f32 %v3185_v43, %v3190_v58 }
0x10d1   : > { %v3192_v60 = vmul.f32 %v3191_v59, %v3191_v59 }
0x10d3   : > { %3193 = vadd.xlane.f32.xlu1 %v3192_v60 }
0x1160   : > { %v3194_v16 = vpop.xlane.xlu1 %3193 }
0x1161   : > { %v3195_v17 = vmul.f32 0.0078125, %v3194_v16 }
0x1163   : > { %v3196_v18 = vadd.f32 1e-05, %v3195_v17 }
0x1165   : > { %8696 = vrsqrt.f32 %v3196_v18 }
0x116f   : > { %v8697_v19 = vpop.eup %8696 }
0x1170   : > { %v3198_v21 = vmul.f32 %v8697_v19, %v3191_v59  ;;  %v8500_v19 = vld [vmem:[%s10276_s1 + $0x10] sm:$0xff]  }
0x1172   : > { %v3205_v23 = vmul.f32 %v7384_v20, %v3198_v21  ;;  %v8501_v20 = vld [vmem:[%s10276_s1 + $0x18] sm:$0xff]  }
0x1174   : > { %v9538_v24 = vadd.f32 %v7385_v22, %v3205_v23 }
0x1176   : > { %v3245_v25 = vpack.c.bf16 %v9538_v24, %v9538_v24 }
0x1178   : > { %3424 = vmatmul.mubr.bf16.vlgmr.msra.gmra.mrb[28].mxu0 %v3245_v25  ;;  %7973 = vmatmul.mubr.bf16.vlgmr.msra.gmra.mrb[44].mxu1 %v3245_v25 }
0x1179   : > { %7978 = vmatprep.mubr.msk.bf16.mxu0 %vm8923_vm1, %v8922_v0  ;;  %7984 = vmatprep.mubr.msk.bf16.mxu1 %vm8923_vm1, %v8922_v0 }
0x124b   : > { %v3425_v30 = vpop.f32.mrb[28].mxu0  ;;  %v3466_v37 = vpop.f32.mrb[44].mxu1 }
0x124c   : > { %v3426_v31 = vadd.f32 %v3425_v30, %v3251_v27  ;;  %v3467_v32 = vadd.f32 %v3466_v37, %v3259_v28  ;;  %v3427_v34 = vpop.f32.mrb[29].mxu0  ;;  %v7974_v35 = vpop.f32.mrb[45].mxu1  ;;  %v8498_v27 = vld [vmem:[%s10276_s1] sm:$0xff]  }
0x124d   : > { %v3428_v38 = vadd.f32 %v3427_v34, %v3255_v29  ;;  %v3429_v1 = vpop.f32.mrb[30].mxu0  ;;  %v3469_v4 = vpop.f32.mrb[46].mxu1  ;;  %v8499_v29 = vld [vmem:[%s10276_s1 + $0x8] sm:$0xff]  }
0x124e   : > { %v9550_v39 = vpack.c.bf16 %v3426_v31, %v3426_v31  ;;  %v9552_v40 = vpack.c.bf16 %v3467_v32, %v3467_v32  ;;  %v3430_v41 = vpop.f32.mrb[31].mxu0  ;;  %v7975_v42 = vpop.f32.mrb[47].mxu1 }
0x124f   : > { %v9554_v43 = vpack.c.bf16 %v3428_v38, %v3428_v38 }
0x1250   : > { %3598 = vrot.lane.b32.xlu0 %v9550_v39, %s10274_s3  ;;  %v3554_v44 = vsel %vm2205_vm4, %v9552_v40, 0 }
0x1251   : > { %7983 = vmatpush3.bf16.msra.mxu1 %v3554_v44  ;;  %3601 = vrot.lane.b32.xlu1 %v9554_v43, %s10274_s3  ;;  %v3494_v48 = vsel %vm2140_vm3, %v9554_v43, 0 }
0x1252   : > { %7977 = vmatpush3.bf16.xpose.msra.mxu0 %v3494_v48  ;;  %7994 = vmatprep.subr.bf16.mxu1 %v8922_v0 }
0x1253   : > { %7988 = vmatprep.subr.bf16.mxu0 %v8922_v0 }
0x1259   : > { %7979 = vmatmul.mubr.msk.bf16.vlgmr.msra.gmra.mrb[32].mxu0 %vm2140_vm3, %v9550_v39 }
0x125a   : > { %7990 = vmatprep.mubr.msk.bf16.mxu0 %vm8923_vm1, %v8922_v0 }
0x12c2   : > { %v3599_v53 = vpop.permute.xlu0 %3598 }
0x12c3   : > { %v3602_v51 = vpop.permute.xlu1 %3601 }
0x12c4   : > { %v3607_v52 = vsel %vm2140_vm3, %v3602_v51, 0 }
0x12c5   : > { %7989 = vmatpush3.bf16.xpose.msra.mxu0 %v3607_v52 }
0x12c6   : > { %8000 = vmatprep.subr.bf16.mxu0 %v8922_v0 }
0x12cc   : > { %7991 = vmatmul.mubr.msk.bf16.vlgmr.msra.gmra.mrb[36].mxu0 %vm2140_vm3, %v3599_v53 }
0x12cd   : > { %8004 = vmatprep.mubr.msk.bf16.mxu0 %vm8923_vm1, %v8922_v0  ;;  %8001 = vmatpush3.bf16.msra.mxu0 %v8500_v19 }
0x12ce   : > { %8002 = vmatprep.subr.bf16.mxu0 %v8922_v0 }
0x12d1   : > { %8003 = vmatpush3.bf16.msra.mxu0 %v8501_v20 }
0x12d2   : > { %8016 = vmatprep.subr.bf16.mxu0 %v8922_v0 }
0x132c   : > { %v3530_v54 = vpop.f32.mrb[32].mxu0 }
0x132d   : > { %v3536_v55 = vmul.f32 0.17677669, %v3530_v54  ;;  %v7980_v56 = vpop.f32.mrb[33].mxu0 }
0x132e   : > { %v3533_v57 = vpop.f32.mrb[34].mxu0 }
0x132f   : > { %v7981_v58 = vpop.f32.mrb[35].mxu0  ;;  %v3537_v59 = vsel %vm2188_vm5, %v3536_v55, -inf }
0x1330   : > { %3538 = vmax.xlane.f32.xlu1 %v3537_v59 }
0x139f   : > { %v3643_v60 = vpop.f32.mrb[36].mxu0 }
0x13a0   : > { %v3649_v61 = vmul.f32 0.17677669, %v3643_v60  ;;  %v7992_v62 = vpop.f32.mrb[37].mxu0 }
0x13a1   : > { %v3646_v63 = vpop.f32.mrb[38].mxu0 }
0x13a2   : > { %v7993_v5 = vpop.f32.mrb[39].mxu0  ;;  %v3650_v2 = vsel %vm2188_vm5, %v3649_v61, -inf }
0x13a3   : > { %3651 = vmax.xlane.f32.xlu0 %v3650_v2 }
0x13b9   : > { %3824 = vrot.lane.b32.xlu0 %v9554_v43, %s10275_s11 }
0x13bd   : > { %v3539_v3 = vpop.xlane.xlu1 %3538 }
0x13be   : > { %v3540_v6 = vsub.f32 %v3536_v55, %v3539_v3 }
0x13c0   : > { %v3541_v7 = vmul.f32 1.442695, %v3540_v6 }
0x13c2   : > { %8698 = vpow2.f32 %v3541_v7 }
0x13cc   : > { %v8699_v8 = vpop.eup %8698 }
0x13cd   : > { %v3543_v9 = vsel %vm2188_vm5, %v8699_v8, 0.0 }
0x13ce   : > { %3544 = vadd.xlane.f32.xlu1 %v3543_v9 }
0x1430   : > { %v3652_v10 = vpop.xlane.xlu0 %3651 }
0x1431   : > { %v3653_v11 = vsub.f32 %v3649_v61, %v3652_v10  ;;  %v8502_v10 = vld [vmem:[%s10276_s1 + $0x20] sm:$0xff]  }
0x1433   : > { %v3654_v12 = vmul.f32 1.442695, %v3653_v11 }
0x1434   : > { %v3825_v35 = vpop.permute.xlu0 %3824 }
0x1435   : > { %8700 = vpow2.f32 %v3654_v12  ;;  %v3830_v42 = vsel %vm2140_vm3, %v3825_v35, 0 }
0x143f   : > { %v8701_v13 = vpop.eup %8700 }
0x1440   : > { %v3656_v14 = vsel %vm2188_vm5, %v8701_v13, 0.0 }
0x1441   : > { %3657 = vadd.xlane.f32.xlu1 %v3656_v14 }
0x1452   : > { %3663 = vrot.lane.b32.xlu1 %v9552_v40, %s10274_s3 }
0x1456   : > { %3822 = vrot.lane.b32.xlu1 %v9550_v39, %s10275_s11 }
0x145b   : > { %v3545_v15 = vpop.xlane.xlu1 %3544 }
0x145c   : > { %8702 = vrcp.f32 %v3545_v15 }
0x1466   : > { %v8703_v16 = vpop.eup %8702 }
0x1467   : > { %v3547_v17 = vmul.f32 %v8703_v16, %v8699_v8 }
0x1469   : > { %v3548_v18 = vpack.c.bf16 %v3547_v17, %v3547_v17 }
0x146b   : > { %7985 = vmatmul.mubr.msk.bf16.vlgmr.msra.gmra.mrb[48].mxu1 %vm2188_vm5, %v3548_v18  ;;  %v8503_v18 = vld [vmem:[%s10276_s1 + $0x28] sm:$0xff]  }
0x146c   : > { %7996 = vmatprep.mubr.msk.bf16.mxu1 %vm8923_vm1, %v8922_v0 }
0x14ce   : > { %v3658_v21 = vpop.xlane.xlu1 %3657 }
0x14cf   : > { %8704 = vrcp.f32 %v3658_v21 }
0x14d2   : > { %v3664_v22 = vpop.permute.xlu1 %3663 }
0x14d3   : > { %v3669_v23 = vsel %vm2205_vm4, %v3664_v22, 0 }
0x14d4   : > { %7995 = vmatpush3.bf16.msra.mxu1 %v3669_v23 }
0x14d5   : > { %8008 = vmatprep.subr.bf16.mxu1 %v8922_v0 }
0x14d6   : > { %v3823_v48 = vpop.permute.xlu1 %3822 }
0x14d9   : > { %v8705_v25 = vpop.eup %8704 }
0x14da   : > { %v3660_v26 = vmul.f32 %v8705_v25, %v8701_v13 }
0x14dc   : > { %v3661_v28 = vpack.c.bf16 %v3660_v26, %v3660_v26 }
0x14de   : > { %7997 = vmatmul.mubr.msk.bf16.vlgmr.msra.gmra.mrb[52].mxu1 %vm2188_vm5, %v3661_v28 }
0x14df   : > { %8009 = vmatpush3.bf16.msra.mxu1 %v8498_v27  ;;  %8012 = vmatprep.mubr.msk.bf16.mxu1 %vm8923_vm1, %v8922_v0 }
0x14e0   : > { %8010 = vmatprep.subr.bf16.mxu1 %v8922_v0 }
0x14e3   : > { %8011 = vmatpush3.bf16.msra.mxu1 %v8499_v29 }
0x14e4   : > { %8022 = vmatprep.subr.bf16.mxu1 %v8922_v0 }
0x153e   : > { %v3590_v30 = vpop.f32.mrb[48].mxu1 }
0x153f   : > { %v3596_v37 = vpack.c.bf16 %v3590_v30, %v3590_v30  ;;  %v7986_v31 = vpop.f32.mrb[49].mxu1 }
0x1540   : > { %v3593_v32 = vpop.f32.mrb[50].mxu1 }
0x1541   : > { %v7987_v34 = vpop.f32.mrb[51].mxu1  ;;  %8013 = vmatmul.mubr.msk.bf16.vlgmr.msra.gmra.mrb[56].mxu1 %vm2140_vm3, %v3596_v37 }
0x1542   : > { %8024 = vmatprep.mubr.msk.bf16.mxu1 %vm8923_vm1, %v8922_v0 }
0x15b1   : > { %v3705_v38 = vpop.f32.mrb[52].mxu1 }
0x15b2   : > { %v3711_v1 = vpack.c.bf16 %v3705_v38, %v3705_v38  ;;  %v7998_v4 = vpop.f32.mrb[53].mxu1 }
0x15b3   : > { %v3708_v41 = vpop.f32.mrb[54].mxu1  ;;  %v8504_v4 = vld [vmem:[%s10276_s1 + $0x30] sm:$0xff]  }
0x15b4   : > { %v7999_v44 = vpop.f32.mrb[55].mxu1  ;;  %8005 = vmatmul.mubr.msk.bf16.vlgmr.msra.gmra.mrb[40].mxu0 %vm2140_vm3, %v3711_v1 }
0x15b5   : > { %8017 = vmatpush3.bf16.xpose.msra.mxu0 %v3830_v42  ;;  %8018 = vmatprep.mubr.msk.bf16.mxu0 %vm8923_vm1, %v8922_v0 }
0x15b6   : > { %8028 = vmatprep.subr.bf16.mxu0 %v8922_v0 }
0x15bc   : > { %8019 = vmatmul.mubr.msk.bf16.vlgmr.msra.gmra.mrb[44].mxu0 %vm2140_vm3, %v3823_v48 }
0x15bd   : > { %8032 = vmatprep.mubr.msk.bf16.mxu0 %vm8923_vm1, %v8922_v0  ;;  %8029 = vmatpush3.bf16.msra.mxu0 %v8502_v10  ;;  %v8511_v10 = vld [vmem:[%s10279_s8 + $0x14] ss:$8 sps:$4 sm:$0xff]  }
0x15be   : > { %8030 = vmatprep.subr.bf16.mxu0 %v8922_v0 }
0x15c1   : > { %8031 = vmatpush3.bf16.msra.mxu0 %v8503_v18  ;;  %v8518_v18 = vld [vmem:[%s10279_s8 + $0x40] ss:$8 sps:$4 sm:$0xff]  }
0x15c2   : > { %8042 = vmatprep.subr.bf16.mxu0 %v8922_v0 }
0x1614   : > { %v3816_v51 = vpop.f32.mrb[56].mxu1 }
0x1615   : > { %v8014_v52 = vpop.f32.mrb[57].mxu1 }
0x1616   : > { %v3819_v53 = vpop.f32.mrb[58].mxu1 }
0x1617   : > { %v8015_v54 = vpop.f32.mrb[59].mxu1 }
0x1687   : > { %v3761_v55 = vpop.f32.mrb[40].mxu0 }
0x1688   : > { %v9612_v56 = vadd.f32 %v3816_v51, %v3761_v55  ;;  %v8006_v57 = vpop.f32.mrb[41].mxu0  ;;  %v8505_v55 = vld [vmem:[%s10276_s1 + $0x38] sm:$0xff]   ;;  %s10281_s1 = sld [smem:[#allocation31_spill]] }
0x1689   : > { %v3764_v58 = vpop.f32.mrb[42].mxu0 }
0x168a   : > { %v8007_v59 = vpop.f32.mrb[43].mxu0 }
0x168f   : > { %v3866_v60 = vpop.f32.mrb[44].mxu0 }
0x1690   : > { %v3872_v61 = vmul.f32 0.17677669, %v3866_v60  ;;  %v8020_v62 = vpop.f32.mrb[45].mxu0 }
0x1691   : > { %v3869_v63 = vpop.f32.mrb[46].mxu0  ;;  %v7430_v62 = vld [vmem:[%s10278_s6] ss:$0 sm:$0xff]  ;;  %s10280_s6 = sld [smem:[#allocation37_spill]] }
0x1692   : > { %v8021_v5 = vpop.f32.mrb[47].mxu0  ;;  %v3873_v2 = vsel %vm2188_vm5, %v3872_v61, -inf }
0x1693   : > { %3874 = vmax.xlane.f32.xlu1 %v3873_v2 }
0x16a4   : > { %3992 = vrot.lane.b32.xlu1 %v9554_v43, %s10277_s5 }
0x16a8   : > { %3990 = vrot.lane.b32.xlu1 %v9550_v39, %s10277_s5 }
0x1720   : > { %v3875_v3 = vpop.xlane.xlu1 %3874 }
0x1721   : > { %v3876_v6 = vsub.f32 %v3872_v61, %v3875_v3 }
0x1723   : > { %v3877_v7 = vmul.f32 1.442695, %v3876_v6 }
0x1724   : > { %v3993_v14 = vpop.permute.xlu1 %3992 }
0x1725   : > { %8706 = vpow2.f32 %v3877_v7  ;;  %v3998_v16 = vsel %vm2140_vm3, %v3993_v14, 0 }
0x1728   : > { %v3991_v17 = vpop.permute.xlu1 %3990 }
0x172f   : > { %v8707_v8 = vpop.eup %8706 }
0x1730   : > { %v3879_v9 = vsel %vm2188_vm5, %v8707_v8, 0.0 }
0x1731   : > { %3880 = vadd.xlane.f32.xlu0 %v3879_v9  ;;  %v8508_v9 = vld [vmem:[%s10279_s8 + $0x4] ss:$8 sps:$4 sm:$0xff]  }
0x1747   : > { %3885 = vrot.lane.b32.xlu0 %v9552_v40, %s10275_s11 }
0x17be   : > { %v3881_v11 = vpop.xlane.xlu0 %3880 }
0x17bf   : > { %8708 = vrcp.f32 %v3881_v11  ;;  %v8509_v11 = vld [vmem:[%s10279_s8 + $0x10] ss:$8 sps:$4 sm:$0xff]  }
0x17c2   : > { %v3886_v43 = vpop.permute.xlu0 %3885 }
0x17c3   : > { %v3891_v39 = vsel %vm2205_vm4, %v3886_v43, 0  ;;  %v8514_v43 = vld [vmem:[%s10279_s8 + $0x24] ss:$8 sps:$4 sm:$0xff]  }
0x17c4   : > { %8023 = vmatpush3.bf16.msra.mxu1 %v3891_v39  ;;  %v8512_v39 = vld [vmem:[%s10279_s8 + $0x20] ss:$8 sps:$4 sm:$0xff]  }
0x17c5   : > { %8036 = vmatprep.subr.bf16.mxu1 %v8922_v0 }
0x17c9   : > { %v8709_v12 = vpop.eup %8708 }
0x17ca   : > { %v3883_v13 = vmul.f32 %v8709_v12, %v8707_v8  ;;  %v8506_v8 = vld [vmem:[%s10279_s8] ss:$8 sps:$4 sm:$0xff]  }
0x17cc   : > { %v3884_v15 = vpack.c.bf16 %v3883_v13, %v3883_v13 }
0x17ce   : > { %8025 = vmatmul.mubr.msk.bf16.vlgmr.msra.gmra.mrb[60].mxu1 %vm2188_vm5, %v3884_v15  ;;  %v8517_v15 = vld [vmem:[%s10279_s8 + $0x34] ss:$8 sps:$4 sm:$0xff]  }
0x17cf   : > { %8037 = vmatpush3.bf16.xpose.msra.mxu1 %v3998_v16  ;;  %8038 = vmatprep.mubr.msk.bf16.mxu1 %vm8923_vm1, %v8922_v0  ;;  %v8515_v16 = vld [vmem:[%s10279_s8 + $0x30] ss:$8 sps:$4 sm:$0xff]  }
0x17d0   : > { %8048 = vmatprep.subr.bf16.mxu1 %v8922_v0 }
0x17d6   : > { %8039 = vmatmul.mubr.msk.bf16.vlgmr.msra.gmra.mrb[64].mxu1 %vm2140_vm3, %v3991_v17  ;;  %v8520_v17 = vld [vmem:[%s10279_s8 + $0x44] ss:$8 sps:$4 sm:$0xff]  }
0x17d7   : > { %8052 = vmatprep.mubr.msk.bf16.mxu1 %vm8923_vm1, %v8922_v0  ;;  %8049 = vmatpush3.bf16.msra.mxu1 %v8504_v4  ;;  %v7432_v4 = vld [vmem:[%s10283_s12] ss:$0 sm:$0xff]  ;;  %s10285_s12 = sld [smem:[#allocation30_spill]] }
0x17d8   : > { %8050 = vmatprep.subr.bf16.mxu1 %v8922_v0 }
0x17db   : > { %8051 = vmatpush3.bf16.msra.mxu1 %v8505_v55  ;;  %v8539_v55 = vld [vmem:[%s10280_s6 + $0x48] ss:$12 sps:$4 sm:$0xff]  }
0x18a1   : > { %v3927_v19 = vpop.f32.mrb[60].mxu1 }
0x18a2   : > { %v3933_v20 = vpack.c.bf16 %v3927_v19, %v3927_v19  ;;  %v8026_v21 = vpop.f32.mrb[61].mxu1  ;;  %v8523_v19 = vld [vmem:[%s10279_s8 + $0x54] ss:$8 sps:$4 sm:$0xff]  }
0x18a3   : > { %v3930_v22 = vpop.f32.mrb[62].mxu1  ;;  %v8526_v21 = vld [vmem:[%s10279_s8 + $0x64] ss:$8 sps:$4 sm:$0xff]  }
0x18a4   : > { %v8027_v23 = vpop.f32.mrb[63].mxu1  ;;  %8033 = vmatmul.mubr.msk.bf16.vlgmr.msra.gmra.mrb[48].mxu0 %vm2140_vm3, %v3933_v20  ;;  %v8521_v20 = vld [vmem:[%s10279_s8 + $0x50] ss:$8 sps:$4 sm:$0xff]   ;;  %v8524_v22 = vld [vmem:[%s10279_s8 + $0x60] ss:$8 sps:$4 sm:$0xff]  }
0x18a5   : > { %8044 = vmatprep.mubr.msk.bf16.mxu0 %vm8923_vm1, %v8922_v0  ;;  %v8529_v23 = vld [vmem:[%s10279_s8 + $0x74] ss:$8 sps:$4 sm:$0xff]  }
0x18a9   : > { %v4034_v25 = vpop.f32.mrb[64].mxu1 }
0x18aa   : > { %v4040_v26 = vmul.f32 0.17677669, %v4034_v25  ;;  %v8040_v27 = vpop.f32.mrb[65].mxu1  ;;  %v8527_v25 = vld [vmem:[%s10279_s8 + $0x70] ss:$8 sps:$4 sm:$0xff]   ;;  %s10295_s8 = sld [smem:[#allocation36_spill]] }
0x18ab   : > { %v4037_v28 = vpop.f32.mrb[66].mxu1  ;;  %v8554_v27 = vld [vmem:[%s10281_s1 + $0x40] sm:$0xff]  }
0x18ac   : > { %v8041_v29 = vpop.f32.mrb[67].mxu1  ;;  %v4041_v30 = vsel %vm2188_vm5, %v4040_v26, -inf  ;;  %v8555_v28 = vld [vmem:[%s10281_s1] sm:$0xff]   ;;  %7717 = vmatprep.subr.bf16.mxu1 %v8554_v27 }
0x18ad   : > { %4042 = vmax.xlane.f32.xlu0 %v4041_v30  ;;  %v8556_v29 = vld [vmem:[%s10281_s1 + $0x48] sm:$0xff]  }
0x18ae   : > { %v8557_v30 = vld [vmem:[%s10281_s1 + $0x8] sm:$0xff]  }
0x18c3   : > { %4053 = vrot.lane.b32.xlu0 %v9552_v40, %s10277_s5 }
0x193a   : > { %v4043_v37 = vpop.xlane.xlu0 %4042 }
0x193b   : > { %v4044_v31 = vsub.f32 %v4040_v26, %v4043_v37  ;;  %v8532_v26 = vld [vmem:[%s10280_s6 + $0x4] ss:$12 sps:$4 sm:$0xff]  }
0x193c   : > { %v8558_v37 = vld [vmem:[%s10281_s1 + $0x50] sm:$0xff]  }
0x193d   : > { %v4045_v32 = vmul.f32 1.442695, %v4044_v31 }
0x193e   : > { %v4054_v34 = vpop.permute.xlu0 %4053 }
0x193f   : > { %8710 = vpow2.f32 %v4045_v32  ;;  %v4059_v35 = vsel %vm2205_vm4, %v4054_v34, 0 }
0x1940   : > { %8043 = vmatpush3.bf16.msra.mxu0 %v4059_v35 }
0x1941   : > { %4303 = vmatprep.subr.bf16.mxu0 %v8508_v9  ;;  %v8563_v9 = vld [vmem:[%s10281_s1 + $0x20] sm:$0xff]  }
0x1949   : > { %v8711_v38 = vpop.eup %8710 }
0x194a   : > { %v4047_v1 = vsel %vm2188_vm5, %v8711_v38, 0.0 }
0x194b   : > { %4048 = vadd.xlane.f32.xlu1 %v4047_v1 }
0x1977   : > { %v3983_v41 = vpop.f32.mrb[48].mxu0 }
0x1978   : > { %v3989_v40 = vadd.f32 %v3983_v41, %v9612_v56  ;;  %v8034_v42 = vpop.f32.mrb[49].mxu0 }
0x1979   : > { %v3986_v44 = vpop.f32.mrb[50].mxu0  ;;  %v8530_v42 = vld [vmem:[%s10280_s6] ss:$12 sps:$4 sm:$0xff]  }
0x197a   : > { %v8035_v48 = vpop.f32.mrb[51].mxu0 }
0x197b   : > { %v8535_v48 = vld [vmem:[%s10280_s6 + $0x1c] ss:$12 sps:$4 sm:$0xff]  }
0x19d8   : > { %v4049_v51 = vpop.xlane.xlu1 %4048 }
0x19d9   : > { %8712 = vrcp.f32 %v4049_v51  ;;  %v8533_v51 = vld [vmem:[%s10280_s6 + $0x18] ss:$12 sps:$4 sm:$0xff]  }
0x19e3   : > { %v8713_v52 = vpop.eup %8712 }
0x19e4   : > { %v4051_v53 = vmul.f32 %v8713_v52, %v8711_v38  ;;  %v7431_v38 = vld [vmem:[%s10282_s9] ss:$0 sm:$0xff]  ;;  %s10284_s9 = sld [smem:[#allocation13_spill]] }
0x19e5   : > { %v8538_v52 = vld [vmem:[%s10280_s6 + $0x34] ss:$12 sps:$4 sm:$0xff]  }
0x19e6   : > { %v4052_v54 = vpack.c.bf16 %v4051_v53, %v4051_v53  ;;  %v8536_v53 = vld [vmem:[%s10280_s6 + $0x30] ss:$12 sps:$4 sm:$0xff]  }
0x19e8   : > { %8045 = vmatmul.mubr.msk.bf16.vlgmr.msra.gmra.mrb[52].mxu0 %vm2188_vm5, %v4052_v54  ;;  %v8541_v54 = vld [vmem:[%s10280_s6 + $0x4c] ss:$12 sps:$4 sm:$0xff]  }
0x19e9   : > { %4335 = vmatprep.mubr.bf16.mxu0 %v8924_v33  ;;  %4304 = vmatpush1.bf16.msra.mxu0 %v8506_v8  ;;  %v8562_v8 = vld [vmem:[%s10281_s1 + $0x60] sm:$0xff]  }
0x19ea   : > { %4305 = vmatprep.subr.bf16.mxu0 %v8511_v10  ;;  %v8564_v10 = vld [vmem:[%s10281_s1 + $0x68] sm:$0xff]  }
0x19ed   : > { %4306 = vmatpush1.bf16.msra.mxu0 %v8509_v11  ;;  %v8565_v11 = vld [vmem:[%s10281_s1 + $0x28] sm:$0xff]  }
0x19ee   : > { %4307 = vmatprep.subr.bf16.mxu0 %v8514_v43  ;;  %v8566_v43 = vld [vmem:[%s10281_s1 + $0x70] sm:$0xff]  }
0x19f1   : > { %4308 = vmatpush1.bf16.msra.mxu0 %v8512_v39  ;;  %v8567_v39 = vld [vmem:[%s10281_s1 + $0x30] sm:$0xff]  }
0x19f2   : > { %4309 = vmatprep.subr.bf16.mxu0 %v8517_v15 }
0x19f5   : > { %4310 = vmatpush1.bf16.msra.mxu0 %v8515_v16 }
0x19f6   : > { %4311 = vmatprep.subr.bf16.mxu0 %v8520_v17 }
0x19f9   : > { %4312 = vmatpush1.bf16.msra.mxu0 %v8518_v18 }
0x19fa   : > { %4313 = vmatprep.subr.bf16.mxu0 %v8523_v19 }
0x19fd   : > { %4314 = vmatpush1.bf16.msra.mxu0 %v8521_v20 }
0x19fe   : > { %4315 = vmatprep.subr.bf16.mxu0 %v8526_v21 }
0x1a01   : > { %4316 = vmatpush1.bf16.msra.mxu0 %v8524_v22 }
0x1a02   : > { %4317 = vmatprep.subr.bf16.mxu0 %v8529_v23 }
0x1a05   : > { %4318 = vmatpush1.bf16.msra.mxu0 %v8527_v25 }
0x1a06   : > { %4765 = vmatprep.subr.bf16.mxu0 %v8532_v26 }
0x1abb   : > { %v4095_v57 = vpop.f32.mrb[52].mxu0 }
0x1abc   : > { %v4101_v58 = vpack.c.bf16 %v4095_v57, %v4095_v57  ;;  %v8046_v56 = vpop.f32.mrb[53].mxu0  ;;  %v8544_v57 = vld [vmem:[%s10280_s6 + $0x64] ss:$12 sps:$4 sm:$0xff]  }
0x1abd   : > { %v4098_v59 = vpop.f32.mrb[54].mxu0  ;;  %v8547_v56 = vld [vmem:[%s10280_s6 + $0x7c] ss:$12 sps:$4 sm:$0xff]  }
0x1abe   : > { %v8047_v60 = vpop.f32.mrb[55].mxu0  ;;  %8053 = vmatmul.mubr.msk.bf16.vlgmr.msra.gmra.mrb[68].mxu1 %vm2140_vm3, %v4101_v58  ;;  %v8542_v58 = vld [vmem:[%s10280_s6 + $0x60] ss:$12 sps:$4 sm:$0xff]   ;;  %v8545_v59 = vld [vmem:[%s10280_s6 + $0x78] ss:$12 sps:$4 sm:$0xff]  }
0x1abf   : > { %7718 = vmatpush3.bf16.msra.mxu1 %v8555_v28  ;;  %v8550_v60 = vld [vmem:[%s10280_s6 + $0x94] ss:$12 sps:$4 sm:$0xff]  }
0x1ac0   : > { %7719 = vmatprep.subr.bf16.mxu1 %v8556_v29 }
0x1ac3   : > { %7720 = vmatpush3.bf16.msra.mxu1 %v8557_v30 }
0x1ac4   : > { %7721 = vmatprep.subr.bf16.mxu1 %v8558_v37 }
0x1b91   : > { %v4151_v61 = vpop.f32.mrb[68].mxu1 }
0x1b92   : > { %v4157_v63 = vadd.f32 %v4151_v61, %v3989_v40  ;;  %v8054_v5 = vpop.f32.mrb[69].mxu1  ;;  %v8548_v61 = vld [vmem:[%s10280_s6 + $0x90] ss:$12 sps:$4 sm:$0xff]  }
0x1b93   : > { %v4154_v2 = vpop.f32.mrb[70].mxu1  ;;  %v8551_v5 = vld [vmem:[%s10280_s6 + $0xa8] ss:$12 sps:$4 sm:$0xff]  }
0x1b94   : > { %v4165_v3 = vadd.f32 %v7430_v62, %v4157_v63  ;;  %v8055_v6 = vpop.f32.mrb[71].mxu1  ;;  %v8553_v62 = vld [vmem:[%s10280_s6 + $0xac] ss:$12 sps:$4 sm:$0xff]   ;;  %v1811_v63 = vld [vmem:[%s10284_s9] sm:$0xff]  ;;  %s10286_s9 = sld [smem:[#allocation38_spill]] }
0x1b95   : > { %v9699_v2 = vadd.f32 %v9332_v36, %v1811_v63  ;;  %v8559_v6 = vld [vmem:[%s10281_s1 + $0x10] sm:$0xff]   ;;  %v8560_v36 = vld [vmem:[%s10281_s1 + $0x58] sm:$0xff]  }
0x1b96   : > { %v4166_v7 = vadd.f32 %v4165_v3, %v9538_v24  ;;  %7722 = vmatpush3.bf16.msra.mxu1 %v8559_v6 }
0x1b97   : > { %v9703_v3 = vpack.c.bf16 %v9699_v2, %v9699_v2  ;;  %7723 = vmatprep.subr.bf16.mxu1 %v8560_v36 }
0x1b98   : > { %4169 = vadd.xlane.f32.xlu1 %v4166_v7 }
0x1c25   : > { %v4170_v24 = vpop.xlane.xlu1 %4169 }
0x1c26   : > { %v4171_v12 = vmul.f32 0.0078125, %v4170_v24  ;;  %v8568_v24 = vld [vmem:[%s10281_s1 + $0x78] sm:$0xff]  }
0x1c28   : > { %v4172_v13 = vsub.f32 %v4166_v7, %v4171_v12  ;;  %v8561_v7 = vld [vmem:[%s10281_s1 + $0x18] sm:$0xff]  }
0x1c29   : > { %7724 = vmatpush3.bf16.msra.mxu1 %v8561_v7  ;;  %v8569_v12 = vld [vmem:[%s10281_s1 + $0x38] sm:$0xff]   ;;  %s10290_s1 = sld [smem:[#allocation34_spill]] }
0x1c2a   : > { %v4173_v14 = vmul.f32 %v4172_v13, %v4172_v13  ;;  %7725 = vmatprep.subr.bf16.mxu1 %v8562_v8 }
0x1c2c   : > { %4174 = vadd.xlane.f32.xlu1 %v4173_v14 }
0x1c2d   : > { %7726 = vmatpush3.bf16.msra.mxu1 %v8563_v9 }
0x1c2e   : > { %7727 = vmatprep.subr.bf16.mxu1 %v8564_v10  ;;  %v9775_v10 = vand.u32 127, %v1898_v45 }
0x1c30   : > { %vm4866_vm6 = vcmp.le.s32.totalorder %v9775_v10, %v9343_v46 }
0x1c31   : > { %7728 = vmatpush3.bf16.msra.mxu1 %v8565_v11 }
0x1c32   : > { %7729 = vmatprep.subr.bf16.mxu1 %v8566_v43 }
0x1c35   : > { %7730 = vmatpush3.bf16.msra.mxu1 %v8567_v39 }
0x1c36   : > { %7731 = vmatprep.subr.bf16.mxu1 %v8568_v24 }
0x1c39   : > { %7732 = vmatpush3.bf16.msra.mxu1 %v8569_v12 }
0x1c3a   : > { %8056 = vmatprep.subr.bf16.mxu1 %v8922_v0 }
0x1cb9   : > { %v4175_v31 = vpop.xlane.xlu1 %4174 }
0x1cba   : > { %v4176_v32 = vmul.f32 0.0078125, %v4175_v31 }
0x1cbc   : > { %v4177_v34 = vadd.f32 1e-05, %v4176_v32 }
0x1cbe   : > { %8714 = vrsqrt.f32 %v4177_v34  ;;  %v8570_v34 = vld [vmem:[%s10280_s6 + $0x8] ss:$12 sps:$4 sm:$0xff]  }
0x1cc8   : > { %v8715_v35 = vpop.eup %8714 }
0x1cc9   : > { %v4179_v1 = vmul.f32 %v8715_v35, %v4172_v13  ;;  %v4211_v13 = vld [vmem:[%s10285_s12] sm:$0x3]  ;;  %s10287_s12 = sld [smem:[#allocation39_spill]] }
0x1cca   : > { %v4216_v14 = vrot.slane %v4211_v13, %v9350_v49  ;;  %v4220_v15 = vrot.slane %v4211_v13, %v9346_v47 }
0x1ccb   : > { %v4186_v41 = vmul.f32 %v7431_v38, %v4179_v1  ;;  %v8571_v38 = vld [vmem:[%s10280_s6 + $0x20] ss:$12 sps:$4 sm:$0xff]  }
0x1ccc   : > { %v9730_v1 = vld [vmem:[%s10286_s9] sm:$0x7]  ;;  %s10288_s9 = sld [smem:[#allocation32_spill]] }
0x1ccd   : > { %v9677_v40 = vadd.f32 %v7432_v4, %v4186_v41  ;;  %v4625_v4 = vrot.slane %v9730_v1, %v9350_v49  ;;  %v8572_v41 = vld [vmem:[%s10280_s6 + $0x38] ss:$12 sps:$4 sm:$0xff]  }
0x1ccf   : > { %v4210_v44 = vpack.c.bf16 %v9677_v40, %v9677_v40 }
0x1cd1   : > { %4336 = vmatmul.mubr.bf16.vlgmr.msra.gmra.mrb[56].mxu0 %v4210_v44 }
0x1cd2   : > { %4766 = vmatpush1.bf16.msra.mxu0 %v8530_v42  ;;  %4797 = vmatprep.mubr.bf16.mxu0 %v8924_v33  ;;  %v4629_v42 = vrot.slane %v9730_v1, %v9346_v47 }
0x1cd3   : > { %4767 = vmatprep.subr.bf16.mxu0 %v8535_v48 }
0x1cd6   : > { %4768 = vmatpush1.bf16.msra.mxu0 %v8533_v51 }
0x1cd7   : > { %4769 = vmatprep.subr.bf16.mxu0 %v8538_v52  ;;  %v8573_v52 = vld [vmem:[%s10280_s6 + $0x50] ss:$12 sps:$4 sm:$0xff]  }
0x1cda   : > { %4770 = vmatpush1.bf16.msra.mxu0 %v8536_v53 }
0x1cdb   : > { %4771 = vmatprep.subr.bf16.mxu0 %v8541_v54 }
0x1cde   : > { %4772 = vmatpush1.bf16.msra.mxu0 %v8539_v55 }
0x1cdf   : > { %4773 = vmatprep.subr.bf16.mxu0 %v8544_v57 }
0x1ce2   : > { %4774 = vmatpush1.bf16.msra.mxu0 %v8542_v58 }
0x1ce3   : > { %4775 = vmatprep.subr.bf16.mxu0 %v8547_v56  ;;  %v8574_v56 = vld [vmem:[%s10280_s6 + $0x68] ss:$12 sps:$4 sm:$0xff]  }
0x1ce6   : > { %4776 = vmatpush1.bf16.msra.mxu0 %v8545_v59 }
0x1ce7   : > { %4777 = vmatprep.subr.bf16.mxu0 %v8550_v60  ;;  %v8575_v60 = vld [vmem:[%s10280_s6 + $0x80] ss:$12 sps:$4 sm:$0xff]  }
0x1cea   : > { %4778 = vmatpush1.bf16.msra.mxu0 %v8548_v61  ;;  %v8576_v61 = vld [vmem:[%s10280_s6 + $0x98] ss:$12 sps:$4 sm:$0xff]  }
0x1ceb   : > { %4779 = vmatprep.subr.bf16.mxu0 %v8553_v62  ;;  %v8577_v62 = vld [vmem:[%s10280_s6 + $0xb0] ss:$12 sps:$4 sm:$0xff]   ;;  %s10291_s6 = sld [smem:[#allocation43_spill]] }
0x1cee   : > { %4780 = vmatpush1.bf16.msra.mxu0 %v8551_v5 }
0x1cef   : > { %8076 = vmatprep.subr.bf16.mxu0 %v8922_v0 }
0x1cf1   : > { %4798 = vmatmul.mubr.bf16.vlgmr.msra.gmra.mrb[60].mxu0 %v9703_v3 }
0x1cf2   : > { %8078 = vmatprep.mubr.msk.bf16.mxu0 %vm8923_vm1, %v8922_v0 }
0x1da4   : > { %v4337_v16 = vpop.f32.mrb[56].mxu0 }
0x1da5   : > { %v4338_v17 = vadd.f32 %v4337_v16, %v4216_v14  ;;  %v4339_v18 = vpop.f32.mrb[57].mxu0 }
0x1da6   : > { %v4340_v19 = vadd.f32 %v4339_v18, %v4220_v15  ;;  %v4341_v20 = vpop.f32.mrb[58].mxu0  ;;  %v4633_v15 = vrot.slane %v9730_v1, %v9353_v50 }
0x1da7   : > { %v4346_v21 = vmul.f32 0.70710677, %v4338_v17  ;;  %v4342_v22 = vpop.f32.mrb[59].mxu0  ;;  %v4344_v27 = vmul.f32 0.5, %v4338_v17 }
0x1da8   : > { %v4347_v23 = vmul.f32 0.70710677, %v4340_v19  ;;  %v4345_v29 = vmul.f32 0.5, %v4340_v19 }
0x1da9   : > { %8716 = verf.f32 %v4346_v21 }
0x1daa   : > { %8718 = verf.f32 %v4347_v23 }
0x1db3   : > { %v8717_v25 = vpop.eup %8716 }
0x1db4   : > { %v8719_v26 = vpop.eup %8718  ;;  %v4350_v28 = vadd.f32 1.0, %v8717_v25 }
0x1db5   : > { %v4351_v30 = vadd.f32 1.0, %v8719_v26 }
0x1db6   : > { %v4352_v37 = vmul.f32 %v4350_v28, %v4344_v27 }
0x1db7   : > { %v4353_v31 = vmul.f32 %v4351_v30, %v4345_v29 }
0x1db8   : > { %v4386_v35 = vpack.c.bf16 %v4352_v37, %v4352_v37 }
0x1db9   : > { %v4387_v32 = vpack.c.bf16 %v4353_v31, %v4353_v31 }
0x1dbb   : > { %4523 = vmatprep.mubr.bf16.mxu1 %v4387_v32 }
0x1dbc   : > { %4524 = vmatmul.mubr.bf16.vlgmr.msra.gmra.mrb[72].mxu1 %v4386_v35 }
0x1dbd   : > { %8057 = vmatpush3.bf16.msra.mxu1 %v8570_v34  ;;  %8072 = vmatprep.mubr.msk.bf16.mxu1 %vm8923_vm1, %v8922_v0 }
0x1dbe   : > { %8058 = vmatprep.subr.bf16.mxu1 %v8922_v0 }
0x1dc1   : > { %8059 = vmatpush3.bf16.msra.mxu1 %v8571_v38 }
0x1dc2   : > { %8060 = vmatprep.subr.bf16.mxu1 %v8922_v0 }
0x1dc4   : > { %v4799_v44 = vpop.f32.mrb[60].mxu0 }
0x1dc5   : > { %v4800_v48 = vadd.f32 %v4799_v44, %v4625_v4  ;;  %v4801_v51 = vpop.f32.mrb[61].mxu0  ;;  %8061 = vmatpush3.bf16.msra.mxu1 %v8572_v41 }
0x1dc6   : > { %v4802_v53 = vadd.f32 %v4801_v51, %v4629_v42  ;;  %v4803_v54 = vpop.f32.mrb[62].mxu0  ;;  %8062 = vmatprep.subr.bf16.mxu1 %v8922_v0  ;;  %v8580_v51 = vld [vmem:[%s10287_s12 + $0x10] sm:$0xff]  }
0x1dc7   : > { %v9740_v55 = vpack.c.bf16 %v4800_v48, %v4800_v48  ;;  %v4804_v57 = vpop.f32.mrb[63].mxu0 }
0x1dc8   : > { %v9742_v58 = vpack.c.bf16 %v4802_v53, %v4802_v53 }
0x1dc9   : > { %4978 = vrot.lane.b32.xlu0 %v9740_v55, %s10274_s3  ;;  %8063 = vmatpush3.bf16.msra.mxu1 %v8573_v52  ;;  %v8581_v52 = vld [vmem:[%s10287_s12 + $0x18] sm:$0xff]  }
0x1dca   : > { %4981 = vrot.lane.b32.xlu1 %v9742_v58, %s10274_s3  ;;  %v4873_v59 = vsel %vm2140_vm3, %v9742_v58, 0  ;;  %8064 = vmatprep.subr.bf16.mxu1 %v8922_v0 }
0x1dcb   : > { %8077 = vmatpush3.bf16.xpose.msra.mxu0 %v4873_v59 }
0x1dcc   : > { %8088 = vmatprep.subr.bf16.mxu0 %v8922_v0 }
0x1dcd   : > { %8065 = vmatpush3.bf16.msra.mxu1 %v8574_v56 }
0x1dce   : > { %8066 = vmatprep.subr.bf16.mxu1 %v8922_v0 }
0x1dd1   : > { %8067 = vmatpush3.bf16.msra.mxu1 %v8575_v60  ;;  %v8578_v60 = vld [vmem:[%s10287_s12] sm:$0xff]  }
0x1dd2   : > { %8079 = vmatmul.mubr.msk.bf16.vlgmr.msra.gmra.mrb[64].mxu0 %vm2140_vm3, %v9740_v55  ;;  %8068 = vmatprep.subr.bf16.mxu1 %v8922_v0 }
0x1dd3   : > { %8090 = vmatprep.mubr.msk.bf16.mxu0 %vm8923_vm1, %v8922_v0 }
0x1dd5   : > { %8069 = vmatpush3.bf16.msra.mxu1 %v8576_v61 }
0x1dd6   : > { %8070 = vmatprep.subr.bf16.mxu1 %v8922_v0 }
0x1dd9   : > { %8071 = vmatpush3.bf16.msra.mxu1 %v8577_v62  ;;  %v8579_v62 = vld [vmem:[%s10287_s12 + $0x8] sm:$0xff]  }
0x1dda   : > { %8082 = vmatprep.subr.bf16.mxu1 %v8922_v0 }
0x1ddc   : > { %8073 = vmatmul.mubr.bf16.vlgmr.msra.gmra.mrb[76].mxu1 %v9703_v3 }
0x1ddd   : > { %8084 = vmatprep.mubr.msk.bf16.mxu1 %vm8923_vm1, %v8922_v0 }
0x1e3b   : > { %v4979_v6 = vpop.permute.xlu0 %4978 }
0x1e3c   : > { %v4982_v63 = vpop.permute.xlu1 %4981 }
0x1e3d   : > { %v4987_v5 = vsel %vm2140_vm3, %v4982_v63, 0 }
0x1e3e   : > { %8089 = vmatpush3.bf16.xpose.msra.mxu0 %v4987_v5 }
0x1e3f   : > { %8100 = vmatprep.subr.bf16.mxu0 %v8922_v0 }
0x1e45   : > { %8091 = vmatmul.mubr.msk.bf16.vlgmr.msra.gmra.mrb[68].mxu0 %vm2140_vm3, %v4979_v6 }
0x1e46   : > { %8104 = vmatprep.mubr.msk.bf16.mxu0 %vm8923_vm1, %v8922_v0  ;;  %8101 = vmatpush3.bf16.msra.mxu0 %v8580_v51  ;;  %v8583_v51 = vld [vmem:[%s10287_s12 + $0x28] sm:$0xff]  }
0x1e47   : > { %8102 = vmatprep.subr.bf16.mxu0 %v8922_v0 }
0x1e4a   : > { %8103 = vmatpush3.bf16.msra.mxu0 %v8581_v52 }
0x1e4b   : > { %8116 = vmatprep.subr.bf16.mxu0 %v8922_v0 }
0x1e8f   : > { %v7733_v36 = vpop.f32.mrb[72].mxu1 }
0x1e90   : > { %v7734_v7 = vpop.f32.mrb[73].mxu1 }
0x1e91   : > { %v9772_v8 = vadd.f32 %v7734_v7, %v7733_v36  ;;  %v7736_v3 = vpop.f32.mrb[74].mxu1 }
0x1e92   : > { %v7737_v9 = vpop.f32.mrb[75].mxu1 }
0x1ea5   : > { %v4909_v11 = vpop.f32.mrb[64].mxu0 }
0x1ea6   : > { %v4915_v43 = vmul.f32 0.17677669, %v4909_v11  ;;  %v8080_v39 = vpop.f32.mrb[65].mxu0 }
0x1ea7   : > { %v4912_v24 = vpop.f32.mrb[66].mxu0 }
0x1ea8   : > { %v8081_v12 = vpop.f32.mrb[67].mxu0  ;;  %v4916_v13 = vsel %vm4866_vm6, %v4915_v43, -1e+30 }
0x1ea9   : > { %v4917_v14 = vsel %vm2188_vm5, %v4916_v13, -inf }
0x1eaa   : > { %4918 = vmax.xlane.f32.xlu0 %v4917_v14 }
0x1eaf   : > { %v4840_v45 = vpop.f32.mrb[76].mxu1 }
0x1eb0   : > { %v4841_v16 = vadd.f32 %v4840_v45, %v4633_v15  ;;  %v8074_v17 = vpop.f32.mrb[77].mxu1 }
0x1eb1   : > { %v4843_v18 = vpop.f32.mrb[78].mxu1 }
0x1eb2   : > { %v9785_v19 = vpack.c.bf16 %v4841_v16, %v4841_v16  ;;  %v8075_v20 = vpop.f32.mrb[79].mxu1 }
0x1eb4   : > { %v4934_v21 = vsel %vm2205_vm4, %v9785_v19, 0 }
0x1eb5   : > { %8083 = vmatpush3.bf16.msra.mxu1 %v4934_v21 }
0x1eb6   : > { %8094 = vmatprep.subr.bf16.mxu1 %v8922_v0 }
0x1f18   : > { %v5023_v22 = vpop.f32.mrb[68].mxu0 }
0x1f19   : > { %v5029_v23 = vmul.f32 0.17677669, %v5023_v22  ;;  %v8092_v25 = vpop.f32.mrb[69].mxu0 }
0x1f1a   : > { %v5026_v26 = vpop.f32.mrb[70].mxu0 }
0x1f1b   : > { %v8093_v27 = vpop.f32.mrb[71].mxu0  ;;  %v5030_v50 = vsel %vm4866_vm6, %v5029_v23, -1e+30 }
0x1f1c   : > { %v5031_v28 = vsel %vm2188_vm5, %v5030_v50, -inf }
0x1f1d   : > { %5032 = vmax.xlane.f32.xlu1 %v5031_v28 }
0x1f2e   : > { %5205 = vrot.lane.b32.xlu1 %v9742_v58, %s10275_s11 }
0x1f32   : > { %5203 = vrot.lane.b32.xlu1 %v9740_v55, %s10275_s11 }
0x1f37   : > { %v4919_v29 = vpop.xlane.xlu0 %4918 }
0x1f38   : > { %v4920_v30 = vsub.f32 %v4916_v13, %v4919_v29 }
0x1f3a   : > { %v4921_v37 = vmul.f32 1.442695, %v4920_v30 }
0x1f3c   : > { %8720 = vpow2.f32 %v4921_v37 }
0x1f46   : > { %v8721_v31 = vpop.eup %8720 }
0x1f47   : > { %v4923_v32 = vsel %vm2188_vm5, %v8721_v31, 0.0 }
0x1f48   : > { %4924 = vadd.xlane.f32.xlu0 %v4923_v32 }
0x1faa   : > { %v5033_v34 = vpop.xlane.xlu1 %5032 }
0x1fab   : > { %v5034_v35 = vsub.f32 %v5030_v50, %v5033_v34 }
0x1fad   : > { %v5035_v38 = vmul.f32 1.442695, %v5034_v35 }
0x1fae   : > { %v5206_v3 = vpop.permute.xlu1 %5205 }
0x1faf   : > { %8722 = vpow2.f32 %v5035_v38  ;;  %v5211_v24 = vsel %vm2140_vm3, %v5206_v3, 0 }
0x1fb2   : > { %v5204_v13 = vpop.permute.xlu1 %5203 }
0x1fb9   : > { %v8723_v1 = vpop.eup %8722 }
0x1fba   : > { %v5037_v4 = vsel %vm2188_vm5, %v8723_v1, 0.0 }
0x1fbb   : > { %5038 = vadd.xlane.f32.xlu0 %v5037_v4 }
0x1fd1   : > { %5044 = vrot.lane.b32.xlu0 %v9785_v19, %s10274_s3 }
0x1fd5   : > { %v4925_v41 = vpop.xlane.xlu0 %4924 }
0x1fd6   : > { %8724 = vrcp.f32 %v4925_v41 }
0x1fe0   : > { %v8725_v42 = vpop.eup %8724 }
0x1fe1   : > { %v4927_v44 = vmul.f32 %v8725_v42, %v8721_v31 }
0x1fe3   : > { %v4928_v48 = vpack.c.bf16 %v4927_v44, %v4927_v44 }
0x1fe5   : > { %8085 = vmatmul.mubr.msk.bf16.vlgmr.msra.gmra.mrb[80].mxu1 %vm2188_vm5, %v4928_v48 }
0x1fe6   : > { %8096 = vmatprep.mubr.msk.bf16.mxu1 %vm8923_vm1, %v8922_v0 }
0x2048   : > { %v5039_v53 = vpop.xlane.xlu0 %5038 }
0x2049   : > { %8726 = vrcp.f32 %v5039_v53 }
0x204c   : > { %v5045_v54 = vpop.permute.xlu0 %5044 }
0x204d   : > { %v5050_v57 = vsel %vm2205_vm4, %v5045_v54, 0 }
0x204e   : > { %8095 = vmatpush3.bf16.msra.mxu1 %v5050_v57 }
0x204f   : > { %8108 = vmatprep.subr.bf16.mxu1 %v8922_v0 }
0x2053   : > { %v8727_v56 = vpop.eup %8726 }
0x2054   : > { %v5041_v59 = vmul.f32 %v8727_v56, %v8723_v1  ;;  %v8582_v1 = vld [vmem:[%s10287_s12 + $0x20] sm:$0xff]  }
0x2056   : > { %v5042_v61 = vpack.c.bf16 %v5041_v59, %v5041_v59  ;;  %v7449_v59 = vld [vmem:[%s10288_s9] ss:$0 sm:$0xff]  ;;  %s10289_s9 = sld [smem:[#allocation33_spill]] }
0x2058   : > { %8097 = vmatmul.mubr.msk.bf16.vlgmr.msra.gmra.mrb[84].mxu1 %vm2188_vm5, %v5042_v61 }
0x2059   : > { %8109 = vmatpush3.bf16.msra.mxu1 %v8578_v60  ;;  %8112 = vmatprep.mubr.msk.bf16.mxu1 %vm8923_vm1, %v8922_v0 }
0x205a   : > { %8110 = vmatprep.subr.bf16.mxu1 %v8922_v0 }
0x205d   : > { %8111 = vmatpush3.bf16.msra.mxu1 %v8579_v62 }
0x205e   : > { %8122 = vmatprep.subr.bf16.mxu1 %v8922_v0 }
0x20b8   : > { %v4970_v63 = vpop.f32.mrb[80].mxu1 }
0x20b9   : > { %v4976_v5 = vpack.c.bf16 %v4970_v63, %v4970_v63  ;;  %v8086_v6 = vpop.f32.mrb[81].mxu1 }
0x20ba   : > { %v4973_v36 = vpop.f32.mrb[82].mxu1 }
0x20bb   : > { %v8087_v7 = vpop.f32.mrb[83].mxu1  ;;  %8113 = vmatmul.mubr.msk.bf16.vlgmr.msra.gmra.mrb[88].mxu1 %vm2140_vm3, %v4976_v5  ;;  %v4526_v5 = vadd.f32 %v9772_v8, %v7449_v59 }
0x20bc   : > { %8124 = vmatprep.mubr.msk.bf16.mxu1 %vm8923_vm1, %v8922_v0 }
0x20bd   : > { %v4531_v3 = vadd.f32 %v4526_v5, %v9677_v40  ;;  %v8597_v5 = vld [vmem:[%s10291_s6 + $0x34] ss:$8 sps:$4 sm:$0xff]  }
0x212b   : > { %v5086_v9 = vpop.f32.mrb[84].mxu1 }
0x212c   : > { %v5092_v11 = vpack.c.bf16 %v5086_v9, %v5086_v9  ;;  %v8098_v43 = vpop.f32.mrb[85].mxu1 }
0x212d   : > { %v5089_v39 = vpop.f32.mrb[86].mxu1 }
0x212e   : > { %v8099_v12 = vpop.f32.mrb[87].mxu1  ;;  %8105 = vmatmul.mubr.msk.bf16.vlgmr.msra.gmra.mrb[72].mxu0 %vm2140_vm3, %v5092_v11 }
0x212f   : > { %8117 = vmatpush3.bf16.xpose.msra.mxu0 %v5211_v24  ;;  %8118 = vmatprep.mubr.msk.bf16.mxu0 %vm8923_vm1, %v8922_v0 }
0x2130   : > { %8128 = vmatprep.subr.bf16.mxu0 %v8922_v0 }
0x2136   : > { %8119 = vmatmul.mubr.msk.bf16.vlgmr.msra.gmra.mrb[76].mxu0 %vm2140_vm3, %v5204_v13 }
0x2137   : > { %8132 = vmatprep.mubr.msk.bf16.mxu0 %vm8923_vm1, %v8922_v0  ;;  %8129 = vmatpush3.bf16.msra.mxu0 %v8582_v1 }
0x2138   : > { %8130 = vmatprep.subr.bf16.mxu0 %v8922_v0 }
0x213b   : > { %8131 = vmatpush3.bf16.msra.mxu0 %v8583_v51 }
0x213c   : > { %8142 = vmatprep.subr.bf16.mxu0 %v8922_v0 }
0x218e   : > { %v5197_v14 = vpop.f32.mrb[88].mxu1 }
0x218f   : > { %v8114_v15 = vpop.f32.mrb[89].mxu1 }
0x2190   : > { %v5200_v45 = vpop.f32.mrb[90].mxu1 }
0x2191   : > { %v8115_v16 = vpop.f32.mrb[91].mxu1 }
0x2201   : > { %v5142_v17 = vpop.f32.mrb[72].mxu0 }
0x2202   : > { %v9829_v18 = vadd.f32 %v5197_v14, %v5142_v17  ;;  %v8106_v20 = vpop.f32.mrb[73].mxu0 }
0x2203   : > { %v5145_v21 = vpop.f32.mrb[74].mxu0 }
0x2204   : > { %v8107_v22 = vpop.f32.mrb[75].mxu0 }
0x2209   : > { %v5247_v23 = vpop.f32.mrb[76].mxu0 }
0x220a   : > { %v5253_v25 = vmul.f32 0.17677669, %v5247_v23  ;;  %v8120_v26 = vpop.f32.mrb[77].mxu0 }
0x220b   : > { %v5250_v27 = vpop.f32.mrb[78].mxu0 }
0x220c   : > { %v8121_v50 = vpop.f32.mrb[79].mxu0  ;;  %v5254_v28 = vsel %vm4866_vm6, %v5253_v25, -1e+30  ;;  %v7467_v27 = vld [vmem:[%s10290_s1] ss:$0 sm:$0xff]  ;;  %s10292_s1 = sld [smem:[#allocation40_spill]] }
0x220d   : > { %v5255_v29 = vsel %vm2188_vm5, %v5254_v28, -inf }
0x220e   : > { %5256 = vmax.xlane.f32.xlu0 %v5255_v29 }
0x2224   : > { %5267 = vrot.lane.b32.xlu0 %v9785_v19, %s10275_s11 }
0x2228   : > { %5372 = vrot.lane.b32.xlu0 %v9740_v55, %s10277_s5 }
0x229b   : > { %v5257_v30 = vpop.xlane.xlu0 %5256 }
0x229c   : > { %v5258_v37 = vsub.f32 %v5254_v28, %v5257_v30 }
0x229e   : > { %v5259_v31 = vmul.f32 1.442695, %v5258_v37  ;;  %v8584_v37 = vld [vmem:[%s10287_s12 + $0x30] sm:$0xff]  }
0x229f   : > { %v5268_v32 = vpop.permute.xlu0 %5267 }
0x22a0   : > { %8728 = vpow2.f32 %v5259_v31  ;;  %v5273_v34 = vsel %vm2205_vm4, %v5268_v32, 0  ;;  %v8585_v31 = vld [vmem:[%s10287_s12 + $0x38] sm:$0xff]  }
0x22a1   : > { %8123 = vmatpush3.bf16.msra.mxu1 %v5273_v34 }
0x22a2   : > { %8136 = vmatprep.subr.bf16.mxu1 %v8922_v0 }
0x22aa   : > { %v8729_v35 = vpop.eup %8728 }
0x22ab   : > { %v5261_v38 = vsel %vm2188_vm5, %v8729_v35, 0.0 }
0x22ac   : > { %5262 = vadd.xlane.f32.xlu1 %v5261_v38 }
0x22bd   : > { %5374 = vrot.lane.b32.xlu1 %v9742_v58, %s10277_s5  ;;  %v5373_v58 = vpop.permute.xlu0 %5372 }
0x2339   : > { %v5263_v55 = vpop.xlane.xlu1 %5262 }
0x233a   : > { %8730 = vrcp.f32 %v5263_v55  ;;  %v8586_v55 = vld [vmem:[%s10291_s6] ss:$8 sps:$4 sm:$0xff]  }
0x233d   : > { %v5375_v42 = vpop.permute.xlu1 %5374 }
0x233e   : > { %v5380_v48 = vsel %vm2140_vm3, %v5375_v42, 0  ;;  %v8589_v42 = vld [vmem:[%s10291_s6 + $0x10] ss:$8 sps:$4 sm:$0xff]  }
0x2344   : > { %v8731_v4 = vpop.eup %8730 }
0x2345   : > { %v5265_v41 = vmul.f32 %v8731_v4, %v8729_v35  ;;  %v8588_v4 = vld [vmem:[%s10291_s6 + $0x4] ss:$8 sps:$4 sm:$0xff]  }
0x2347   : > { %v5266_v44 = vpack.c.bf16 %v5265_v41, %v5265_v41  ;;  %v8591_v41 = vld [vmem:[%s10291_s6 + $0x14] ss:$8 sps:$4 sm:$0xff]  }
0x2349   : > { %8125 = vmatmul.mubr.msk.bf16.vlgmr.msra.gmra.mrb[92].mxu1 %vm2188_vm5, %v5266_v44 }
0x234a   : > { %8137 = vmatpush3.bf16.xpose.msra.mxu1 %v5380_v48  ;;  %8138 = vmatprep.mubr.msk.bf16.mxu1 %vm8923_vm1, %v8922_v0 }
0x234b   : > { %8148 = vmatprep.subr.bf16.mxu1 %v8922_v0 }
0x2351   : > { %8139 = vmatmul.mubr.msk.bf16.vlgmr.msra.gmra.mrb[96].mxu1 %vm2140_vm3, %v5373_v58  ;;  %v7514_v58 = vld [vmem:[%s10292_s1] ss:$0 sm:$0xff]  ;;  %s10294_s1 = sld [smem:[#allocation35_spill]] }
0x2352   : > { %8152 = vmatprep.mubr.msk.bf16.mxu1 %vm8923_vm1, %v8922_v0  ;;  %8149 = vmatpush3.bf16.msra.mxu1 %v8584_v37 }
0x2353   : > { %8150 = vmatprep.subr.bf16.mxu1 %v8922_v0 }
0x2356   : > { %8151 = vmatpush3.bf16.msra.mxu1 %v8585_v31 }
0x2357   : > { %5798 = vmatprep.subr.bf16.mxu1 %v8588_v4 }
0x241c   : > { %v5309_v52 = vpop.f32.mrb[92].mxu1 }
0x241d   : > { %v5315_v53 = vpack.c.bf16 %v5309_v52, %v5309_v52  ;;  %v8126_v54 = vpop.f32.mrb[93].mxu1 }
0x241e   : > { %v5312_v57 = vpop.f32.mrb[94].mxu1 }
0x241f   : > { %v8127_v56 = vpop.f32.mrb[95].mxu1  ;;  %8133 = vmatmul.mubr.msk.bf16.vlgmr.msra.gmra.mrb[80].mxu0 %vm2140_vm3, %v5315_v53 }
0x2420   : > { %8144 = vmatprep.mubr.msk.bf16.mxu0 %vm8923_vm1, %v8922_v0 }
0x2424   : > { %v5416_v60 = vpop.f32.mrb[96].mxu1 }
0x2425   : > { %v5422_v61 = vmul.f32 0.17677669, %v5416_v60  ;;  %v8140_v62 = vpop.f32.mrb[97].mxu1 }
0x2426   : > { %v5419_v63 = vpop.f32.mrb[98].mxu1  ;;  %v8592_v62 = vld [vmem:[%s10291_s6 + $0x20] ss:$8 sps:$4 sm:$0xff]  }
0x2427   : > { %v8141_v6 = vpop.f32.mrb[99].mxu1  ;;  %v5423_v36 = vsel %vm4866_vm6, %v5422_v61, -1e+30  ;;  %v8594_v63 = vld [vmem:[%s10291_s6 + $0x24] ss:$8 sps:$4 sm:$0xff]  }
0x2428   : > { %v5424_v7 = vsel %vm2188_vm5, %v5423_v36, -inf  ;;  %v8595_v6 = vld [vmem:[%s10291_s6 + $0x30] ss:$8 sps:$4 sm:$0xff]  }
0x2429   : > { %5425 = vmax.xlane.f32.xlu1 %v5424_v7  ;;  %v8598_v7 = vld [vmem:[%s10291_s6 + $0x40] ss:$8 sps:$4 sm:$0xff]  }
0x242d   : > { %4534 = vadd.xlane.f32.xlu1 %v4531_v3 }
0x24b6   : > { %v5426_v9 = vpop.xlane.xlu1 %5425 }
0x24b7   : > { %v5427_v11 = vsub.f32 %v5423_v36, %v5426_v9  ;;  %v8600_v36 = vld [vmem:[%s10291_s6 + $0x44] ss:$8 sps:$4 sm:$0xff]  }
0x24b8   : > { %v8606_v9 = vld [vmem:[%s10291_s6 + $0x64] ss:$8 sps:$4 sm:$0xff]  }
0x24b9   : > { %v5428_v43 = vmul.f32 1.442695, %v5427_v11  ;;  %v8604_v11 = vld [vmem:[%s10291_s6 + $0x60] ss:$8 sps:$4 sm:$0xff]  }
0x24ba   : > { %v4535_v39 = vpop.xlane.xlu1 %4534 }
0x24bb   : > { %8732 = vpow2.f32 %v5428_v43  ;;  %v4536_v24 = vmul.f32 0.0078125, %v4535_v39  ;;  %v8609_v43 = vld [vmem:[%s10291_s6 + $0x74] ss:$8 sps:$4 sm:$0xff]   ;;  %v8607_v39 = vld [vmem:[%s10291_s6 + $0x70] ss:$8 sps:$4 sm:$0xff]  }
0x24bd   : > { %v4537_v12 = vsub.f32 %v4531_v3, %v4536_v24  ;;  %v8601_v3 = vld [vmem:[%s10291_s6 + $0x50] ss:$8 sps:$4 sm:$0xff]  }
0x24bf   : > { %v4538_v13 = vmul.f32 %v4537_v12, %v4537_v12 }
0x24c1   : > { %4539 = vadd.xlane.f32.xlu1 %v4538_v13 }
0x24c5   : > { %v8733_v8 = vpop.eup %8732 }
0x24c6   : > { %v5430_v14 = vsel %vm2188_vm5, %v8733_v8, 0.0 }
0x24c7   : > { %5431 = vadd.xlane.f32.xlu0 %v5430_v14 }
0x24dd   : > { %5436 = vrot.lane.b32.xlu0 %v9785_v19, %s10277_s5 }
0x24f2   : > { %v5365_v46 = vpop.f32.mrb[80].mxu0 }
0x24f3   : > { %v5371_v40 = vadd.f32 %v5365_v46, %v9829_v18  ;;  %v8134_v10 = vpop.f32.mrb[81].mxu0  ;;  %v7466_v18 = vld [vmem:[%s10289_s9] ss:$0 sm:$0xff]  ;;  %s10293_s9 = sld [smem:[#allocation41_spill]] }
0x24f4   : > { %v5368_v15 = vpop.f32.mrb[82].mxu0 }
0x24f5   : > { %v8135_v45 = vpop.f32.mrb[83].mxu0 }
0x24f9   : > { %v8610_v24 = vld [vmem:[%s10293_s9] sm:$0xff]  }
0x254e   : > { %v4540_v16 = vpop.xlane.xlu1 %4539 }
0x254f   : > { %v4541_v17 = vmul.f32 0.0078125, %v4540_v16  ;;  %v7468_v16 = vld [vmem:[%s10294_s1] ss:$0 sm:$0xff]  ;;  %s10297_s1 = sld [smem:[#allocation48_spill]] }
0x2551   : > { %v4542_v20 = vadd.f32 1e-05, %v4541_v17 }
0x2553   : > { %8734 = vrsqrt.f32 %v4542_v20  ;;  %v8612_v20 = vld [vmem:[%s10293_s9 + $0x10] sm:$0xff]  }
0x2554   : > { %v5432_v21 = vpop.xlane.xlu0 %5431 }
0x2555   : > { %8736 = vrcp.f32 %v5432_v21  ;;  %v7469_v21 = vld [vmem:[%s10295_s8] ss:$0 sm:$0xff]  ;;  %s10296_s8 = sld [smem:[#allocation47_spill]] }
0x2558   : > { %v5437_v22 = vpop.permute.xlu0 %5436 }
0x2559   : > { %v5442_v23 = vsel %vm2205_vm4, %v5437_v22, 0 }
0x255a   : > { %8143 = vmatpush3.bf16.msra.mxu0 %v5442_v23 }
0x255b   : > { %8156 = vmatprep.subr.bf16.mxu0 %v8922_v0  ;;  %v7515_v31 = vld [vmem:[%s10296_s8] ss:$0 sm:$0xff]  ;;  %s10305_s8 = sld [smem:[#allocation50_spill]] }
0x255d   : > { %v8735_v19 = vpop.eup %8734 }
0x255e   : > { %v4544_v25 = vmul.f32 %v8735_v19, %v4537_v12  ;;  %v8611_v12 = vld [vmem:[%s10293_s9 + $0x8] sm:$0xff]   ;;  %v8613_v19 = vld [vmem:[%s10293_s9 + $0x18] sm:$0xff]  }
0x255f   : > { %v8737_v26 = vpop.eup %8736 }
0x2560   : > { %v5434_v50 = vmul.f32 %v8737_v26, %v8733_v8  ;;  %v4551_v28 = vmul.f32 %v7466_v18, %v4544_v25  ;;  %v8614_v25 = vld [vmem:[%s10293_s9 + $0x20] sm:$0xff]   ;;  %v8615_v26 = vld [vmem:[%s10293_s9 + $0x28] sm:$0xff]  }
0x2562   : > { %v5435_v29 = vpack.c.bf16 %v5434_v50, %v5434_v50  ;;  %v4558_v30 = vadd.f32 %v7467_v27, %v4551_v28  ;;  %v8616_v27 = vld [vmem:[%s10293_s9 + $0x30] sm:$0xff]   ;;  %v8617_v50 = vld [vmem:[%s10293_s9 + $0x38] sm:$0xff]   ;;  %s10299_s9 = sld [smem:[#allocation42_spill]] }
0x2564   : > { %8145 = vmatmul.mubr.msk.bf16.vlgmr.msra.gmra.mrb[84].mxu0 %vm2188_vm5, %v5435_v29  ;;  %4561 = vadd.xlane.f32.xlu1 %v4558_v30 }
0x2565   : > { %8172 = vmatprep.mubr.msk.bf16.mxu0 %vm8923_vm1, %v8922_v0  ;;  %8157 = vmatpush3.bf16.msra.mxu0 %v8610_v24 }
0x2566   : > { %8158 = vmatprep.subr.bf16.mxu0 %v8922_v0 }
0x2569   : > { %8159 = vmatpush3.bf16.msra.mxu0 %v8611_v12 }
0x256a   : > { %8160 = vmatprep.subr.bf16.mxu0 %v8922_v0 }
0x256d   : > { %8161 = vmatpush3.bf16.msra.mxu0 %v8612_v20 }
0x256e   : > { %8162 = vmatprep.subr.bf16.mxu0 %v8922_v0 }
0x2571   : > { %8163 = vmatpush3.bf16.msra.mxu0 %v8613_v19 }
0x2572   : > { %8164 = vmatprep.subr.bf16.mxu0 %v8922_v0 }
0x2575   : > { %8165 = vmatpush3.bf16.msra.mxu0 %v8614_v25 }
0x2576   : > { %8166 = vmatprep.subr.bf16.mxu0 %v8922_v0 }
0x2579   : > { %8167 = vmatpush3.bf16.msra.mxu0 %v8615_v26 }
0x257a   : > { %8168 = vmatprep.subr.bf16.mxu0 %v8922_v0 }
0x257d   : > { %8169 = vmatpush3.bf16.msra.mxu0 %v8616_v27 }
0x257e   : > { %8170 = vmatprep.subr.bf16.mxu0 %v8922_v0 }
0x2581   : > { %8171 = vmatpush3.bf16.msra.mxu0 %v8617_v50 }
0x2582   : > { %8176 = vmatprep.subr.bf16.mxu0 %v8922_v0 }
0x25f1   : > { %v4562_v44 = vpop.xlane.xlu1 %4561 }
0x25f2   : > { %v4563_v51 = vmul.f32 0.0078125, %v4562_v44 }
0x25f4   : > { %v4564_v59 = vsub.f32 %v4558_v30, %v4563_v51 }
0x25f6   : > { %v4565_v61 = vmul.f32 %v4564_v59, %v4564_v59 }
0x2637   : > { %v5478_v32 = vpop.f32.mrb[84].mxu0 }
0x2638   : > { %v5484_v34 = vpack.c.bf16 %v5478_v32, %v5478_v32  ;;  %v8146_v35 = vpop.f32.mrb[85].mxu0 }
0x2639   : > { %v5481_v38 = vpop.f32.mrb[86].mxu0 }
0x263a   : > { %v8147_v1 = vpop.f32.mrb[87].mxu0  ;;  %8153 = vmatmul.mubr.msk.bf16.vlgmr.msra.gmra.mrb[100].mxu1 %vm2140_vm3, %v5484_v34  ;;  %v7516_v34 = vld [vmem:[%s10297_s1] ss:$0 sm:$0xff]  ;;  %s10306_s1 = sld [smem:[#allocation54_spill]] }
0x263b   : > { %5830 = vmatprep.mubr.bf16.mxu1 %v8924_v33  ;;  %5799 = vmatpush1.bf16.msra.mxu1 %v8586_v55 }
0x263c   : > { %5800 = vmatprep.subr.bf16.mxu1 %v8591_v41 }
0x263f   : > { %5801 = vmatpush1.bf16.msra.mxu1 %v8589_v42 }
0x2640   : > { %5802 = vmatprep.subr.bf16.mxu1 %v8594_v63 }
0x2643   : > { %5803 = vmatpush1.bf16.msra.mxu1 %v8592_v62 }
0x2644   : > { %5804 = vmatprep.subr.bf16.mxu1 %v8597_v5 }
0x2647   : > { %5805 = vmatpush1.bf16.msra.mxu1 %v8595_v6 }
0x2648   : > { %5806 = vmatprep.subr.bf16.mxu1 %v8600_v36 }
0x264b   : > { %5807 = vmatpush1.bf16.msra.mxu1 %v8598_v7 }
0x270d   : > { %v5534_v48 = vpop.f32.mrb[100].mxu1 }
0x270e   : > { %v5540_v52 = vadd.f32 %v5534_v48, %v5371_v40  ;;  %v8154_v53 = vpop.f32.mrb[101].mxu1 }
0x270f   : > { %v5537_v54 = vpop.f32.mrb[102].mxu1 }
0x2710   : > { %v5548_v57 = vadd.f32 %v7514_v58, %v5540_v52  ;;  %v8155_v56 = vpop.f32.mrb[103].mxu1 }
0x2712   : > { %v5549_v60 = vadd.f32 %v5548_v57, %v9699_v2  ;;  %v8603_v2 = vld [vmem:[%s10291_s6 + $0x54] ss:$8 sps:$4 sm:$0xff]   ;;  %s9906_s6 = sand.u32 1, %s8854_s16  }
0x2713   : > { %5808 = vmatprep.subr.bf16.mxu1 %v8603_v2  ;;  %s10198_s12 = sshll.u32 %s9906_s6, 3  ;;  %s7068_s14 = scalar_lea.sflag [#allocation3], %s9906_s6 }
0x2714   : > { %5552 = vadd.xlane.f32.xlu1 %v5549_v60  ;;  %5809 = vmatpush1.bf16.msra.mxu1 %v8601_v3  ;;  %s9916_s13 = scalar_lea.vmem [#allocation2], %s10198_s12  ;;  %s10298_s12 = sld [smem:[#allocation44_spill]] }
0x2715   : > { %5810 = vmatprep.subr.bf16.mxu1 %v8606_v9 }
0x2718   : > { %4566 = vadd.xlane.f32.xlu1 %v4565_v61  ;;  %5811 = vmatpush1.bf16.msra.mxu1 %v8604_v11 }
0x2719   : > { %5812 = vmatprep.subr.bf16.mxu1 %v8609_v43 }
0x271a   : > { %v5706_v55 = vld [vmem:[%s10298_s12] sm:$0x3]  ;;  %s10300_s12 = sld [smem:[#allocation45_spill]] }
0x271b   : > { %v5711_v4 = vrot.slane %v5706_v55, %v9350_v49  ;;  %v5715_v41 = vrot.slane %v5706_v55, %v9346_v47 }
0x271c   : > { %5813 = vmatpush1.bf16.msra.mxu1 %v8607_v39 }
0x271d   : > { %8182 = vmatprep.subr.bf16.mxu1 %v8922_v0 }
0x2720   : > { %v8620_v50 = vld [vmem:[%s10300_s12 + $0x10] sm:$0xff]  }
0x27a1   : > { %v5553_v13 = vpop.xlane.xlu1 %5552 }
0x27a2   : > { %v5554_v8 = vmul.f32 0.0078125, %v5553_v13 }
0x27a4   : > { %v5555_v14 = vsub.f32 %v5549_v60, %v5554_v8 }
0x27a5   : > { %v4567_v46 = vpop.xlane.xlu1 %4566 }
0x27a6   : > { %v4568_v40 = vmul.f32 0.0078125, %v4567_v46  ;;  %v5556_v10 = vmul.f32 %v5555_v14, %v5555_v14 }
0x27a8   : > { %v4569_v15 = vadd.f32 1e-05, %v4568_v40  ;;  %5557 = vadd.xlane.f32.xlu0 %v5556_v10 }
0x27aa   : > { %8738 = vrsqrt.f32 %v4569_v15 }
0x27b4   : > { %v8739_v45 = vpop.eup %8738 }
0x27b5   : > { %v4571_v17 = vmul.f32 %v8739_v45, %v4564_v59  ;;  %v7517_v59 = vld [vmem:[%s10299_s9] ss:$0 sm:$0xff]  ;;  %s10304_s9 = sld [smem:[#allocation49_spill]] }
0x27b7   : > { %v4578_v22 = vmul.f32 %v7468_v16, %v4571_v17 }
0x27b9   : > { %v4585_v23 = vadd.f32 %v7469_v21, %v4578_v22 }
0x27bb   : > { %v5705_v18 = vpack.c.bf16 %v4585_v23, %v4585_v23  ;;  %4586 = vst [vmem:[%s9916_s13] sm:$0xff] %v4585_v23 }
0x27bd   : > { %5831 = vmatmul.mubr.bf16.vlgmr.msra.gmra.mrb[104].mxu1 %v5705_v18 }
0x27be   : > { %8184 = vmatprep.mubr.msk.bf16.mxu1 %vm8923_vm1, %v8922_v0 }
0x2835   : > { %v5558_v28 = vpop.xlane.xlu0 %5557 }
0x2836   : > { %v5559_v29 = vmul.f32 0.0078125, %v5558_v28  ;;  %v8621_v28 = vld [vmem:[%s10300_s12 + $0x18] sm:$0xff]  }
0x2838   : > { %v5560_v30 = vadd.f32 1e-05, %v5559_v29 }
0x283a   : > { %8740 = vrsqrt.f32 %v5560_v30 }
0x2844   : > { %v8741_v37 = vpop.eup %8740 }
0x2845   : > { %v5562_v32 = vmul.f32 %v8741_v37, %v5555_v14 }
0x2847   : > { %v5569_v35 = vmul.f32 %v7515_v31, %v5562_v32 }
0x2849   : > { %v9932_v38 = vadd.f32 %v7516_v34, %v5569_v35  ;;  %v8618_v34 = vld [vmem:[%s10300_s12] sm:$0xff]  }
0x284b   : > { %v5593_v1 = vpack.c.bf16 %v9932_v38, %v9932_v38 }
0x284d   : > { %8173 = vmatmul.mubr.bf16.vlgmr.msra.gmra.mrb[88].mxu0 %v5593_v1  ;;  %v8619_v1 = vld [vmem:[%s10300_s12 + $0x8] sm:$0xff]  }
0x284e   : > { %8178 = vmatprep.mubr.msk.bf16.mxu0 %vm8923_vm1, %v8922_v0 }
0x2890   : > { %v5832_v42 = vpop.f32.mrb[104].mxu1 }
0x2891   : > { %v5833_v44 = vadd.f32 %v5832_v42, %v5711_v4  ;;  %v5834_v48 = vpop.f32.mrb[105].mxu1 }
0x2892   : > { %v5835_v58 = vadd.f32 %v5834_v48, %v5715_v41  ;;  %v5836_v51 = vpop.f32.mrb[106].mxu1 }
0x2893   : > { %v9941_v52 = vpack.c.bf16 %v5833_v44, %v5833_v44  ;;  %v5837_v53 = vpop.f32.mrb[107].mxu1 }
0x2894   : > { %v9943_v54 = vpack.c.bf16 %v5835_v58, %v5835_v58 }
0x2895   : > { %5968 = vrot.lane.b32.xlu1 %v9941_v52, %s10274_s3  ;;  %v5861_v57 = vsel %vm2140_vm3, %v9941_v52, 0 }
0x2896   : > { %8177 = vmatpush3.bf16.xpose.msra.mxu0 %v5861_v57  ;;  %v5921_v56 = vsel %vm2205_vm4, %v9943_v54, 0 }
0x2897   : > { %8183 = vmatpush3.bf16.msra.mxu1 %v5921_v56  ;;  %8188 = vmatprep.subr.bf16.mxu0 %v8922_v0 }
0x2898   : > { %8194 = vmatprep.subr.bf16.mxu1 %v8922_v0 }
0x2907   : > { %v5969_v63 = vpop.permute.xlu1 %5968 }
0x2908   : > { %v5974_v7 = vsel %vm2140_vm3, %v5969_v63, 0 }
0x2920   : > { %v5683_v60 = vpop.f32.mrb[88].mxu0 }
0x2921   : > { %v5684_v61 = vadd.f32 %v7517_v59, %v5683_v60  ;;  %v8174_v62 = vpop.f32.mrb[89].mxu0 }
0x2922   : > { %v5686_v5 = vpop.f32.mrb[90].mxu0 }
0x2923   : > { %v9954_v6 = vpack.c.bf16 %v5684_v61, %v5684_v61  ;;  %v8175_v36 = vpop.f32.mrb[91].mxu0 }
0x2925   : > { %5965 = vrot.lane.b32.xlu1 %v9954_v6, %s10274_s3  ;;  %8179 = vmatmul.mubr.msk.bf16.vlgmr.msra.gmra.mrb[92].mxu0 %vm2140_vm3, %v9954_v6 }
0x2926   : > { %8189 = vmatpush3.bf16.xpose.msra.mxu0 %v5974_v7  ;;  %8190 = vmatprep.mubr.msk.bf16.mxu0 %vm8923_vm1, %v8922_v0 }
0x2927   : > { %8200 = vmatprep.subr.bf16.mxu0 %v8922_v0 }
0x2997   : > { %v5966_v2 = vpop.permute.xlu1 %5965 }
0x2998   : > { %8191 = vmatmul.mubr.msk.bf16.vlgmr.msra.gmra.mrb[96].mxu0 %vm2140_vm3, %v5966_v2 }
0x2999   : > { %8204 = vmatprep.mubr.msk.bf16.mxu0 %vm8923_vm1, %v8922_v0  ;;  %8201 = vmatpush3.bf16.msra.mxu0 %v8620_v50 }
0x299a   : > { %8202 = vmatprep.subr.bf16.mxu0 %v8922_v0 }
0x299d   : > { %8203 = vmatpush3.bf16.msra.mxu0 %v8621_v28 }
0x299e   : > { %8216 = vmatprep.subr.bf16.mxu0 %v8922_v0 }
0x29f8   : > { %v5897_v3 = vpop.f32.mrb[92].mxu0 }
0x29f9   : > { %v5903_v9 = vmul.f32 0.17677669, %v5897_v3  ;;  %v8180_v11 = vpop.f32.mrb[93].mxu0 }
0x29fa   : > { %v5900_v43 = vpop.f32.mrb[94].mxu0 }
0x29fb   : > { %v8181_v39 = vpop.f32.mrb[95].mxu0  ;;  %v5904_v24 = vsel %vm2188_vm5, %v5903_v9, -inf }
0x29fc   : > { %5905 = vmax.xlane.f32.xlu1 %v5904_v24 }
0x2a0d   : > { %6191 = vrot.lane.b32.xlu1 %v9941_v52, %s10275_s11 }
0x2a6b   : > { %v6010_v12 = vpop.f32.mrb[96].mxu0 }
0x2a6c   : > { %v6016_v13 = vmul.f32 0.17677669, %v6010_v12  ;;  %v8192_v8 = vpop.f32.mrb[97].mxu0 }
0x2a6d   : > { %v6013_v14 = vpop.f32.mrb[98].mxu0 }
0x2a6e   : > { %v8193_v46 = vpop.f32.mrb[99].mxu0  ;;  %v6017_v40 = vsel %vm2188_vm5, %v6016_v13, -inf }
0x2a6f   : > { %6018 = vmax.xlane.f32.xlu0 %v6017_v40 }
0x2a89   : > { %v5906_v10 = vpop.xlane.xlu1 %5905 }
0x2a8a   : > { %v5907_v15 = vsub.f32 %v5903_v9, %v5906_v10 }
0x2a8c   : > { %v5908_v45 = vmul.f32 1.442695, %v5907_v15 }
0x2a8d   : > { %v6192_v48 = vpop.permute.xlu1 %6191 }
0x2a8e   : > { %8742 = vpow2.f32 %v5908_v45  ;;  %v6197_v56 = vsel %vm2140_vm3, %v6192_v48, 0 }
0x2a98   : > { %v8743_v16 = vpop.eup %8742 }
0x2a99   : > { %v5910_v17 = vsel %vm2188_vm5, %v8743_v16, 0.0 }
0x2a9a   : > { %5911 = vadd.xlane.f32.xlu0 %v5910_v17 }
0x2afc   : > { %v6019_v20 = vpop.xlane.xlu0 %6018 }
0x2afd   : > { %v6020_v21 = vsub.f32 %v6016_v13, %v6019_v20 }
0x2aff   : > { %v6021_v22 = vmul.f32 1.442695, %v6020_v21 }
0x2b01   : > { %8744 = vpow2.f32 %v6021_v22 }
0x2b0b   : > { %v8745_v23 = vpop.eup %8744 }
0x2b0c   : > { %v6023_v19 = vsel %vm2188_vm5, %v8745_v23, 0.0 }
0x2b0d   : > { %6024 = vadd.xlane.f32.xlu0 %v6023_v19  ;;  %v8623_v19 = vld [vmem:[%s10300_s12 + $0x28] sm:$0xff]  }
0x2b23   : > { %6030 = vrot.lane.b32.xlu0 %v9943_v54, %s10274_s3  ;;  %s10302_s3 = sld [smem:[#allocation53_spill]] }
0x2b27   : > { %6189 = vrot.lane.b32.xlu0 %v9954_v6, %s10275_s11  ;;  %v5912_v18 = vpop.xlane.xlu0 %5911 }
0x2b28   : > { %8746 = vrcp.f32 %v5912_v18 }
0x2b32   : > { %v8747_v25 = vpop.eup %8746 }
0x2b33   : > { %v5914_v26 = vmul.f32 %v8747_v25, %v8743_v16  ;;  %v8622_v16 = vld [vmem:[%s10300_s12 + $0x20] sm:$0xff]  }
0x2b35   : > { %v5915_v27 = vpack.c.bf16 %v5914_v26, %v5914_v26 }
0x2b37   : > { %8185 = vmatmul.mubr.msk.bf16.vlgmr.msra.gmra.mrb[108].mxu1 %vm2188_vm5, %v5915_v27 }
0x2b38   : > { %8196 = vmatprep.mubr.msk.bf16.mxu1 %vm8923_vm1, %v8922_v0 }
0x2b9a   : > { %v6025_v29 = vpop.xlane.xlu0 %6024 }
0x2b9b   : > { %8748 = vrcp.f32 %v6025_v29 }
0x2b9e   : > { %v6031_v30 = vpop.permute.xlu0 %6030 }
0x2b9f   : > { %v6036_v37 = vsel %vm2205_vm4, %v6031_v30, 0 }
0x2ba0   : > { %8195 = vmatpush3.bf16.msra.mxu1 %v6036_v37 }
0x2ba1   : > { %8208 = vmatprep.subr.bf16.mxu1 %v8922_v0 }
0x2ba2   : > { %v6190_v60 = vpop.permute.xlu0 %6189 }
0x2ba5   : > { %v8749_v31 = vpop.eup %8748 }
0x2ba6   : > { %v6027_v32 = vmul.f32 %v8749_v31, %v8745_v23 }
0x2ba8   : > { %v6028_v35 = vpack.c.bf16 %v6027_v32, %v6027_v32 }
0x2baa   : > { %8197 = vmatmul.mubr.msk.bf16.vlgmr.msra.gmra.mrb[112].mxu1 %vm2188_vm5, %v6028_v35 }
0x2bab   : > { %8209 = vmatpush3.bf16.msra.mxu1 %v8618_v34  ;;  %8212 = vmatprep.mubr.msk.bf16.mxu1 %vm8923_vm1, %v8922_v0 }
0x2bac   : > { %8210 = vmatprep.subr.bf16.mxu1 %v8922_v0 }
0x2baf   : > { %8211 = vmatpush3.bf16.msra.mxu1 %v8619_v1 }
0x2bb0   : > { %8222 = vmatprep.subr.bf16.mxu1 %v8922_v0 }
0x2c0a   : > { %v5957_v55 = vpop.f32.mrb[108].mxu1 }
0x2c0b   : > { %v5963_v4 = vpack.c.bf16 %v5957_v55, %v5957_v55  ;;  %v8186_v41 = vpop.f32.mrb[109].mxu1 }
0x2c0c   : > { %v5960_v42 = vpop.f32.mrb[110].mxu1 }
0x2c0d   : > { %v8187_v44 = vpop.f32.mrb[111].mxu1  ;;  %8213 = vmatmul.mubr.msk.bf16.vlgmr.msra.gmra.mrb[116].mxu1 %vm2140_vm3, %v5963_v4 }
0x2c0e   : > { %8224 = vmatprep.mubr.msk.bf16.mxu1 %vm8923_vm1, %v8922_v0  ;;  %v8624_v44 = vld [vmem:[%s10300_s12 + $0x30] sm:$0xff]  }
0x2c7d   : > { %v6072_v58 = vpop.f32.mrb[112].mxu1 }
0x2c7e   : > { %v6078_v51 = vpack.c.bf16 %v6072_v58, %v6072_v58  ;;  %v8198_v53 = vpop.f32.mrb[113].mxu1 }
0x2c7f   : > { %v6075_v57 = vpop.f32.mrb[114].mxu1 }
0x2c80   : > { %v8199_v59 = vpop.f32.mrb[115].mxu1  ;;  %8205 = vmatmul.mubr.msk.bf16.vlgmr.msra.gmra.mrb[100].mxu0 %vm2140_vm3, %v6078_v51 }
0x2c81   : > { %8217 = vmatpush3.bf16.xpose.msra.mxu0 %v6197_v56  ;;  %8218 = vmatprep.mubr.msk.bf16.mxu0 %vm8923_vm1, %v8922_v0 }
0x2c82   : > { %8228 = vmatprep.subr.bf16.mxu0 %v8922_v0 }
0x2c88   : > { %8219 = vmatmul.mubr.msk.bf16.vlgmr.msra.gmra.mrb[104].mxu0 %vm2140_vm3, %v6190_v60 }
0x2c89   : > { %8232 = vmatprep.mubr.msk.bf16.mxu0 %vm8923_vm1, %v8922_v0  ;;  %8229 = vmatpush3.bf16.msra.mxu0 %v8622_v16  ;;  %v8637_v16 = vld [vmem:[%s10302_s3 + $0x34] ss:$8 sps:$4 sm:$0xff]  }
0x2c8a   : > { %8230 = vmatprep.subr.bf16.mxu0 %v8922_v0 }
0x2c8d   : > { %8231 = vmatpush3.bf16.msra.mxu0 %v8623_v19  ;;  %v8649_v19 = vld [vmem:[%s10302_s3 + $0x74] ss:$8 sps:$4 sm:$0xff]  }
0x2c8e   : > { %8242 = vmatprep.subr.bf16.mxu0 %v8922_v0 }
0x2ce0   : > { %v6183_v61 = vpop.f32.mrb[116].mxu1 }
0x2ce1   : > { %v8214_v62 = vpop.f32.mrb[117].mxu1 }
0x2ce2   : > { %v6186_v63 = vpop.f32.mrb[118].mxu1 }
0x2ce3   : > { %v8215_v5 = vpop.f32.mrb[119].mxu1 }
0x2d53   : > { %v6128_v36 = vpop.f32.mrb[100].mxu0 }
0x2d54   : > { %v10004_v7 = vadd.f32 %v6183_v61, %v6128_v36  ;;  %v8206_v2 = vpop.f32.mrb[101].mxu0  ;;  %v8625_v61 = vld [vmem:[%s10300_s12 + $0x38] sm:$0xff]  }
0x2d55   : > { %v6131_v3 = vpop.f32.mrb[102].mxu0 }
0x2d56   : > { %v8207_v9 = vpop.f32.mrb[103].mxu0 }
0x2d5b   : > { %v6233_v11 = vpop.f32.mrb[104].mxu0 }
0x2d5c   : > { %v6239_v43 = vmul.f32 0.17677669, %v6233_v11  ;;  %v8220_v39 = vpop.f32.mrb[105].mxu0 }
0x2d5d   : > { %v6236_v24 = vpop.f32.mrb[106].mxu0 }
0x2d5e   : > { %v8221_v12 = vpop.f32.mrb[107].mxu0  ;;  %v6240_v13 = vsel %vm2188_vm5, %v6239_v43, -inf }
0x2d5f   : > { %6241 = vmax.xlane.f32.xlu0 %v6240_v13  ;;  %v8626_v12 = vld [vmem:[%s10302_s3] ss:$8 sps:$4 sm:$0xff]   ;;  %v8628_v13 = vld [vmem:[%s10302_s3 + $0x4] ss:$8 sps:$4 sm:$0xff]  }
0x2d75   : > { %6252 = vrot.lane.b32.xlu0 %v9943_v54, %s10275_s11  ;;  %s10303_s11 = sld [smem:[#allocation55_spill]] }
0x2d79   : > { %6357 = vrot.lane.b32.xlu0 %v9954_v6, %s10277_s5 }
0x2dec   : > { %v6242_v8 = vpop.xlane.xlu0 %6241 }
0x2ded   : > { %v6243_v14 = vsub.f32 %v6239_v43, %v6242_v8  ;;  %v8631_v8 = vld [vmem:[%s10302_s3 + $0x14] ss:$8 sps:$4 sm:$0xff]  }
0x2def   : > { %v6244_v46 = vmul.f32 1.442695, %v6243_v14  ;;  %v8629_v14 = vld [vmem:[%s10302_s3 + $0x10] ss:$8 sps:$4 sm:$0xff]  }
0x2df0   : > { %v6253_v40 = vpop.permute.xlu0 %6252 }
0x2df1   : > { %8750 = vpow2.f32 %v6244_v46  ;;  %v6258_v10 = vsel %vm2205_vm4, %v6253_v40, 0  ;;  %v8634_v46 = vld [vmem:[%s10302_s3 + $0x24] ss:$8 sps:$4 sm:$0xff]   ;;  %v8632_v40 = vld [vmem:[%s10302_s3 + $0x20] ss:$8 sps:$4 sm:$0xff]  }
0x2df2   : > { %8223 = vmatpush3.bf16.msra.mxu1 %v6258_v10 }
0x2df3   : > { %8236 = vmatprep.subr.bf16.mxu1 %v8922_v0 }
0x2dfb   : > { %v8751_v15 = vpop.eup %8750 }
0x2dfc   : > { %v6246_v45 = vsel %vm2188_vm5, %v8751_v15, 0.0 }
0x2dfd   : > { %6247 = vadd.xlane.f32.xlu1 %v6246_v45 }
0x2e0e   : > { %6359 = vrot.lane.b32.xlu1 %v9941_v52, %s10277_s5  ;;  %v6358_v52 = vpop.permute.xlu0 %6357 }
0x2e8a   : > { %v6248_v6 = vpop.xlane.xlu1 %6247 }
0x2e8b   : > { %8752 = vrcp.f32 %v6248_v6  ;;  %v8635_v6 = vld [vmem:[%s10302_s3 + $0x30] ss:$8 sps:$4 sm:$0xff]  }
0x2e8e   : > { %v6360_v21 = vpop.permute.xlu1 %6359 }
0x2e8f   : > { %v6365_v23 = vsel %vm2140_vm3, %v6360_v21, 0  ;;  %v8643_v21 = vld [vmem:[%s10302_s3 + $0x54] ss:$8 sps:$4 sm:$0xff]  }
0x2e95   : > { %v8753_v17 = vpop.eup %8752 }
0x2e96   : > { %v6250_v20 = vmul.f32 %v8753_v17, %v8751_v15  ;;  %v8640_v17 = vld [vmem:[%s10302_s3 + $0x44] ss:$8 sps:$4 sm:$0xff]  }
0x2e98   : > { %v6251_v22 = vpack.c.bf16 %v6250_v20, %v6250_v20  ;;  %v8638_v20 = vld [vmem:[%s10302_s3 + $0x40] ss:$8 sps:$4 sm:$0xff]  }
0x2e9a   : > { %8225 = vmatmul.mubr.msk.bf16.vlgmr.msra.gmra.mrb[120].mxu1 %vm2188_vm5, %v6251_v22  ;;  %v8641_v22 = vld [vmem:[%s10302_s3 + $0x50] ss:$8 sps:$4 sm:$0xff]  }
0x2e9b   : > { %8237 = vmatpush3.bf16.xpose.msra.mxu1 %v6365_v23  ;;  %8238 = vmatprep.mubr.msk.bf16.mxu1 %vm8923_vm1, %v8922_v0  ;;  %v8646_v23 = vld [vmem:[%s10302_s3 + $0x64] ss:$8 sps:$4 sm:$0xff]  }
0x2e9c   : > { %8248 = vmatprep.subr.bf16.mxu1 %v8922_v0 }
0x2ea2   : > { %8239 = vmatmul.mubr.msk.bf16.vlgmr.msra.gmra.mrb[124].mxu1 %vm2140_vm3, %v6358_v52  ;;  %v8644_v52 = vld [vmem:[%s10302_s3 + $0x60] ss:$8 sps:$4 sm:$0xff]  }
0x2ea3   : > { %8252 = vmatprep.mubr.msk.bf16.mxu1 %vm8923_vm1, %v8922_v0  ;;  %8249 = vmatpush3.bf16.msra.mxu1 %v8624_v44  ;;  %v8657_v44 = vld [vmem:[%s10303_s11 + $0x18] sm:$0xff]  }
0x2ea4   : > { %8250 = vmatprep.subr.bf16.mxu1 %v8922_v0 }
0x2ea7   : > { %8251 = vmatpush3.bf16.msra.mxu1 %v8625_v61 }
0x2f6d   : > { %v6294_v18 = vpop.f32.mrb[120].mxu1 }
0x2f6e   : > { %v6300_v25 = vpack.c.bf16 %v6294_v18, %v6294_v18  ;;  %v8226_v26 = vpop.f32.mrb[121].mxu1  ;;  %v8647_v18 = vld [vmem:[%s10302_s3 + $0x70] ss:$8 sps:$4 sm:$0xff]   ;;  %s7613_s3 = sshll.u32 %s9251_s0, 7 }
0x2f6f   : > { %v6297_v27 = vpop.f32.mrb[122].mxu1  ;;  %v8651_v26 = vld [vmem:[%s10303_s11] sm:$0xff]   ;;  %s10115_s12 = scalar_lea.hbm %s9218_s27, %s7613_s3 }
0x2f70   : > { %v8227_v50 = vpop.f32.mrb[123].mxu1  ;;  %8233 = vmatmul.mubr.msk.bf16.vlgmr.msra.gmra.mrb[108].mxu0 %vm2140_vm3, %v6300_v25  ;;  %v8650_v25 = vld [vmem:[%s10303_s11 + $0x40] sm:$0xff]   ;;  %v8652_v27 = vld [vmem:[%s10303_s11 + $0x48] sm:$0xff]  }
0x2f71   : > { %8244 = vmatprep.mubr.msk.bf16.mxu0 %vm8923_vm1, %v8922_v0  ;;  %7813 = vmatprep.subr.bf16.mxu1 %v8650_v25  ;;  %v8653_v50 = vld [vmem:[%s10303_s11 + $0x8] sm:$0xff]  }
0x2f75   : > { %v6401_v28 = vpop.f32.mrb[124].mxu1 }
0x2f76   : > { %v6407_v29 = vmul.f32 0.17677669, %v6401_v28  ;;  %v8240_v30 = vpop.f32.mrb[125].mxu1 }
0x2f77   : > { %v6404_v37 = vpop.f32.mrb[126].mxu1 }
0x2f78   : > { %v8241_v31 = vpop.f32.mrb[127].mxu1  ;;  %v6408_v32 = vsel %vm2188_vm5, %v6407_v29, -inf }
0x2f79   : > { %6409 = vmax.xlane.f32.xlu0 %v6408_v32  ;;  %v7563_v31 = vld [vmem:[%s10304_s9] ss:$0 sm:$0xff]  ;;  %s10308_s9 = sld [smem:[#allocation51_spill]] }
0x2f7f   : > { %v7598_v25 = vld [vmem:[%s10308_s9] ss:$0 sm:$0xff]  ;;  %s10312_s9 = sld [smem:[#allocation58_spill]] }
0x2f8f   : > { %6420 = vrot.lane.b32.xlu0 %v9943_v54, %s10277_s5  ;;  %s10301_s5 = sld [smem:[#allocation46_spill]] }
0x2f95   : > { %v7562_v3 = vld [vmem:[%s10301_s5] ss:$0 sm:$0xff]  ;;  %s10307_s5 = sld [smem:[#allocation56_spill]] }
0x3006   : > { %v6410_v34 = vpop.xlane.xlu0 %6409 }
0x3007   : > { %v6411_v35 = vsub.f32 %v6407_v29, %v6410_v34  ;;  %v7564_v34 = vld [vmem:[%s10305_s8] ss:$0 sm:$0xff]  ;;  %s10309_s8 = sld [smem:[#allocation52_spill]] }
0x3009   : > { %v6412_v1 = vmul.f32 1.442695, %v6411_v35 }
0x300a   : > { %v6421_v55 = vpop.permute.xlu0 %6420 }
0x300b   : > { %8754 = vpow2.f32 %v6412_v1  ;;  %v6426_v4 = vsel %vm2205_vm4, %v6421_v55, 0 }
0x300c   : > { %8243 = vmatpush3.bf16.msra.mxu0 %v6426_v4  ;;  %v8654_v4 = vld [vmem:[%s10303_s11 + $0x50] sm:$0xff]  }
0x300d   : > { %6670 = vmatprep.subr.bf16.mxu0 %v8628_v13 }
0x3015   : > { %v8755_v41 = vpop.eup %8754 }
0x3016   : > { %v6414_v42 = vsel %vm2188_vm5, %v8755_v41, 0.0 }
0x3017   : > { %6415 = vadd.xlane.f32.xlu1 %v6414_v42  ;;  %v8656_v42 = vld [vmem:[%s10303_s11 + $0x58] sm:$0xff]  }
0x3043   : > { %v6350_v48 = vpop.f32.mrb[108].mxu0 }
0x3044   : > { %v6356_v54 = vadd.f32 %v6350_v48, %v10004_v7  ;;  %v8234_v58 = vpop.f32.mrb[109].mxu0  ;;  %v8658_v48 = vld [vmem:[%s10303_s11 + $0x60] sm:$0xff]  }
0x3045   : > { %v6353_v51 = vpop.f32.mrb[110].mxu0  ;;  %v8660_v58 = vld [vmem:[%s10303_s11 + $0x68] sm:$0xff]  }
0x3046   : > { %v8235_v53 = vpop.f32.mrb[111].mxu0  ;;  %v8661_v51 = vld [vmem:[%s10303_s11 + $0x28] sm:$0xff]  }
0x3047   : > { %v8662_v53 = vld [vmem:[%s10303_s11 + $0x70] sm:$0xff]  }
0x30a4   : > { %v6416_v57 = vpop.xlane.xlu1 %6415 }
0x30a5   : > { %8756 = vrcp.f32 %v6416_v57  ;;  %v8663_v57 = vld [vmem:[%s10303_s11 + $0x30] sm:$0xff]  }
0x30af   : > { %v8757_v56 = vpop.eup %8756 }
0x30b0   : > { %v6418_v59 = vmul.f32 %v8757_v56, %v8755_v41  ;;  %v8655_v41 = vld [vmem:[%s10303_s11 + $0x10] sm:$0xff]   ;;  %v8664_v56 = vld [vmem:[%s10303_s11 + $0x78] sm:$0xff]  }
0x30b2   : > { %v6419_v60 = vpack.c.bf16 %v6418_v59, %v6418_v59  ;;  %v8665_v59 = vld [vmem:[%s10303_s11 + $0x38] sm:$0xff]  }
0x30b4   : > { %8245 = vmatmul.mubr.msk.bf16.vlgmr.msra.gmra.mrb[112].mxu0 %vm2188_vm5, %v6419_v60  ;;  %v6578_v60 = vld [vmem:[%s10306_s1] sm:$0x3]  ;;  %s10310_s1 = sld [smem:[#allocation59_spill]] }
0x30b5   : > { %6702 = vmatprep.mubr.bf16.mxu0 %v8924_v33  ;;  %6671 = vmatpush1.bf16.msra.mxu0 %v8626_v12  ;;  %v6583_v61 = vrot.slane %v6578_v60, %v9350_v49 }
0x30b6   : > { %6672 = vmatprep.subr.bf16.mxu0 %v8631_v8 }
0x30b9   : > { %6673 = vmatpush1.bf16.msra.mxu0 %v8629_v14 }
0x30ba   : > { %6674 = vmatprep.subr.bf16.mxu0 %v8634_v46 }
0x30bd   : > { %6675 = vmatpush1.bf16.msra.mxu0 %v8632_v40  ;;  %v7581_v40 = vld [vmem:[%s10307_s5] ss:$0 sm:$0xff]  ;;  %s10311_s5 = sld [smem:[#allocation57_spill]] }
0x30be   : > { %6676 = vmatprep.subr.bf16.mxu0 %v8637_v16 }
0x30c1   : > { %6677 = vmatpush1.bf16.msra.mxu0 %v8635_v6 }
0x30c2   : > { %6678 = vmatprep.subr.bf16.mxu0 %v8640_v17 }
0x30c5   : > { %6679 = vmatpush1.bf16.msra.mxu0 %v8638_v20 }
0x30c6   : > { %6680 = vmatprep.subr.bf16.mxu0 %v8643_v21 }
0x30c9   : > { %6681 = vmatpush1.bf16.msra.mxu0 %v8641_v22 }
0x30ca   : > { %6682 = vmatprep.subr.bf16.mxu0 %v8646_v23 }
0x30cd   : > { %6683 = vmatpush1.bf16.msra.mxu0 %v8644_v52 }
0x30ce   : > { %6684 = vmatprep.subr.bf16.mxu0 %v8649_v19 }
0x30d1   : > { %6685 = vmatpush1.bf16.msra.mxu0 %v8647_v18 }
0x30d2   : > { %8256 = vmatprep.subr.bf16.mxu0 %v8922_v0 }
0x3187   : > { %v6462_v62 = vpop.f32.mrb[112].mxu0 }
0x3188   : > { %v6468_v63 = vpack.c.bf16 %v6462_v62, %v6462_v62  ;;  %v8246_v5 = vpop.f32.mrb[113].mxu0  ;;  %v6587_v62 = vrot.slane %v6578_v60, %v9346_v47 }
0x3189   : > { %v6465_v36 = vpop.f32.mrb[114].mxu0 }
0x318a   : > { %v8247_v7 = vpop.f32.mrb[115].mxu0  ;;  %8253 = vmatmul.mubr.msk.bf16.vlgmr.msra.gmra.mrb[128].mxu1 %vm2140_vm3, %v6468_v63 }
0x318b   : > { %7814 = vmatpush3.bf16.msra.mxu1 %v8651_v26 }
0x318c   : > { %7815 = vmatprep.subr.bf16.mxu1 %v8652_v27  ;;  %v7599_v27 = vld [vmem:[%s10309_s8] ss:$0 sm:$0xff]  ;;  %s10313_s8 = sshll.u32 %s9906_s6, 3 }
0x318f   : > { %7816 = vmatpush3.bf16.msra.mxu1 %v8653_v50 }
0x3190   : > { %7817 = vmatprep.subr.bf16.mxu1 %v8654_v4  ;;  %v8671_v4 = vld [vmem:[%s10310_s1 + $0x28] sm:$0xff]  }
0x3193   : > { %7818 = vmatpush3.bf16.msra.mxu1 %v8655_v41  ;;  %v8672_v41 = vld [vmem:[%s10310_s1 + $0x30] sm:$0xff]  }
0x3194   : > { %7819 = vmatprep.subr.bf16.mxu1 %v8656_v42  ;;  %v8673_v42 = vld [vmem:[%s10310_s1 + $0x38] sm:$0xff]  }
0x3197   : > { %7820 = vmatpush3.bf16.msra.mxu1 %v8657_v44 }
0x3198   : > { %7821 = vmatprep.subr.bf16.mxu1 %v8658_v48 }
0x325d   : > { %v6518_v2 = vpop.f32.mrb[128].mxu1 }
0x325e   : > { %v6524_v9 = vadd.f32 %v6518_v2, %v6356_v54  ;;  %v8254_v11 = vpop.f32.mrb[129].mxu1  ;;  %v8659_v54 = vld [vmem:[%s10303_s11 + $0x20] sm:$0xff]   ;;  %s7090_s11 = sshll.u32 %s9916_s13, 4  ;;  %s7091_s11 = int_to_ptr.vmem [resolvable:$true] %s7090_s11 }
0x325f   : > { %v6521_v33 = vpop.f32.mrb[130].mxu1  ;;  %7822 = vmatpush3.bf16.msra.mxu1 %v8659_v54 }
0x3260   : > { %v6532_v43 = vadd.f32 %v7562_v3, %v6524_v9  ;;  %v8255_v39 = vpop.f32.mrb[131].mxu1  ;;  %7823 = vmatprep.subr.bf16.mxu1 %v8660_v58 }
0x3262   : > { %v6533_v24 = vadd.f32 %v6532_v43, %v9932_v38 }
0x3263   : > { %7824 = vmatpush3.bf16.msra.mxu1 %v8661_v51  ;;  %v7600_v51 = vld [vmem:[%s10311_s5] ss:$0 sm:$0xff]  ;;  %s8768_s5 = scalar_lea.vmem %s7091_s11, 128 }
0x3264   : > { %6536 = vadd.xlane.f32.xlu1 %v6533_v24  ;;  %7825 = vmatprep.subr.bf16.mxu1 %v8662_v53  ;;  %p8769_p11 = scmp.ne.s32.totalorder %s7091_s11, %s8768_s5 }
0x3266   : > { %p8770_p12 = pnand %p8769_p11, %p9268_p5 }
0x3267   : > { %7826 = vmatpush3.bf16.msra.mxu1 %v8663_v57  ;;  %v7601_v57 = vld [vmem:[%s10312_s9] ss:$0 sm:$0xff]  ;;  %s8928_s9 = smov [#allocation2]  }
0x3268   : > { %7827 = vmatprep.subr.bf16.mxu1 %v8664_v56  ;;  %p8771_p13 = pneg %p8770_p12  ;;  %s8772_s17 = sshll.u32 %s8928_s9, 4  ;;  %s8773_s17 = int_to_ptr.vmem [resolvable:$false] %s8772_s17 }
0x3269   : > { %p8775_p0 = scmp.lt.s32.totalorder %s7091_s11, %s8773_s17 }
0x326b   : > { %7828 = vmatpush3.bf16.msra.mxu1 %v8665_v59 }
0x32f1   : > { %v6537_v38 = vpop.xlane.xlu1 %6536 }
0x32f2   : > { %v6538_v10 = vmul.f32 0.0078125, %v6537_v38 }
0x32f4   : > { %v6539_v15 = vsub.f32 %v6533_v24, %v6538_v10 }
0x32f6   : > { %v6540_v45 = vmul.f32 %v6539_v15, %v6539_v15 }
0x32f8   : > { %6541 = vadd.xlane.f32.xlu1 %v6540_v45 }
0x3385   : > { %v6542_v28 = vpop.xlane.xlu1 %6541 }
0x3386   : > { %v6543_v29 = vmul.f32 0.0078125, %v6542_v28 }
0x3388   : > { %v6544_v30 = vadd.f32 1e-05, %v6543_v29  ;;  %v8666_v29 = vld [vmem:[%s10310_s1] sm:$0xff]  }
0x338a   : > { %8758 = vrsqrt.f32 %v6544_v30  ;;  %v8667_v30 = vld [vmem:[%s10310_s1 + $0x8] sm:$0xff]  }
0x3394   : > { %v8759_v37 = vpop.eup %8758 }
0x3395   : > { %v6546_v32 = vmul.f32 %v8759_v37, %v6539_v15 }
0x3397   : > { %v6553_v35 = vmul.f32 %v7563_v31, %v6546_v32 }
0x3399   : > { %v6560_v1 = vadd.f32 %v7564_v34, %v6553_v35  ;;  %v8668_v35 = vld [vmem:[%s10310_s1 + $0x10] sm:$0xff]  }
0x339b   : > { %v6577_v55 = vpack.c.bf16 %v6560_v1, %v6560_v1 }
0x339d   : > { %6703 = vmatmul.mubr.bf16.vlgmr.msra.gmra.mrb[116].mxu0 %v6577_v55  ;;  %v8670_v55 = vld [vmem:[%s10310_s1 + $0x20] sm:$0xff]  }
0x339e   : > { %8272 = vmatprep.mubr.msk.bf16.mxu0 %vm8923_vm1, %v8922_v0  ;;  %8257 = vmatpush3.bf16.msra.mxu0 %v8666_v29 }
0x339f   : > { %8258 = vmatprep.subr.bf16.mxu0 %v8922_v0 }
0x33a2   : > { %8259 = vmatpush3.bf16.msra.mxu0 %v8667_v30 }
0x33a3   : > { %8260 = vmatprep.subr.bf16.mxu0 %v8922_v0 }
0x33a6   : > { %8261 = vmatpush3.bf16.msra.mxu0 %v8668_v35 }
0x33a7   : > { %8262 = vmatprep.subr.bf16.mxu0 %v8922_v0 }
0x3470   : > { %v6704_v63 = vpop.f32.mrb[116].mxu0 }
0x3471   : > { %v6705_v5 = vadd.f32 %v6704_v63, %v6583_v61  ;;  %v6706_v36 = vpop.f32.mrb[117].mxu0 }
0x3472   : > { %v6707_v7 = vadd.f32 %v6706_v36, %v6587_v62  ;;  %v6708_v2 = vpop.f32.mrb[118].mxu0 }
0x3473   : > { %v6713_v3 = vmul.f32 0.70710677, %v6705_v5  ;;  %v6709_v9 = vpop.f32.mrb[119].mxu0  ;;  %v6711_v39 = vmul.f32 0.5, %v6705_v5 }
0x3474   : > { %v6714_v11 = vmul.f32 0.70710677, %v6707_v7  ;;  %v6712_v12 = vmul.f32 0.5, %v6707_v7 }
0x3475   : > { %8760 = verf.f32 %v6713_v3 }
0x3476   : > { %8762 = verf.f32 %v6714_v11 }
0x347f   : > { %v8761_v33 = vpop.eup %8760 }
0x3480   : > { %v8763_v43 = vpop.eup %8762  ;;  %v6717_v24 = vadd.f32 1.0, %v8761_v33 }
0x3481   : > { %v6718_v13 = vadd.f32 1.0, %v8763_v43 }
0x3482   : > { %v6719_v49 = vmul.f32 %v6717_v24, %v6711_v39 }
0x3483   : > { %v6720_v8 = vmul.f32 %v6718_v13, %v6712_v12 }
0x3484   : > { %v6753_v14 = vpack.c.bf16 %v6719_v49, %v6719_v49 }
0x3485   : > { %v6754_v47 = vpack.c.bf16 %v6720_v8, %v6720_v8 }
0x3487   : > { %6890 = vmatprep.mubr.bf16.mxu1 %v6754_v47 }
0x3488   : > { %6891 = vmatmul.mubr.bf16.vlgmr.msra.gmra.mrb[132].mxu1 %v6753_v14 }
0x355b   : > { %v7829_v46 = vpop.f32.mrb[132].mxu1 }
0x355c   : > { %v7830_v38 = vpop.f32.mrb[133].mxu1 }
0x355d   : > { %v7831_v10 = vadd.f32 %v7830_v38, %v7829_v46  ;;  %v7832_v15 = vpop.f32.mrb[134].mxu1 }
0x355e   : > { %v7833_v45 = vpop.f32.mrb[135].mxu1 }
0x355f   : > { %v6893_v16 = vadd.f32 %v7831_v10, %v7581_v40 }
0x3561   : > { %v6898_v6 = vadd.f32 %v6893_v16, %v6560_v1  ;;  %v8669_v1 = vld [vmem:[%s10310_s1 + $0x18] sm:$0xff]   ;;  %s10107_s1 = scalar_lea.vmem [#allocation4], %s10313_s8  ;;  %s8774_s8 = scalar_lea.vmem %s8773_s17, 256 }
0x3562   : > { %8263 = vmatpush3.bf16.msra.mxu0 %v8669_v1  ;;  %p8776_p1 = scmp.lt.s32.totalorder %s8774_s8, %s8768_s5 }
0x3563   : > { %6901 = vadd.xlane.f32.xlu1 %v6898_v6  ;;  %8264 = vmatprep.subr.bf16.mxu0 %v8922_v0 }
0x3564   : > { %p8777_p2 = por %p8776_p1, %p8775_p0 }
0x3566   : > { %8265 = vmatpush3.bf16.msra.mxu0 %v8670_v55  ;;  %p8778_p3 = pnand %p8777_p2, %p8771_p13 }
0x3567   : > { %8266 = vmatprep.subr.bf16.mxu0 %v8922_v0 }
0x356a   : > { %8267 = vmatpush3.bf16.msra.mxu0 %v8671_v4 }
0x356b   : > { %8268 = vmatprep.subr.bf16.mxu0 %v8922_v0 }
0x356e   : > { %8269 = vmatpush3.bf16.msra.mxu0 %v8672_v41 }
0x356f   : > { %8270 = vmatprep.subr.bf16.mxu0 %v8922_v0 }
0x3572   : > { %8271 = vmatpush3.bf16.msra.mxu0 %v8673_v42 }
0x35f0   : > { %v6902_v17 = vpop.xlane.xlu1 %6901 }
0x35f1   : > { %v6903_v20 = vmul.f32 0.0078125, %v6902_v17 }
0x35f3   : > { %v6904_v21 = vsub.f32 %v6898_v6, %v6903_v20 }
0x35f5   : > { %v6905_v22 = vmul.f32 %v6904_v21, %v6904_v21 }
0x35f7   : > { %6906 = vadd.xlane.f32.xlu1 %v6905_v22 }
0x3684   : > { %v6907_v23 = vpop.xlane.xlu1 %6906 }
0x3685   : > { %v6908_v52 = vmul.f32 0.0078125, %v6907_v23 }
0x3687   : > { %v6909_v19 = vadd.f32 1e-05, %v6908_v52 }
0x3689   : > { %8764 = vrsqrt.f32 %v6909_v19 }
0x3693   : > { %v8765_v18 = vpop.eup %8764 }
0x3694   : > { %v6911_v26 = vmul.f32 %v8765_v18, %v6904_v21 }
0x3696   : > { %v6918_v50 = vmul.f32 %v7598_v25, %v6911_v26 }
0x3698   : > { %v6925_v28 = vadd.f32 %v7599_v27, %v6918_v50 }
0x369a   : > { %6928 = vadd.xlane.f32.xlu0 %v6925_v28 }
0x3727   : > { %v6929_v37 = vpop.xlane.xlu0 %6928 }
0x3728   : > { %v6930_v31 = vmul.f32 0.0078125, %v6929_v37 }
0x372a   : > { %v6931_v32 = vsub.f32 %v6925_v28, %v6930_v31 }
0x372c   : > { %v6932_v34 = vmul.f32 %v6931_v32, %v6931_v32 }
0x372e   : > { %6933 = vadd.xlane.f32.xlu1 %v6932_v34 }
0x37bb   : > { %v6934_v44 = vpop.xlane.xlu1 %6933 }
0x37bc   : > { %v6935_v48 = vmul.f32 0.0078125, %v6934_v44 }
0x37be   : > { %v6936_v54 = vadd.f32 1e-05, %v6935_v48 }
0x37c0   : > { %8766 = vrsqrt.f32 %v6936_v54 }
0x37ca   : > { %v8767_v58 = vpop.eup %8766 }
0x37cb   : > { %v6938_v53 = vmul.f32 %v8767_v58, %v6931_v32 }
0x37cd   : > { %v6945_v56 = vmul.f32 %v7600_v51, %v6938_v53 }
0x37cf   : > { %v6952_v59 = vadd.f32 %v7601_v57, %v6945_v56 }
0x37d1   : > { %v6970_v60 = vpack.c.bf16 %v6952_v59, %v6952_v59  ;;  %6953 = vst [vmem:[%s10107_s1] sm:$0xff] %v6952_v59 }
0x37d3   : > { %8273 = vmatmul.mubr.bf16.vlgmr.msra.gmra.mrb[120].mxu0 %v6970_v60 }
0x37d4   : > { %8781 = shalt.err (!%p8778_p3)
}
0x37d5   : > { %s8782_s13 = scalar_lea.hbm %s10115_s12, 128  ;;  %s8786_s9 = scalar_lea.hbm %s9218_s27, 256 }
0x37d6   : > { %p8783_p4 = scmp.ne.s32.totalorder %s10115_s12, %s8782_s13  ;;  %p8787_p9 = scmp.lt.u32.totalorder %s10115_s12, %s9218_s27 }
0x37d7   : > { %p8788_p10 = scmp.lt.u32.totalorder %s8786_s9, %s8782_s13  ;;  %p8790_p12 = scmp.lt.u32.totalorder %s8782_s13, %s10115_s12 }
0x37d8   : > { %p8784_p7 = pnand %p8783_p4, %p9268_p5 }
0x37d9   : > { %p8789_p11 = por %p8788_p10, %p8787_p9 }
0x37da   : > { %p8785_p8 = pneg %p8784_p7 }
0x37db   : > { %p8791_p0 = por %p8790_p12, %p8789_p11 }
0x37dd   : > { %p8792_p13 = pnand %p8791_p0, %p8785_p8 }
0x37df   : > { %8795 = shalt.err (!%p8792_p13)
}
0x37e0   : > { %8276 = dma.vmem_to_hbm [thread:$0]  (%p9268_p5), %s7091_s11, 128, %s10115_s12, %s7068_s14  }
0x37e1   : > { %s10134_s17 = scalar_lea.hbm %s9223_s4, %s7613_s3  ;;  %s7103_s5 = sshll.u32 %s10107_s1, 4  ;;  %s7104_s5 = int_to_ptr.vmem [resolvable:$true] %s7103_s5 }
0x37e2   : > { %s7073_s8 = scalar_lea.sflag [#allocation5], %s9906_s6  ;;  %s8796_s9 = scalar_lea.vmem %s7104_s5, 128 }
0x37e3   : > { %p8797_p1 = scmp.ne.s32.totalorder %s7104_s5, %s8796_s9  ;;  %s8929_s13 = smov [#allocation4]  }
0x37e4   : > { %s8800_s19 = sshll.u32 %s8929_s13, 4  ;;  %s8801_s19 = int_to_ptr.vmem [resolvable:$false] %s8800_s19 }
0x37e5   : > { %p8798_p2 = pnand %p8797_p1, %p9268_p5  ;;  %s8802_s21 = scalar_lea.vmem %s8801_s19, 256 }
0x37e6   : > { %p8803_p4 = scmp.lt.s32.totalorder %s7104_s5, %s8801_s19  ;;  %p8804_p7 = scmp.lt.s32.totalorder %s8802_s21, %s8796_s9 }
0x37e7   : > { %p8799_p3 = pneg %p8798_p2 }
0x37e8   : > { %p8805_p8 = por %p8804_p7, %p8803_p4 }
0x37ea   : > { %p8806_p9 = pnand %p8805_p8, %p8799_p3 }
0x37ec   : > { %8809 = shalt.err (!%p8806_p9)
}
0x37ed   : > { %s8810_s14 = scalar_lea.hbm %s10134_s17, 128  ;;  %s8814_s0 = scalar_lea.hbm %s9223_s4, 256 }
0x37ee   : > { %p8811_p10 = scmp.ne.s32.totalorder %s10134_s17, %s8810_s14  ;;  %p8815_p0 = scmp.lt.u32.totalorder %s10134_s17, %s9223_s4 }
0x37ef   : > { %p8816_p13 = scmp.lt.u32.totalorder %s8814_s0, %s8810_s14  ;;  %p8818_p2 = scmp.lt.u32.totalorder %s8810_s14, %s10134_s17 }
0x37f0   : > { %p8812_p11 = pnand %p8811_p10, %p9268_p5 }
0x37f1   : > { %p8817_p1 = por %p8816_p13, %p8815_p0 }
0x37f2   : > { %p8813_p12 = pneg %p8812_p11 }
0x37f3   : > { %p8819_p4 = por %p8818_p2, %p8817_p1 }
0x37f5   : > { %p8820_p3 = pnand %p8819_p4, %p8813_p12 }
0x37f7   : > { %8823 = shalt.err (!%p8820_p3)
}
0x37f8   : > { %8277 = dma.vmem_to_hbm [thread:$0]  (%p9268_p5), %s7104_s5, 128, %s10134_s17, %s7073_s8   ;;  %v7602_v0 = vld [vmem:[%s9213_s20] ss:$0 sm:$0xff] }
0x37f9   : > { %s1747_s21 = scalar_lea.vmem %s9228_s25, %s9289_s23 }
0x38a6   : > { %v7060_v61 = vpop.f32.mrb[120].mxu0 }
0x38a7   : > { %v7061_v62 = vadd.f32 %v7602_v0, %v7060_v61  ;;  %v8274_v63 = vpop.f32.mrb[121].mxu0 }
0x38a8   : > { %v7063_v5 = vpop.f32.mrb[122].mxu0 }
0x38a9   : > { %7066 = vst [vmem:[%s1747_s21] sm:$0xff] %v7061_v62  ;;  %v8275_v36 = vpop.f32.mrb[123].mxu0 }
0x38aa PF: > { %p8287_p7 = scmp.ge.s32.totalorder %s8862_s22, 2  ;;  %s7118_s19 = sand.u32 1, %s8850_s15  }
0x38ab   : > { %s7119_s7 = scalar_lea.sflag [#allocation3], %s7118_s19 }
0x38ac   : > { %p8281_p8 = pnand %p8287_p7, %p9272_p6 }
0x38ae   : > { %8841 = dma.done.wait (!%p8281_p8), %s7119_s7, 128  }
0x38af   : > { %8843 = vsyncadd (!%p8281_p8), %s7119_s7, 4294967168  ;;  %s7128_s6 = scalar_lea.sflag [#allocation5], %s7118_s19 }
0x38b0   : > { %8845 = dma.done.wait (!%p8281_p8), %s7128_s6, 128  }
0x38b1   : > { %8847 = vsyncadd (!%p8281_p8), %s7128_s6, 4294967168  ;;  %p131_p5 = scmp.ge.s32.totalorder %s9255_s26, 4   ;;  %s10314_s15 = smov %s8854_s16 }
0x38b2   : > { %s10315_s16 = smov %s8858_s18  ;;  %s10316_s18 = smov %s9266_s2 }
0x38b3   : > { %s10317_s22 = smov %s9255_s26  ;;  %133 = sbr.rel (!%p131_p5) target bundleno = 135 (0x87), region = 369 }
0x38ba   :  { %7140 = vsyncpa [#allocation3], 1 }
0x38bb   :  { %7142 = vsyncpa [#allocation3 + $0x1], 1 }
0x38bc   :  { %7143 = vsyncpa [#allocation5], 1 }
0x38bd   :  { %7145 = vsyncpa [#allocation5 + $0x1], 1 }

</bundles_post_ra>
